<compile_context>
chip_gen: v6e
topology: v6e:2x2x1
jax: 0.10.0
libtpu: 0.0.40
codegen_flags: <defaults>
</compile_context>

<pallas_src>
import functools

import numpy as np
import jax
import jax.numpy as jnp
from jax import lax
from jax.experimental import pallas as pl
from jax.experimental.pallas import tpu as pltpu

CI, CO, K, STRIDE, PAD = 4, 2, 4, 2, 1          # ConvTranspose2d(4, 2, 4, stride=2, padding=1)
POOL_K, POOL_S, POOL_P = 8, 2, 1                # avg_pool2d(kernel=8, stride=2, padding=1, ceil_mode=True)
NEG_SLOPE = -0.4
HT_LO, HT_HI = -6.027711750132898, 6.027711750132898


def _pool_out_size(L):
    # PyTorch ceil_mode=True rule (last window must start inside image+pad).
    out = -(-(L + 2 * POOL_P - POOL_K) // POOL_S) + 1
    if (out - 1) * POOL_S >= L + POOL_P:
        out -= 1
    return out


def _pool_matrix(L):
    """(L, OP) matrix with 1/count folded in (count_include_pad=True, trailing clip)."""
    OP = _pool_out_size(L)
    S = np.zeros((L, OP), dtype=np.float32)
    for o in range(OP):
        start = o * POOL_S - POOL_P
        count = min(start + POOL_K, L + POOL_P) - start
        for j in range(max(start, 0), min(start + POOL_K, L)):
            S[j, o] = 1.0 / count
    return S


def _kernel(xp_ref, w_ref, b_ref, sth_ref, swp_ref, out_ref, *, H, W):
    # xp_ref : (1, CI, H+2, W+2)   raw input with 1-pixel zero halo (VMEM)
    # w_ref  : (CO*CI*K*K,)        correlation-form weights, flat (SMEM)
    # b_ref  : (CO,)               bias (SMEM)
    # sth_ref: (2, OPH, H)         height-pool matrices (transposed), per row parity
    # swp_ref: (2, W, OPW_PAD)     width-pool matrices, per col parity, lane-padded to 128*
    # out_ref: (1, CO, OPH, OPW_PAD)

    # Hoist all scalar SMEM loads ahead of the vector work.
    wv = {}
    for co in range(CO):
        for ci in range(CI):
            for kh in range(K):
                for kw in range(K):
                    wv[(co, ci, kh, kw)] = w_ref[((co * CI + ci) * K + kh) * K + kw]
    bias = [b_ref[co] for co in range(CO)]

    # Load the padded channel planes and pooling matrices once.
    xch = [xp_ref[0, ci, :, :] for ci in range(CI)]   # each (H+2, W+2)
    sth = [sth_ref[p, :, :] for p in range(2)]        # (OPH, H)
    swp = [swp_ref[q, :, :] for q in range(2)]        # (W, OPW_PAD)

    # rowp[co][q] accumulates ST_h_p @ o4_pq over the row parity p.
    rowp = [[None, None] for _ in range(CO)]

    for p in range(2):
        for q in range(2):
            # o1 parity sub-grid (p, q): VALID 2x2 correlation over the raw input
            # (no dilation zeros).  Two partial accumulators per co -> 4 chains of ILP.
            parts = [[None, None] for _ in range(CO)]
            for ci in range(CI):
                for r in range(2):
                    for c in range(2):
                        s = xch[ci][p + r:p + r + H, q + c:q + c + W]
                        for co in range(CO):
                            t = s * wv[(co, ci, 2 * r + p, 2 * c + q)]
                            if parts[co][r] is None:
                                parts[co][r] = t
                            else:
                                parts[co][r] = parts[co][r] + t
            for co in range(CO):
                o1 = parts[co][0] + parts[co][1] + bias[co]
                # o2/o3/o4: where(o1 > 0, o1, -0.4 * o1)
                o4 = jnp.where(o1 > 0, o1, o1 * NEG_SLOPE)
                rp = jnp.dot(sth[p], o4, preferred_element_type=jnp.float32)
                if rowp[co][q] is None:
                    rowp[co][q] = rp
                else:
                    rowp[co][q] = rowp[co][q] + rp

    for co in range(CO):
        pooled = (jnp.dot(rowp[co][0], swp[0], preferred_element_type=jnp.float32)
                  + jnp.dot(rowp[co][1], swp[1], preferred_element_type=jnp.float32))
        out_ref[0, co, :, :] = jnp.clip(pooled, HT_LO, HT_HI)   # hardtanh


@jax.jit
def model_forward(x, weight, bias):
    N, ci, H, W = x.shape
    assert ci == CI
    OH = (H - 1) * STRIDE - 2 * PAD + K
    OW = (W - 1) * STRIDE - 2 * PAD + K
    assert OH == STRIDE * H and OW == STRIDE * W  # required by the parity decomposition
    OPH, OPW = _pool_out_size(OH), _pool_out_size(OW)
    OPW_PAD = ((OPW + 127) // 128) * 128

    # Only a 1-pixel zero halo is needed (no stride dilation, no K-1-PAD pad).
    xp = jnp.pad(x.astype(jnp.float32), ((0, 0), (0, 0), (1, 1), (1, 1)))

    # Correlation-form weights: flip spatially + swap (in,out) channel axes.
    w_corr = jnp.transpose(jnp.flip(weight, axis=(2, 3)), (1, 0, 2, 3))  # (CO, CI, K, K)
    w_flat = w_corr.reshape(-1).astype(jnp.float32)

    # Per-parity pooling matrices (avg divisor folded in); width matrices are
    # zero-padded to OPW_PAD lanes so the kernel's stores are full-lane-width.
    st_h = _pool_matrix(OH).T                        # (OPH, OH)
    s_w = _pool_matrix(OW)                           # (OW, OPW)
    sth = np.stack([st_h[:, 0::2], st_h[:, 1::2]]).astype(np.float32)   # (2, OPH, H)
    swp = np.zeros((2, W, OPW_PAD), np.float32)
    swp[0, :, :OPW] = s_w[0::2, :]
    swp[1, :, :OPW] = s_w[1::2, :]

    kernel = functools.partial(_kernel, H=H, W=W)
    out = pl.pallas_call(
        kernel,
        out_shape=jax.ShapeDtypeStruct((N, CO, OPH, OPW_PAD), jnp.float32),
        grid=(N,),
        in_specs=[
            pl.BlockSpec((1, CI, H + 2, W + 2), lambda n: (n, 0, 0, 0)),
            pl.BlockSpec(memory_space=pltpu.MemorySpace.SMEM),
            pl.BlockSpec(memory_space=pltpu.MemorySpace.SMEM),
            pl.BlockSpec((2, OPH, H), lambda n: (0, 0, 0)),
            pl.BlockSpec((2, W, OPW_PAD), lambda n: (0, 0, 0)),
        ],
        out_specs=pl.BlockSpec((1, CO, OPH, OPW_PAD), lambda n: (n, 0, 0, 0)),
        compiler_params=pltpu.CompilerParams(dimension_semantics=("parallel",)),
    )(xp, w_flat, bias.astype(jnp.float32), jnp.asarray(sth), jnp.asarray(swp))
    return out[:, :, :, :OPW]


def reference(x, weight, bias):
    """Pure-JAX reference matching the PyTorch module for these shapes."""
    w_corr = jnp.transpose(jnp.flip(weight, axis=(2, 3)), (1, 0, 2, 3))
    o1 = lax.conv_general_dilated(
        x, w_corr, window_strides=(1, 1),
        padding=((K - 1 - PAD,) * 2, (K - 1 - PAD,) * 2),
        lhs_dilation=(STRIDE, STRIDE), rhs_dilation=(1, 1),
        dimension_numbers=("NCHW", "OIHW", "NCHW"))
    o1 = o1 + bias[None, :, None, None]
    o4 = jnp.where(o1 > 0, o1, o1 * NEG_SLOPE)
    summed = lax.reduce_window(
        o4, 0.0, lax.add, (1, 1, POOL_K, POOL_K), (1, 1, POOL_S, POOL_S),
        ((0, 0), (0, 0), (POOL_P, POOL_P), (POOL_P, POOL_P)))
    o5 = summed / float(POOL_K * POOL_K)   # no window is edge-clipped at these shapes
    return jnp.clip(o5, HT_LO, HT_HI)


if __name__ == "__main__":
    key = jax.random.PRNGKey(0)
    k1, k2, k3 = jax.random.split(key, 3)
    N, H, W = 2, 16, 16
    x = jax.random.normal(k1, (N, CI, H, W), jnp.float32)
    # Deterministic parameter init (shapes from ConvTranspose2d(4, 2, 4)).
    bound = 1.0 / float(CI * K * K) ** 0.5
    weight = jax.random.uniform(k2, (CI, CO, K, K), jnp.float32, -bound, bound)
    bias = jax.random.uniform(k3, (CO,), jnp.float32, -bound, bound)

    out = jax.block_until_ready(model_forward(x, weight, bias))
    ref = reference(x, weight, bias)
    assert out.shape == (N, CO, _pool_out_size(2 * H), _pool_out_size(2 * W)), out.shape
    err = float(jnp.max(jnp.abs(out - ref)))
    assert err < 1e-2, f"max abs err {err}"
    print("KERNEL_OK")
</pallas_src>

<mosaic_0001>
module attributes {stable_mosaic.version = 11 : i64} {
  func.func @_kernel(%arg0: i32, %arg1: memref<1x4x18x18xf32, #tpu.memory_space<vmem>>, %arg2: memref<128xf32, #tpu.memory_space<smem>>, %arg3: memref<2xf32, #tpu.memory_space<smem>>, %arg4: memref<2x14x16xf32, #tpu.memory_space<vmem>>, %arg5: memref<2x16x128xf32, #tpu.memory_space<vmem>>, %arg6: memref<1x2x14x128xf32, #tpu.memory_space<vmem>>) attributes {dimension_semantics = [#tpu.dimension_semantics<parallel>], iteration_bounds = array<i64: 2>, scalar_prefetch = 0 : i64, scratch_operands = 0 : i64, tpu.core_type = #tpu.core_type<tc>, window_params = [{transform_indices = @transform_0, window_bounds = array<i64: 1, 4, 18, 18>}, {transform_indices = @transform_1, window_bounds = array<i64: 128>}, {transform_indices = @transform_2, window_bounds = array<i64: 2>}, {pipeline_mode = #tpu.pipeline_mode<synchronous>, transform_indices = @transform_3, window_bounds = array<i64: 2, 14, 16>}, {pipeline_mode = #tpu.pipeline_mode<synchronous>, transform_indices = @transform_4, window_bounds = array<i64: 2, 16, 128>}, {transform_indices = @transform_5, window_bounds = array<i64: 1, 2, 14, 128>}]} {
    %c0 = arith.constant 0 : index
    %0 = memref.load %arg2[%c0] : memref<128xf32, #tpu.memory_space<smem>>
    %c1 = arith.constant 1 : index
    %1 = memref.load %arg2[%c1] : memref<128xf32, #tpu.memory_space<smem>>
    %c2 = arith.constant 2 : index
    %2 = memref.load %arg2[%c2] : memref<128xf32, #tpu.memory_space<smem>>
    %c3 = arith.constant 3 : index
    %3 = memref.load %arg2[%c3] : memref<128xf32, #tpu.memory_space<smem>>
    %c4 = arith.constant 4 : index
    %4 = memref.load %arg2[%c4] : memref<128xf32, #tpu.memory_space<smem>>
    %c5 = arith.constant 5 : index
    %5 = memref.load %arg2[%c5] : memref<128xf32, #tpu.memory_space<smem>>
    %c6 = arith.constant 6 : index
    %6 = memref.load %arg2[%c6] : memref<128xf32, #tpu.memory_space<smem>>
    %c7 = arith.constant 7 : index
    %7 = memref.load %arg2[%c7] : memref<128xf32, #tpu.memory_space<smem>>
    %c8 = arith.constant 8 : index
    %8 = memref.load %arg2[%c8] : memref<128xf32, #tpu.memory_space<smem>>
    %c9 = arith.constant 9 : index
    %9 = memref.load %arg2[%c9] : memref<128xf32, #tpu.memory_space<smem>>
    %c10 = arith.constant 10 : index
    %10 = memref.load %arg2[%c10] : memref<128xf32, #tpu.memory_space<smem>>
    %c11 = arith.constant 11 : index
    %11 = memref.load %arg2[%c11] : memref<128xf32, #tpu.memory_space<smem>>
    %c12 = arith.constant 12 : index
    %12 = memref.load %arg2[%c12] : memref<128xf32, #tpu.memory_space<smem>>
    %c13 = arith.constant 13 : index
    %13 = memref.load %arg2[%c13] : memref<128xf32, #tpu.memory_space<smem>>
    %c14 = arith.constant 14 : index
    %14 = memref.load %arg2[%c14] : memref<128xf32, #tpu.memory_space<smem>>
    %c15 = arith.constant 15 : index
    %15 = memref.load %arg2[%c15] : memref<128xf32, #tpu.memory_space<smem>>
    %c16 = arith.constant 16 : index
    %16 = memref.load %arg2[%c16] : memref<128xf32, #tpu.memory_space<smem>>
    %c17 = arith.constant 17 : index
    %17 = memref.load %arg2[%c17] : memref<128xf32, #tpu.memory_space<smem>>
    %c18 = arith.constant 18 : index
    %18 = memref.load %arg2[%c18] : memref<128xf32, #tpu.memory_space<smem>>
    %c19 = arith.constant 19 : index
    %19 = memref.load %arg2[%c19] : memref<128xf32, #tpu.memory_space<smem>>
    %c20 = arith.constant 20 : index
    %20 = memref.load %arg2[%c20] : memref<128xf32, #tpu.memory_space<smem>>
    %c21 = arith.constant 21 : index
    %21 = memref.load %arg2[%c21] : memref<128xf32, #tpu.memory_space<smem>>
    %c22 = arith.constant 22 : index
    %22 = memref.load %arg2[%c22] : memref<128xf32, #tpu.memory_space<smem>>
    %c23 = arith.constant 23 : index
    %23 = memref.load %arg2[%c23] : memref<128xf32, #tpu.memory_space<smem>>
    %c24 = arith.constant 24 : index
    %24 = memref.load %arg2[%c24] : memref<128xf32, #tpu.memory_space<smem>>
    %c25 = arith.constant 25 : index
    %25 = memref.load %arg2[%c25] : memref<128xf32, #tpu.memory_space<smem>>
    %c26 = arith.constant 26 : index
    %26 = memref.load %arg2[%c26] : memref<128xf32, #tpu.memory_space<smem>>
    %c27 = arith.constant 27 : index
    %27 = memref.load %arg2[%c27] : memref<128xf32, #tpu.memory_space<smem>>
    %c28 = arith.constant 28 : index
    %28 = memref.load %arg2[%c28] : memref<128xf32, #tpu.memory_space<smem>>
    %c29 = arith.constant 29 : index
    %29 = memref.load %arg2[%c29] : memref<128xf32, #tpu.memory_space<smem>>
    %c30 = arith.constant 30 : index
    %30 = memref.load %arg2[%c30] : memref<128xf32, #tpu.memory_space<smem>>
    %c31 = arith.constant 31 : index
    %31 = memref.load %arg2[%c31] : memref<128xf32, #tpu.memory_space<smem>>
    %c32 = arith.constant 32 : index
    %32 = memref.load %arg2[%c32] : memref<128xf32, #tpu.memory_space<smem>>
    %c33 = arith.constant 33 : index
    %33 = memref.load %arg2[%c33] : memref<128xf32, #tpu.memory_space<smem>>
    %c34 = arith.constant 34 : index
    %34 = memref.load %arg2[%c34] : memref<128xf32, #tpu.memory_space<smem>>
    %c35 = arith.constant 35 : index
    %35 = memref.load %arg2[%c35] : memref<128xf32, #tpu.memory_space<smem>>
    %c36 = arith.constant 36 : index
    %36 = memref.load %arg2[%c36] : memref<128xf32, #tpu.memory_space<smem>>
    %c37 = arith.constant 37 : index
    %37 = memref.load %arg2[%c37] : memref<128xf32, #tpu.memory_space<smem>>
    %c38 = arith.constant 38 : index
    %38 = memref.load %arg2[%c38] : memref<128xf32, #tpu.memory_space<smem>>
    %c39 = arith.constant 39 : index
    %39 = memref.load %arg2[%c39] : memref<128xf32, #tpu.memory_space<smem>>
    %c40 = arith.constant 40 : index
    %40 = memref.load %arg2[%c40] : memref<128xf32, #tpu.memory_space<smem>>
    %c41 = arith.constant 41 : index
    %41 = memref.load %arg2[%c41] : memref<128xf32, #tpu.memory_space<smem>>
    %c42 = arith.constant 42 : index
    %42 = memref.load %arg2[%c42] : memref<128xf32, #tpu.memory_space<smem>>
    %c43 = arith.constant 43 : index
    %43 = memref.load %arg2[%c43] : memref<128xf32, #tpu.memory_space<smem>>
    %c44 = arith.constant 44 : index
    %44 = memref.load %arg2[%c44] : memref<128xf32, #tpu.memory_space<smem>>
    %c45 = arith.constant 45 : index
    %45 = memref.load %arg2[%c45] : memref<128xf32, #tpu.memory_space<smem>>
    %c46 = arith.constant 46 : index
    %46 = memref.load %arg2[%c46] : memref<128xf32, #tpu.memory_space<smem>>
    %c47 = arith.constant 47 : index
    %47 = memref.load %arg2[%c47] : memref<128xf32, #tpu.memory_space<smem>>
    %c48 = arith.constant 48 : index
    %48 = memref.load %arg2[%c48] : memref<128xf32, #tpu.memory_space<smem>>
    %c49 = arith.constant 49 : index
    %49 = memref.load %arg2[%c49] : memref<128xf32, #tpu.memory_space<smem>>
    %c50 = arith.constant 50 : index
    %50 = memref.load %arg2[%c50] : memref<128xf32, #tpu.memory_space<smem>>
    %c51 = arith.constant 51 : index
    %51 = memref.load %arg2[%c51] : memref<128xf32, #tpu.memory_space<smem>>
    %c52 = arith.constant 52 : index
    %52 = memref.load %arg2[%c52] : memref<128xf32, #tpu.memory_space<smem>>
    %c53 = arith.constant 53 : index
    %53 = memref.load %arg2[%c53] : memref<128xf32, #tpu.memory_space<smem>>
    %c54 = arith.constant 54 : index
    %54 = memref.load %arg2[%c54] : memref<128xf32, #tpu.memory_space<smem>>
    %c55 = arith.constant 55 : index
    %55 = memref.load %arg2[%c55] : memref<128xf32, #tpu.memory_space<smem>>
    %c56 = arith.constant 56 : index
    %56 = memref.load %arg2[%c56] : memref<128xf32, #tpu.memory_space<smem>>
    %c57 = arith.constant 57 : index
    %57 = memref.load %arg2[%c57] : memref<128xf32, #tpu.memory_space<smem>>
    %c58 = arith.constant 58 : index
    %58 = memref.load %arg2[%c58] : memref<128xf32, #tpu.memory_space<smem>>
    %c59 = arith.constant 59 : index
    %59 = memref.load %arg2[%c59] : memref<128xf32, #tpu.memory_space<smem>>
    %c60 = arith.constant 60 : index
    %60 = memref.load %arg2[%c60] : memref<128xf32, #tpu.memory_space<smem>>
    %c61 = arith.constant 61 : index
    %61 = memref.load %arg2[%c61] : memref<128xf32, #tpu.memory_space<smem>>
    %c62 = arith.constant 62 : index
    %62 = memref.load %arg2[%c62] : memref<128xf32, #tpu.memory_space<smem>>
    %c63 = arith.constant 63 : index
    %63 = memref.load %arg2[%c63] : memref<128xf32, #tpu.memory_space<smem>>
    %c64 = arith.constant 64 : index
    %64 = memref.load %arg2[%c64] : memref<128xf32, #tpu.memory_space<smem>>
    %c65 = arith.constant 65 : index
    %65 = memref.load %arg2[%c65] : memref<128xf32, #tpu.memory_space<smem>>
    %c66 = arith.constant 66 : index
    %66 = memref.load %arg2[%c66] : memref<128xf32, #tpu.memory_space<smem>>
    %c67 = arith.constant 67 : index
    %67 = memref.load %arg2[%c67] : memref<128xf32, #tpu.memory_space<smem>>
    %c68 = arith.constant 68 : index
    %68 = memref.load %arg2[%c68] : memref<128xf32, #tpu.memory_space<smem>>
    %c69 = arith.constant 69 : index
    %69 = memref.load %arg2[%c69] : memref<128xf32, #tpu.memory_space<smem>>
    %c70 = arith.constant 70 : index
    %70 = memref.load %arg2[%c70] : memref<128xf32, #tpu.memory_space<smem>>
    %c71 = arith.constant 71 : index
    %71 = memref.load %arg2[%c71] : memref<128xf32, #tpu.memory_space<smem>>
    %c72 = arith.constant 72 : index
    %72 = memref.load %arg2[%c72] : memref<128xf32, #tpu.memory_space<smem>>
    %c73 = arith.constant 73 : index
    %73 = memref.load %arg2[%c73] : memref<128xf32, #tpu.memory_space<smem>>
    %c74 = arith.constant 74 : index
    %74 = memref.load %arg2[%c74] : memref<128xf32, #tpu.memory_space<smem>>
    %c75 = arith.constant 75 : index
    %75 = memref.load %arg2[%c75] : memref<128xf32, #tpu.memory_space<smem>>
    %c76 = arith.constant 76 : index
    %76 = memref.load %arg2[%c76] : memref<128xf32, #tpu.memory_space<smem>>
    %c77 = arith.constant 77 : index
    %77 = memref.load %arg2[%c77] : memref<128xf32, #tpu.memory_space<smem>>
    %c78 = arith.constant 78 : index
    %78 = memref.load %arg2[%c78] : memref<128xf32, #tpu.memory_space<smem>>
    %c79 = arith.constant 79 : index
    %79 = memref.load %arg2[%c79] : memref<128xf32, #tpu.memory_space<smem>>
    %c80 = arith.constant 80 : index
    %80 = memref.load %arg2[%c80] : memref<128xf32, #tpu.memory_space<smem>>
    %c81 = arith.constant 81 : index
    %81 = memref.load %arg2[%c81] : memref<128xf32, #tpu.memory_space<smem>>
    %c82 = arith.constant 82 : index
    %82 = memref.load %arg2[%c82] : memref<128xf32, #tpu.memory_space<smem>>
    %c83 = arith.constant 83 : index
    %83 = memref.load %arg2[%c83] : memref<128xf32, #tpu.memory_space<smem>>
    %c84 = arith.constant 84 : index
    %84 = memref.load %arg2[%c84] : memref<128xf32, #tpu.memory_space<smem>>
    %c85 = arith.constant 85 : index
    %85 = memref.load %arg2[%c85] : memref<128xf32, #tpu.memory_space<smem>>
    %c86 = arith.constant 86 : index
    %86 = memref.load %arg2[%c86] : memref<128xf32, #tpu.memory_space<smem>>
    %c87 = arith.constant 87 : index
    %87 = memref.load %arg2[%c87] : memref<128xf32, #tpu.memory_space<smem>>
    %c88 = arith.constant 88 : index
    %88 = memref.load %arg2[%c88] : memref<128xf32, #tpu.memory_space<smem>>
    %c89 = arith.constant 89 : index
    %89 = memref.load %arg2[%c89] : memref<128xf32, #tpu.memory_space<smem>>
    %c90 = arith.constant 90 : index
    %90 = memref.load %arg2[%c90] : memref<128xf32, #tpu.memory_space<smem>>
    %c91 = arith.constant 91 : index
    %91 = memref.load %arg2[%c91] : memref<128xf32, #tpu.memory_space<smem>>
    %c92 = arith.constant 92 : index
    %92 = memref.load %arg2[%c92] : memref<128xf32, #tpu.memory_space<smem>>
    %c93 = arith.constant 93 : index
    %93 = memref.load %arg2[%c93] : memref<128xf32, #tpu.memory_space<smem>>
    %c94 = arith.constant 94 : index
    %94 = memref.load %arg2[%c94] : memref<128xf32, #tpu.memory_space<smem>>
    %c95 = arith.constant 95 : index
    %95 = memref.load %arg2[%c95] : memref<128xf32, #tpu.memory_space<smem>>
    %c96 = arith.constant 96 : index
    %96 = memref.load %arg2[%c96] : memref<128xf32, #tpu.memory_space<smem>>
    %c97 = arith.constant 97 : index
    %97 = memref.load %arg2[%c97] : memref<128xf32, #tpu.memory_space<smem>>
    %c98 = arith.constant 98 : index
    %98 = memref.load %arg2[%c98] : memref<128xf32, #tpu.memory_space<smem>>
    %c99 = arith.constant 99 : index
    %99 = memref.load %arg2[%c99] : memref<128xf32, #tpu.memory_space<smem>>
    %c100 = arith.constant 100 : index
    %100 = memref.load %arg2[%c100] : memref<128xf32, #tpu.memory_space<smem>>
    %c101 = arith.constant 101 : index
    %101 = memref.load %arg2[%c101] : memref<128xf32, #tpu.memory_space<smem>>
    %c102 = arith.constant 102 : index
    %102 = memref.load %arg2[%c102] : memref<128xf32, #tpu.memory_space<smem>>
    %c103 = arith.constant 103 : index
    %103 = memref.load %arg2[%c103] : memref<128xf32, #tpu.memory_space<smem>>
    %c104 = arith.constant 104 : index
    %104 = memref.load %arg2[%c104] : memref<128xf32, #tpu.memory_space<smem>>
    %c105 = arith.constant 105 : index
    %105 = memref.load %arg2[%c105] : memref<128xf32, #tpu.memory_space<smem>>
    %c106 = arith.constant 106 : index
    %106 = memref.load %arg2[%c106] : memref<128xf32, #tpu.memory_space<smem>>
    %c107 = arith.constant 107 : index
    %107 = memref.load %arg2[%c107] : memref<128xf32, #tpu.memory_space<smem>>
    %c108 = arith.constant 108 : index
    %108 = memref.load %arg2[%c108] : memref<128xf32, #tpu.memory_space<smem>>
    %c109 = arith.constant 109 : index
    %109 = memref.load %arg2[%c109] : memref<128xf32, #tpu.memory_space<smem>>
    %c110 = arith.constant 110 : index
    %110 = memref.load %arg2[%c110] : memref<128xf32, #tpu.memory_space<smem>>
    %c111 = arith.constant 111 : index
    %111 = memref.load %arg2[%c111] : memref<128xf32, #tpu.memory_space<smem>>
    %c112 = arith.constant 112 : index
    %112 = memref.load %arg2[%c112] : memref<128xf32, #tpu.memory_space<smem>>
    %c113 = arith.constant 113 : index
    %113 = memref.load %arg2[%c113] : memref<128xf32, #tpu.memory_space<smem>>
    %c114 = arith.constant 114 : index
    %114 = memref.load %arg2[%c114] : memref<128xf32, #tpu.memory_space<smem>>
    %c115 = arith.constant 115 : index
    %115 = memref.load %arg2[%c115] : memref<128xf32, #tpu.memory_space<smem>>
    %c116 = arith.constant 116 : index
    %116 = memref.load %arg2[%c116] : memref<128xf32, #tpu.memory_space<smem>>
    %c117 = arith.constant 117 : index
    %117 = memref.load %arg2[%c117] : memref<128xf32, #tpu.memory_space<smem>>
    %c118 = arith.constant 118 : index
    %118 = memref.load %arg2[%c118] : memref<128xf32, #tpu.memory_space<smem>>
    %c119 = arith.constant 119 : index
    %119 = memref.load %arg2[%c119] : memref<128xf32, #tpu.memory_space<smem>>
    %c120 = arith.constant 120 : index
    %120 = memref.load %arg2[%c120] : memref<128xf32, #tpu.memory_space<smem>>
    %c121 = arith.constant 121 : index
    %121 = memref.load %arg2[%c121] : memref<128xf32, #tpu.memory_space<smem>>
    %c122 = arith.constant 122 : index
    %122 = memref.load %arg2[%c122] : memref<128xf32, #tpu.memory_space<smem>>
    %c123 = arith.constant 123 : index
    %123 = memref.load %arg2[%c123] : memref<128xf32, #tpu.memory_space<smem>>
    %c124 = arith.constant 124 : index
    %124 = memref.load %arg2[%c124] : memref<128xf32, #tpu.memory_space<smem>>
    %c125 = arith.constant 125 : index
    %125 = memref.load %arg2[%c125] : memref<128xf32, #tpu.memory_space<smem>>
    %c126 = arith.constant 126 : index
    %126 = memref.load %arg2[%c126] : memref<128xf32, #tpu.memory_space<smem>>
    %c127 = arith.constant 127 : index
    %127 = memref.load %arg2[%c127] : memref<128xf32, #tpu.memory_space<smem>>
    %c0_0 = arith.constant 0 : index
    %128 = memref.load %arg3[%c0_0] : memref<2xf32, #tpu.memory_space<smem>>
    %c1_1 = arith.constant 1 : index
    %129 = memref.load %arg3[%c1_1] : memref<2xf32, #tpu.memory_space<smem>>
    %c0_2 = arith.constant 0 : index
    %c0_3 = arith.constant 0 : index
    %c0_4 = arith.constant 0 : index
    %c0_5 = arith.constant 0 : index
    %130 = vector.load %arg1[%c0_2, %c0_3, %c0_4, %c0_5] : memref<1x4x18x18xf32, #tpu.memory_space<vmem>>, vector<1x1x18x18xf32>
    %131 = vector.shape_cast %130 : vector<1x1x18x18xf32> to vector<18x18xf32>
    %c0_6 = arith.constant 0 : index
    %c1_7 = arith.constant 1 : index
    %c0_8 = arith.constant 0 : index
    %c0_9 = arith.constant 0 : index
    %132 = vector.load %arg1[%c0_6, %c1_7, %c0_8, %c0_9] : memref<1x4x18x18xf32, #tpu.memory_space<vmem>>, vector<1x1x18x18xf32>
    %133 = vector.shape_cast %132 : vector<1x1x18x18xf32> to vector<18x18xf32>
    %c0_10 = arith.constant 0 : index
    %c2_11 = arith.constant 2 : index
    %c0_12 = arith.constant 0 : index
    %c0_13 = arith.constant 0 : index
    %134 = vector.load %arg1[%c0_10, %c2_11, %c0_12, %c0_13] : memref<1x4x18x18xf32, #tpu.memory_space<vmem>>, vector<1x1x18x18xf32>
    %135 = vector.shape_cast %134 : vector<1x1x18x18xf32> to vector<18x18xf32>
    %c0_14 = arith.constant 0 : index
    %c3_15 = arith.constant 3 : index
    %c0_16 = arith.constant 0 : index
    %c0_17 = arith.constant 0 : index
    %136 = vector.load %arg1[%c0_14, %c3_15, %c0_16, %c0_17] : memref<1x4x18x18xf32, #tpu.memory_space<vmem>>, vector<1x1x18x18xf32>
    %137 = vector.shape_cast %136 : vector<1x1x18x18xf32> to vector<18x18xf32>
    %c0_18 = arith.constant 0 : index
    %c0_19 = arith.constant 0 : index
    %c0_20 = arith.constant 0 : index
    %138 = vector.load %arg4[%c0_18, %c0_19, %c0_20] : memref<2x14x16xf32, #tpu.memory_space<vmem>>, vector<1x14x16xf32>
    %139 = vector.shape_cast %138 : vector<1x14x16xf32> to vector<14x16xf32>
    %c1_21 = arith.constant 1 : index
    %c0_22 = arith.constant 0 : index
    %c0_23 = arith.constant 0 : index
    %140 = vector.load %arg4[%c1_21, %c0_22, %c0_23] : memref<2x14x16xf32, #tpu.memory_space<vmem>>, vector<1x14x16xf32>
    %141 = vector.shape_cast %140 : vector<1x14x16xf32> to vector<14x16xf32>
    %c0_24 = arith.constant 0 : index
    %c0_25 = arith.constant 0 : index
    %c0_26 = arith.constant 0 : index
    %142 = vector.load %arg5[%c0_24, %c0_25, %c0_26] : memref<2x16x128xf32, #tpu.memory_space<vmem>>, vector<1x16x128xf32>
    %143 = vector.shape_cast %142 : vector<1x16x128xf32> to vector<16x128xf32>
    %c1_27 = arith.constant 1 : index
    %c0_28 = arith.constant 0 : index
    %c0_29 = arith.constant 0 : index
    %144 = vector.load %arg5[%c1_27, %c0_28, %c0_29] : memref<2x16x128xf32, #tpu.memory_space<vmem>>, vector<1x16x128xf32>
    %145 = vector.shape_cast %144 : vector<1x16x128xf32> to vector<16x128xf32>
    %146 = vector.extract_strided_slice %131 {offsets = [0, 0], sizes = [16, 16], strides = [1, 1]} : vector<18x18xf32> to vector<16x16xf32>
    %147 = vector.broadcast %0 : f32 to vector<16x16xf32>
    %148 = arith.mulf %146, %147 : vector<16x16xf32>
    %149 = vector.broadcast %64 : f32 to vector<16x16xf32>
    %150 = arith.mulf %146, %149 : vector<16x16xf32>
    %151 = vector.extract_strided_slice %131 {offsets = [0, 1], sizes = [16, 16], strides = [1, 1]} : vector<18x18xf32> to vector<16x16xf32>
    %152 = vector.broadcast %2 : f32 to vector<16x16xf32>
    %153 = arith.mulf %151, %152 : vector<16x16xf32>
    %154 = arith.addf %148, %153 : vector<16x16xf32>
    %155 = vector.broadcast %66 : f32 to vector<16x16xf32>
    %156 = arith.mulf %151, %155 : vector<16x16xf32>
    %157 = arith.addf %150, %156 : vector<16x16xf32>
    %158 = vector.extract_strided_slice %131 {offsets = [1, 0], sizes = [16, 16], strides = [1, 1]} : vector<18x18xf32> to vector<16x16xf32>
    %159 = vector.broadcast %8 : f32 to vector<16x16xf32>
    %160 = arith.mulf %158, %159 : vector<16x16xf32>
    %161 = vector.broadcast %72 : f32 to vector<16x16xf32>
    %162 = arith.mulf %158, %161 : vector<16x16xf32>
    %163 = vector.extract_strided_slice %131 {offsets = [1, 1], sizes = [16, 16], strides = [1, 1]} : vector<18x18xf32> to vector<16x16xf32>
    %164 = vector.broadcast %10 : f32 to vector<16x16xf32>
    %165 = arith.mulf %163, %164 : vector<16x16xf32>
    %166 = arith.addf %160, %165 : vector<16x16xf32>
    %167 = vector.broadcast %74 : f32 to vector<16x16xf32>
    %168 = arith.mulf %163, %167 : vector<16x16xf32>
    %169 = arith.addf %162, %168 : vector<16x16xf32>
    %170 = vector.extract_strided_slice %133 {offsets = [0, 0], sizes = [16, 16], strides = [1, 1]} : vector<18x18xf32> to vector<16x16xf32>
    %171 = vector.broadcast %16 : f32 to vector<16x16xf32>
    %172 = arith.mulf %170, %171 : vector<16x16xf32>
    %173 = arith.addf %154, %172 : vector<16x16xf32>
    %174 = vector.broadcast %80 : f32 to vector<16x16xf32>
    %175 = arith.mulf %170, %174 : vector<16x16xf32>
    %176 = arith.addf %157, %175 : vector<16x16xf32>
    %177 = vector.extract_strided_slice %133 {offsets = [0, 1], sizes = [16, 16], strides = [1, 1]} : vector<18x18xf32> to vector<16x16xf32>
    %178 = vector.broadcast %18 : f32 to vector<16x16xf32>
    %179 = arith.mulf %177, %178 : vector<16x16xf32>
    %180 = arith.addf %173, %179 : vector<16x16xf32>
    %181 = vector.broadcast %82 : f32 to vector<16x16xf32>
    %182 = arith.mulf %177, %181 : vector<16x16xf32>
    %183 = arith.addf %176, %182 : vector<16x16xf32>
    %184 = vector.extract_strided_slice %133 {offsets = [1, 0], sizes = [16, 16], strides = [1, 1]} : vector<18x18xf32> to vector<16x16xf32>
    %185 = vector.broadcast %24 : f32 to vector<16x16xf32>
    %186 = arith.mulf %184, %185 : vector<16x16xf32>
    %187 = arith.addf %166, %186 : vector<16x16xf32>
    %188 = vector.broadcast %88 : f32 to vector<16x16xf32>
    %189 = arith.mulf %184, %188 : vector<16x16xf32>
    %190 = arith.addf %169, %189 : vector<16x16xf32>
    %191 = vector.extract_strided_slice %133 {offsets = [1, 1], sizes = [16, 16], strides = [1, 1]} : vector<18x18xf32> to vector<16x16xf32>
    %192 = vector.broadcast %26 : f32 to vector<16x16xf32>
    %193 = arith.mulf %191, %192 : vector<16x16xf32>
    %194 = arith.addf %187, %193 : vector<16x16xf32>
    %195 = vector.broadcast %90 : f32 to vector<16x16xf32>
    %196 = arith.mulf %191, %195 : vector<16x16xf32>
    %197 = arith.addf %190, %196 : vector<16x16xf32>
    %198 = vector.extract_strided_slice %135 {offsets = [0, 0], sizes = [16, 16], strides = [1, 1]} : vector<18x18xf32> to vector<16x16xf32>
    %199 = vector.broadcast %32 : f32 to vector<16x16xf32>
    %200 = arith.mulf %198, %199 : vector<16x16xf32>
    %201 = arith.addf %180, %200 : vector<16x16xf32>
    %202 = vector.broadcast %96 : f32 to vector<16x16xf32>
    %203 = arith.mulf %198, %202 : vector<16x16xf32>
    %204 = arith.addf %183, %203 : vector<16x16xf32>
    %205 = vector.extract_strided_slice %135 {offsets = [0, 1], sizes = [16, 16], strides = [1, 1]} : vector<18x18xf32> to vector<16x16xf32>
    %206 = vector.broadcast %34 : f32 to vector<16x16xf32>
    %207 = arith.mulf %205, %206 : vector<16x16xf32>
    %208 = arith.addf %201, %207 : vector<16x16xf32>
    %209 = vector.broadcast %98 : f32 to vector<16x16xf32>
    %210 = arith.mulf %205, %209 : vector<16x16xf32>
    %211 = arith.addf %204, %210 : vector<16x16xf32>
    %212 = vector.extract_strided_slice %135 {offsets = [1, 0], sizes = [16, 16], strides = [1, 1]} : vector<18x18xf32> to vector<16x16xf32>
    %213 = vector.broadcast %40 : f32 to vector<16x16xf32>
    %214 = arith.mulf %212, %213 : vector<16x16xf32>
    %215 = arith.addf %194, %214 : vector<16x16xf32>
    %216 = vector.broadcast %104 : f32 to vector<16x16xf32>
    %217 = arith.mulf %212, %216 : vector<16x16xf32>
    %218 = arith.addf %197, %217 : vector<16x16xf32>
    %219 = vector.extract_strided_slice %135 {offsets = [1, 1], sizes = [16, 16], strides = [1, 1]} : vector<18x18xf32> to vector<16x16xf32>
    %220 = vector.broadcast %42 : f32 to vector<16x16xf32>
    %221 = arith.mulf %219, %220 : vector<16x16xf32>
    %222 = arith.addf %215, %221 : vector<16x16xf32>
    %223 = vector.broadcast %106 : f32 to vector<16x16xf32>
    %224 = arith.mulf %219, %223 : vector<16x16xf32>
    %225 = arith.addf %218, %224 : vector<16x16xf32>
    %226 = vector.extract_strided_slice %137 {offsets = [0, 0], sizes = [16, 16], strides = [1, 1]} : vector<18x18xf32> to vector<16x16xf32>
    %227 = vector.broadcast %48 : f32 to vector<16x16xf32>
    %228 = arith.mulf %226, %227 : vector<16x16xf32>
    %229 = arith.addf %208, %228 : vector<16x16xf32>
    %230 = vector.broadcast %112 : f32 to vector<16x16xf32>
    %231 = arith.mulf %226, %230 : vector<16x16xf32>
    %232 = arith.addf %211, %231 : vector<16x16xf32>
    %233 = vector.extract_strided_slice %137 {offsets = [0, 1], sizes = [16, 16], strides = [1, 1]} : vector<18x18xf32> to vector<16x16xf32>
    %234 = vector.broadcast %50 : f32 to vector<16x16xf32>
    %235 = arith.mulf %233, %234 : vector<16x16xf32>
    %236 = arith.addf %229, %235 : vector<16x16xf32>
    %237 = vector.broadcast %114 : f32 to vector<16x16xf32>
    %238 = arith.mulf %233, %237 : vector<16x16xf32>
    %239 = arith.addf %232, %238 : vector<16x16xf32>
    %240 = vector.extract_strided_slice %137 {offsets = [1, 0], sizes = [16, 16], strides = [1, 1]} : vector<18x18xf32> to vector<16x16xf32>
    %241 = vector.broadcast %56 : f32 to vector<16x16xf32>
    %242 = arith.mulf %240, %241 : vector<16x16xf32>
    %243 = arith.addf %222, %242 : vector<16x16xf32>
    %244 = vector.broadcast %120 : f32 to vector<16x16xf32>
    %245 = arith.mulf %240, %244 : vector<16x16xf32>
    %246 = arith.addf %225, %245 : vector<16x16xf32>
    %247 = vector.extract_strided_slice %137 {offsets = [1, 1], sizes = [16, 16], strides = [1, 1]} : vector<18x18xf32> to vector<16x16xf32>
    %248 = vector.broadcast %58 : f32 to vector<16x16xf32>
    %249 = arith.mulf %247, %248 : vector<16x16xf32>
    %250 = arith.addf %243, %249 : vector<16x16xf32>
    %251 = vector.broadcast %122 : f32 to vector<16x16xf32>
    %252 = arith.mulf %247, %251 : vector<16x16xf32>
    %253 = arith.addf %246, %252 : vector<16x16xf32>
    %254 = arith.addf %236, %250 : vector<16x16xf32>
    %255 = vector.broadcast %128 : f32 to vector<16x16xf32>
    %256 = arith.addf %254, %255 : vector<16x16xf32>
    %cst = arith.constant 0.000000e+00 : f32
    %257 = vector.broadcast %cst : f32 to vector<16x16xf32>
    %258 = arith.cmpf ogt, %256, %257 : vector<16x16xf32>
    %cst_30 = arith.constant -4.000000e-01 : f32
    %259 = vector.broadcast %cst_30 : f32 to vector<16x16xf32>
    %260 = arith.mulf %256, %259 : vector<16x16xf32>
    %261 = arith.select %258, %256, %260 : vector<16x16xi1>, vector<16x16xf32>
    %cst_31 = arith.constant dense<0.000000e+00> : vector<14x16xf32>
    %262 = tpu.matmul %139, %261, %cst_31 {dimension_numbers = #tpu.dot_dimension_numbers<[1], [0], [0], [1], [0, 0, 1, 1], [], []>} : vector<14x16xf32>, vector<16x16xf32>, vector<14x16xf32> -> vector<14x16xf32>
    %263 = arith.addf %239, %253 : vector<16x16xf32>
    %264 = vector.broadcast %129 : f32 to vector<16x16xf32>
    %265 = arith.addf %263, %264 : vector<16x16xf32>
    %cst_32 = arith.constant 0.000000e+00 : f32
    %266 = vector.broadcast %cst_32 : f32 to vector<16x16xf32>
    %267 = arith.cmpf ogt, %265, %266 : vector<16x16xf32>
    %cst_33 = arith.constant -4.000000e-01 : f32
    %268 = vector.broadcast %cst_33 : f32 to vector<16x16xf32>
    %269 = arith.mulf %265, %268 : vector<16x16xf32>
    %270 = arith.select %267, %265, %269 : vector<16x16xi1>, vector<16x16xf32>
    %cst_34 = arith.constant dense<0.000000e+00> : vector<14x16xf32>
    %271 = tpu.matmul %139, %270, %cst_34 {dimension_numbers = #tpu.dot_dimension_numbers<[1], [0], [0], [1], [0, 0, 1, 1], [], []>} : vector<14x16xf32>, vector<16x16xf32>, vector<14x16xf32> -> vector<14x16xf32>
    %272 = vector.extract_strided_slice %131 {offsets = [0, 1], sizes = [16, 16], strides = [1, 1]} : vector<18x18xf32> to vector<16x16xf32>
    %273 = vector.broadcast %1 : f32 to vector<16x16xf32>
    %274 = arith.mulf %272, %273 : vector<16x16xf32>
    %275 = vector.broadcast %65 : f32 to vector<16x16xf32>
    %276 = arith.mulf %272, %275 : vector<16x16xf32>
    %277 = vector.extract_strided_slice %131 {offsets = [0, 2], sizes = [16, 16], strides = [1, 1]} : vector<18x18xf32> to vector<16x16xf32>
    %278 = vector.broadcast %3 : f32 to vector<16x16xf32>
    %279 = arith.mulf %277, %278 : vector<16x16xf32>
    %280 = arith.addf %274, %279 : vector<16x16xf32>
    %281 = vector.broadcast %67 : f32 to vector<16x16xf32>
    %282 = arith.mulf %277, %281 : vector<16x16xf32>
    %283 = arith.addf %276, %282 : vector<16x16xf32>
    %284 = vector.extract_strided_slice %131 {offsets = [1, 1], sizes = [16, 16], strides = [1, 1]} : vector<18x18xf32> to vector<16x16xf32>
    %285 = vector.broadcast %9 : f32 to vector<16x16xf32>
    %286 = arith.mulf %284, %285 : vector<16x16xf32>
    %287 = vector.broadcast %73 : f32 to vector<16x16xf32>
    %288 = arith.mulf %284, %287 : vector<16x16xf32>
    %289 = vector.extract_strided_slice %131 {offsets = [1, 2], sizes = [16, 16], strides = [1, 1]} : vector<18x18xf32> to vector<16x16xf32>
    %290 = vector.broadcast %11 : f32 to vector<16x16xf32>
    %291 = arith.mulf %289, %290 : vector<16x16xf32>
    %292 = arith.addf %286, %291 : vector<16x16xf32>
    %293 = vector.broadcast %75 : f32 to vector<16x16xf32>
    %294 = arith.mulf %289, %293 : vector<16x16xf32>
    %295 = arith.addf %288, %294 : vector<16x16xf32>
    %296 = vector.extract_strided_slice %133 {offsets = [0, 1], sizes = [16, 16], strides = [1, 1]} : vector<18x18xf32> to vector<16x16xf32>
    %297 = vector.broadcast %17 : f32 to vector<16x16xf32>
    %298 = arith.mulf %296, %297 : vector<16x16xf32>
    %299 = arith.addf %280, %298 : vector<16x16xf32>
    %300 = vector.broadcast %81 : f32 to vector<16x16xf32>
    %301 = arith.mulf %296, %300 : vector<16x16xf32>
    %302 = arith.addf %283, %301 : vector<16x16xf32>
    %303 = vector.extract_strided_slice %133 {offsets = [0, 2], sizes = [16, 16], strides = [1, 1]} : vector<18x18xf32> to vector<16x16xf32>
    %304 = vector.broadcast %19 : f32 to vector<16x16xf32>
    %305 = arith.mulf %303, %304 : vector<16x16xf32>
    %306 = arith.addf %299, %305 : vector<16x16xf32>
    %307 = vector.broadcast %83 : f32 to vector<16x16xf32>
    %308 = arith.mulf %303, %307 : vector<16x16xf32>
    %309 = arith.addf %302, %308 : vector<16x16xf32>
    %310 = vector.extract_strided_slice %133 {offsets = [1, 1], sizes = [16, 16], strides = [1, 1]} : vector<18x18xf32> to vector<16x16xf32>
    %311 = vector.broadcast %25 : f32 to vector<16x16xf32>
    %312 = arith.mulf %310, %311 : vector<16x16xf32>
    %313 = arith.addf %292, %312 : vector<16x16xf32>
    %314 = vector.broadcast %89 : f32 to vector<16x16xf32>
    %315 = arith.mulf %310, %314 : vector<16x16xf32>
    %316 = arith.addf %295, %315 : vector<16x16xf32>
    %317 = vector.extract_strided_slice %133 {offsets = [1, 2], sizes = [16, 16], strides = [1, 1]} : vector<18x18xf32> to vector<16x16xf32>
    %318 = vector.broadcast %27 : f32 to vector<16x16xf32>
    %319 = arith.mulf %317, %318 : vector<16x16xf32>
    %320 = arith.addf %313, %319 : vector<16x16xf32>
    %321 = vector.broadcast %91 : f32 to vector<16x16xf32>
    %322 = arith.mulf %317, %321 : vector<16x16xf32>
    %323 = arith.addf %316, %322 : vector<16x16xf32>
    %324 = vector.extract_strided_slice %135 {offsets = [0, 1], sizes = [16, 16], strides = [1, 1]} : vector<18x18xf32> to vector<16x16xf32>
    %325 = vector.broadcast %33 : f32 to vector<16x16xf32>
    %326 = arith.mulf %324, %325 : vector<16x16xf32>
    %327 = arith.addf %306, %326 : vector<16x16xf32>
    %328 = vector.broadcast %97 : f32 to vector<16x16xf32>
    %329 = arith.mulf %324, %328 : vector<16x16xf32>
    %330 = arith.addf %309, %329 : vector<16x16xf32>
    %331 = vector.extract_strided_slice %135 {offsets = [0, 2], sizes = [16, 16], strides = [1, 1]} : vector<18x18xf32> to vector<16x16xf32>
    %332 = vector.broadcast %35 : f32 to vector<16x16xf32>
    %333 = arith.mulf %331, %332 : vector<16x16xf32>
    %334 = arith.addf %327, %333 : vector<16x16xf32>
    %335 = vector.broadcast %99 : f32 to vector<16x16xf32>
    %336 = arith.mulf %331, %335 : vector<16x16xf32>
    %337 = arith.addf %330, %336 : vector<16x16xf32>
    %338 = vector.extract_strided_slice %135 {offsets = [1, 1], sizes = [16, 16], strides = [1, 1]} : vector<18x18xf32> to vector<16x16xf32>
    %339 = vector.broadcast %41 : f32 to vector<16x16xf32>
    %340 = arith.mulf %338, %339 : vector<16x16xf32>
    %341 = arith.addf %320, %340 : vector<16x16xf32>
    %342 = vector.broadcast %105 : f32 to vector<16x16xf32>
    %343 = arith.mulf %338, %342 : vector<16x16xf32>
    %344 = arith.addf %323, %343 : vector<16x16xf32>
    %345 = vector.extract_strided_slice %135 {offsets = [1, 2], sizes = [16, 16], strides = [1, 1]} : vector<18x18xf32> to vector<16x16xf32>
    %346 = vector.broadcast %43 : f32 to vector<16x16xf32>
    %347 = arith.mulf %345, %346 : vector<16x16xf32>
    %348 = arith.addf %341, %347 : vector<16x16xf32>
    %349 = vector.broadcast %107 : f32 to vector<16x16xf32>
    %350 = arith.mulf %345, %349 : vector<16x16xf32>
    %351 = arith.addf %344, %350 : vector<16x16xf32>
    %352 = vector.extract_strided_slice %137 {offsets = [0, 1], sizes = [16, 16], strides = [1, 1]} : vector<18x18xf32> to vector<16x16xf32>
    %353 = vector.broadcast %49 : f32 to vector<16x16xf32>
    %354 = arith.mulf %352, %353 : vector<16x16xf32>
    %355 = arith.addf %334, %354 : vector<16x16xf32>
    %356 = vector.broadcast %113 : f32 to vector<16x16xf32>
    %357 = arith.mulf %352, %356 : vector<16x16xf32>
    %358 = arith.addf %337, %357 : vector<16x16xf32>
    %359 = vector.extract_strided_slice %137 {offsets = [0, 2], sizes = [16, 16], strides = [1, 1]} : vector<18x18xf32> to vector<16x16xf32>
    %360 = vector.broadcast %51 : f32 to vector<16x16xf32>
    %361 = arith.mulf %359, %360 : vector<16x16xf32>
    %362 = arith.addf %355, %361 : vector<16x16xf32>
    %363 = vector.broadcast %115 : f32 to vector<16x16xf32>
    %364 = arith.mulf %359, %363 : vector<16x16xf32>
    %365 = arith.addf %358, %364 : vector<16x16xf32>
    %366 = vector.extract_strided_slice %137 {offsets = [1, 1], sizes = [16, 16], strides = [1, 1]} : vector<18x18xf32> to vector<16x16xf32>
    %367 = vector.broadcast %57 : f32 to vector<16x16xf32>
    %368 = arith.mulf %366, %367 : vector<16x16xf32>
    %369 = arith.addf %348, %368 : vector<16x16xf32>
    %370 = vector.broadcast %121 : f32 to vector<16x16xf32>
    %371 = arith.mulf %366, %370 : vector<16x16xf32>
    %372 = arith.addf %351, %371 : vector<16x16xf32>
    %373 = vector.extract_strided_slice %137 {offsets = [1, 2], sizes = [16, 16], strides = [1, 1]} : vector<18x18xf32> to vector<16x16xf32>
    %374 = vector.broadcast %59 : f32 to vector<16x16xf32>
    %375 = arith.mulf %373, %374 : vector<16x16xf32>
    %376 = arith.addf %369, %375 : vector<16x16xf32>
    %377 = vector.broadcast %123 : f32 to vector<16x16xf32>
    %378 = arith.mulf %373, %377 : vector<16x16xf32>
    %379 = arith.addf %372, %378 : vector<16x16xf32>
    %380 = arith.addf %362, %376 : vector<16x16xf32>
    %381 = vector.broadcast %128 : f32 to vector<16x16xf32>
    %382 = arith.addf %380, %381 : vector<16x16xf32>
    %cst_35 = arith.constant 0.000000e+00 : f32
    %383 = vector.broadcast %cst_35 : f32 to vector<16x16xf32>
    %384 = arith.cmpf ogt, %382, %383 : vector<16x16xf32>
    %cst_36 = arith.constant -4.000000e-01 : f32
    %385 = vector.broadcast %cst_36 : f32 to vector<16x16xf32>
    %386 = arith.mulf %382, %385 : vector<16x16xf32>
    %387 = arith.select %384, %382, %386 : vector<16x16xi1>, vector<16x16xf32>
    %cst_37 = arith.constant dense<0.000000e+00> : vector<14x16xf32>
    %388 = tpu.matmul %139, %387, %cst_37 {dimension_numbers = #tpu.dot_dimension_numbers<[1], [0], [0], [1], [0, 0, 1, 1], [], []>} : vector<14x16xf32>, vector<16x16xf32>, vector<14x16xf32> -> vector<14x16xf32>
    %389 = arith.addf %365, %379 : vector<16x16xf32>
    %390 = vector.broadcast %129 : f32 to vector<16x16xf32>
    %391 = arith.addf %389, %390 : vector<16x16xf32>
    %cst_38 = arith.constant 0.000000e+00 : f32
    %392 = vector.broadcast %cst_38 : f32 to vector<16x16xf32>
    %393 = arith.cmpf ogt, %391, %392 : vector<16x16xf32>
    %cst_39 = arith.constant -4.000000e-01 : f32
    %394 = vector.broadcast %cst_39 : f32 to vector<16x16xf32>
    %395 = arith.mulf %391, %394 : vector<16x16xf32>
    %396 = arith.select %393, %391, %395 : vector<16x16xi1>, vector<16x16xf32>
    %cst_40 = arith.constant dense<0.000000e+00> : vector<14x16xf32>
    %397 = tpu.matmul %139, %396, %cst_40 {dimension_numbers = #tpu.dot_dimension_numbers<[1], [0], [0], [1], [0, 0, 1, 1], [], []>} : vector<14x16xf32>, vector<16x16xf32>, vector<14x16xf32> -> vector<14x16xf32>
    %398 = vector.extract_strided_slice %131 {offsets = [1, 0], sizes = [16, 16], strides = [1, 1]} : vector<18x18xf32> to vector<16x16xf32>
    %399 = vector.broadcast %4 : f32 to vector<16x16xf32>
    %400 = arith.mulf %398, %399 : vector<16x16xf32>
    %401 = vector.broadcast %68 : f32 to vector<16x16xf32>
    %402 = arith.mulf %398, %401 : vector<16x16xf32>
    %403 = vector.extract_strided_slice %131 {offsets = [1, 1], sizes = [16, 16], strides = [1, 1]} : vector<18x18xf32> to vector<16x16xf32>
    %404 = vector.broadcast %6 : f32 to vector<16x16xf32>
    %405 = arith.mulf %403, %404 : vector<16x16xf32>
    %406 = arith.addf %400, %405 : vector<16x16xf32>
    %407 = vector.broadcast %70 : f32 to vector<16x16xf32>
    %408 = arith.mulf %403, %407 : vector<16x16xf32>
    %409 = arith.addf %402, %408 : vector<16x16xf32>
    %410 = vector.extract_strided_slice %131 {offsets = [2, 0], sizes = [16, 16], strides = [1, 1]} : vector<18x18xf32> to vector<16x16xf32>
    %411 = vector.broadcast %12 : f32 to vector<16x16xf32>
    %412 = arith.mulf %410, %411 : vector<16x16xf32>
    %413 = vector.broadcast %76 : f32 to vector<16x16xf32>
    %414 = arith.mulf %410, %413 : vector<16x16xf32>
    %415 = vector.extract_strided_slice %131 {offsets = [2, 1], sizes = [16, 16], strides = [1, 1]} : vector<18x18xf32> to vector<16x16xf32>
    %416 = vector.broadcast %14 : f32 to vector<16x16xf32>
    %417 = arith.mulf %415, %416 : vector<16x16xf32>
    %418 = arith.addf %412, %417 : vector<16x16xf32>
    %419 = vector.broadcast %78 : f32 to vector<16x16xf32>
    %420 = arith.mulf %415, %419 : vector<16x16xf32>
    %421 = arith.addf %414, %420 : vector<16x16xf32>
    %422 = vector.extract_strided_slice %133 {offsets = [1, 0], sizes = [16, 16], strides = [1, 1]} : vector<18x18xf32> to vector<16x16xf32>
    %423 = vector.broadcast %20 : f32 to vector<16x16xf32>
    %424 = arith.mulf %422, %423 : vector<16x16xf32>
    %425 = arith.addf %406, %424 : vector<16x16xf32>
    %426 = vector.broadcast %84 : f32 to vector<16x16xf32>
    %427 = arith.mulf %422, %426 : vector<16x16xf32>
    %428 = arith.addf %409, %427 : vector<16x16xf32>
    %429 = vector.extract_strided_slice %133 {offsets = [1, 1], sizes = [16, 16], strides = [1, 1]} : vector<18x18xf32> to vector<16x16xf32>
    %430 = vector.broadcast %22 : f32 to vector<16x16xf32>
    %431 = arith.mulf %429, %430 : vector<16x16xf32>
    %432 = arith.addf %425, %431 : vector<16x16xf32>
    %433 = vector.broadcast %86 : f32 to vector<16x16xf32>
    %434 = arith.mulf %429, %433 : vector<16x16xf32>
    %435 = arith.addf %428, %434 : vector<16x16xf32>
    %436 = vector.extract_strided_slice %133 {offsets = [2, 0], sizes = [16, 16], strides = [1, 1]} : vector<18x18xf32> to vector<16x16xf32>
    %437 = vector.broadcast %28 : f32 to vector<16x16xf32>
    %438 = arith.mulf %436, %437 : vector<16x16xf32>
    %439 = arith.addf %418, %438 : vector<16x16xf32>
    %440 = vector.broadcast %92 : f32 to vector<16x16xf32>
    %441 = arith.mulf %436, %440 : vector<16x16xf32>
    %442 = arith.addf %421, %441 : vector<16x16xf32>
    %443 = vector.extract_strided_slice %133 {offsets = [2, 1], sizes = [16, 16], strides = [1, 1]} : vector<18x18xf32> to vector<16x16xf32>
    %444 = vector.broadcast %30 : f32 to vector<16x16xf32>
    %445 = arith.mulf %443, %444 : vector<16x16xf32>
    %446 = arith.addf %439, %445 : vector<16x16xf32>
    %447 = vector.broadcast %94 : f32 to vector<16x16xf32>
    %448 = arith.mulf %443, %447 : vector<16x16xf32>
    %449 = arith.addf %442, %448 : vector<16x16xf32>
    %450 = vector.extract_strided_slice %135 {offsets = [1, 0], sizes = [16, 16], strides = [1, 1]} : vector<18x18xf32> to vector<16x16xf32>
    %451 = vector.broadcast %36 : f32 to vector<16x16xf32>
    %452 = arith.mulf %450, %451 : vector<16x16xf32>
    %453 = arith.addf %432, %452 : vector<16x16xf32>
    %454 = vector.broadcast %100 : f32 to vector<16x16xf32>
    %455 = arith.mulf %450, %454 : vector<16x16xf32>
    %456 = arith.addf %435, %455 : vector<16x16xf32>
    %457 = vector.extract_strided_slice %135 {offsets = [1, 1], sizes = [16, 16], strides = [1, 1]} : vector<18x18xf32> to vector<16x16xf32>
    %458 = vector.broadcast %38 : f32 to vector<16x16xf32>
    %459 = arith.mulf %457, %458 : vector<16x16xf32>
    %460 = arith.addf %453, %459 : vector<16x16xf32>
    %461 = vector.broadcast %102 : f32 to vector<16x16xf32>
    %462 = arith.mulf %457, %461 : vector<16x16xf32>
    %463 = arith.addf %456, %462 : vector<16x16xf32>
    %464 = vector.extract_strided_slice %135 {offsets = [2, 0], sizes = [16, 16], strides = [1, 1]} : vector<18x18xf32> to vector<16x16xf32>
    %465 = vector.broadcast %44 : f32 to vector<16x16xf32>
    %466 = arith.mulf %464, %465 : vector<16x16xf32>
    %467 = arith.addf %446, %466 : vector<16x16xf32>
    %468 = vector.broadcast %108 : f32 to vector<16x16xf32>
    %469 = arith.mulf %464, %468 : vector<16x16xf32>
    %470 = arith.addf %449, %469 : vector<16x16xf32>
    %471 = vector.extract_strided_slice %135 {offsets = [2, 1], sizes = [16, 16], strides = [1, 1]} : vector<18x18xf32> to vector<16x16xf32>
    %472 = vector.broadcast %46 : f32 to vector<16x16xf32>
    %473 = arith.mulf %471, %472 : vector<16x16xf32>
    %474 = arith.addf %467, %473 : vector<16x16xf32>
    %475 = vector.broadcast %110 : f32 to vector<16x16xf32>
    %476 = arith.mulf %471, %475 : vector<16x16xf32>
    %477 = arith.addf %470, %476 : vector<16x16xf32>
    %478 = vector.extract_strided_slice %137 {offsets = [1, 0], sizes = [16, 16], strides = [1, 1]} : vector<18x18xf32> to vector<16x16xf32>
    %479 = vector.broadcast %52 : f32 to vector<16x16xf32>
    %480 = arith.mulf %478, %479 : vector<16x16xf32>
    %481 = arith.addf %460, %480 : vector<16x16xf32>
    %482 = vector.broadcast %116 : f32 to vector<16x16xf32>
    %483 = arith.mulf %478, %482 : vector<16x16xf32>
    %484 = arith.addf %463, %483 : vector<16x16xf32>
    %485 = vector.extract_strided_slice %137 {offsets = [1, 1], sizes = [16, 16], strides = [1, 1]} : vector<18x18xf32> to vector<16x16xf32>
    %486 = vector.broadcast %54 : f32 to vector<16x16xf32>
    %487 = arith.mulf %485, %486 : vector<16x16xf32>
    %488 = arith.addf %481, %487 : vector<16x16xf32>
    %489 = vector.broadcast %118 : f32 to vector<16x16xf32>
    %490 = arith.mulf %485, %489 : vector<16x16xf32>
    %491 = arith.addf %484, %490 : vector<16x16xf32>
    %492 = vector.extract_strided_slice %137 {offsets = [2, 0], sizes = [16, 16], strides = [1, 1]} : vector<18x18xf32> to vector<16x16xf32>
    %493 = vector.broadcast %60 : f32 to vector<16x16xf32>
    %494 = arith.mulf %492, %493 : vector<16x16xf32>
    %495 = arith.addf %474, %494 : vector<16x16xf32>
    %496 = vector.broadcast %124 : f32 to vector<16x16xf32>
    %497 = arith.mulf %492, %496 : vector<16x16xf32>
    %498 = arith.addf %477, %497 : vector<16x16xf32>
    %499 = vector.extract_strided_slice %137 {offsets = [2, 1], sizes = [16, 16], strides = [1, 1]} : vector<18x18xf32> to vector<16x16xf32>
    %500 = vector.broadcast %62 : f32 to vector<16x16xf32>
    %501 = arith.mulf %499, %500 : vector<16x16xf32>
    %502 = arith.addf %495, %501 : vector<16x16xf32>
    %503 = vector.broadcast %126 : f32 to vector<16x16xf32>
    %504 = arith.mulf %499, %503 : vector<16x16xf32>
    %505 = arith.addf %498, %504 : vector<16x16xf32>
    %506 = arith.addf %488, %502 : vector<16x16xf32>
    %507 = vector.broadcast %128 : f32 to vector<16x16xf32>
    %508 = arith.addf %506, %507 : vector<16x16xf32>
    %cst_41 = arith.constant 0.000000e+00 : f32
    %509 = vector.broadcast %cst_41 : f32 to vector<16x16xf32>
    %510 = arith.cmpf ogt, %508, %509 : vector<16x16xf32>
    %cst_42 = arith.constant -4.000000e-01 : f32
    %511 = vector.broadcast %cst_42 : f32 to vector<16x16xf32>
    %512 = arith.mulf %508, %511 : vector<16x16xf32>
    %513 = arith.select %510, %508, %512 : vector<16x16xi1>, vector<16x16xf32>
    %cst_43 = arith.constant dense<0.000000e+00> : vector<14x16xf32>
    %514 = tpu.matmul %141, %513, %cst_43 {dimension_numbers = #tpu.dot_dimension_numbers<[1], [0], [0], [1], [0, 0, 1, 1], [], []>} : vector<14x16xf32>, vector<16x16xf32>, vector<14x16xf32> -> vector<14x16xf32>
    %515 = arith.addf %262, %514 : vector<14x16xf32>
    %516 = arith.addf %491, %505 : vector<16x16xf32>
    %517 = vector.broadcast %129 : f32 to vector<16x16xf32>
    %518 = arith.addf %516, %517 : vector<16x16xf32>
    %cst_44 = arith.constant 0.000000e+00 : f32
    %519 = vector.broadcast %cst_44 : f32 to vector<16x16xf32>
    %520 = arith.cmpf ogt, %518, %519 : vector<16x16xf32>
    %cst_45 = arith.constant -4.000000e-01 : f32
    %521 = vector.broadcast %cst_45 : f32 to vector<16x16xf32>
    %522 = arith.mulf %518, %521 : vector<16x16xf32>
    %523 = arith.select %520, %518, %522 : vector<16x16xi1>, vector<16x16xf32>
    %cst_46 = arith.constant dense<0.000000e+00> : vector<14x16xf32>
    %524 = tpu.matmul %141, %523, %cst_46 {dimension_numbers = #tpu.dot_dimension_numbers<[1], [0], [0], [1], [0, 0, 1, 1], [], []>} : vector<14x16xf32>, vector<16x16xf32>, vector<14x16xf32> -> vector<14x16xf32>
    %525 = arith.addf %271, %524 : vector<14x16xf32>
    %526 = vector.extract_strided_slice %131 {offsets = [1, 1], sizes = [16, 16], strides = [1, 1]} : vector<18x18xf32> to vector<16x16xf32>
    %527 = vector.broadcast %5 : f32 to vector<16x16xf32>
    %528 = arith.mulf %526, %527 : vector<16x16xf32>
    %529 = vector.broadcast %69 : f32 to vector<16x16xf32>
    %530 = arith.mulf %526, %529 : vector<16x16xf32>
    %531 = vector.extract_strided_slice %131 {offsets = [1, 2], sizes = [16, 16], strides = [1, 1]} : vector<18x18xf32> to vector<16x16xf32>
    %532 = vector.broadcast %7 : f32 to vector<16x16xf32>
    %533 = arith.mulf %531, %532 : vector<16x16xf32>
    %534 = arith.addf %528, %533 : vector<16x16xf32>
    %535 = vector.broadcast %71 : f32 to vector<16x16xf32>
    %536 = arith.mulf %531, %535 : vector<16x16xf32>
    %537 = arith.addf %530, %536 : vector<16x16xf32>
    %538 = vector.extract_strided_slice %131 {offsets = [2, 1], sizes = [16, 16], strides = [1, 1]} : vector<18x18xf32> to vector<16x16xf32>
    %539 = vector.broadcast %13 : f32 to vector<16x16xf32>
    %540 = arith.mulf %538, %539 : vector<16x16xf32>
    %541 = vector.broadcast %77 : f32 to vector<16x16xf32>
    %542 = arith.mulf %538, %541 : vector<16x16xf32>
    %543 = vector.extract_strided_slice %131 {offsets = [2, 2], sizes = [16, 16], strides = [1, 1]} : vector<18x18xf32> to vector<16x16xf32>
    %544 = vector.broadcast %15 : f32 to vector<16x16xf32>
    %545 = arith.mulf %543, %544 : vector<16x16xf32>
    %546 = arith.addf %540, %545 : vector<16x16xf32>
    %547 = vector.broadcast %79 : f32 to vector<16x16xf32>
    %548 = arith.mulf %543, %547 : vector<16x16xf32>
    %549 = arith.addf %542, %548 : vector<16x16xf32>
    %550 = vector.extract_strided_slice %133 {offsets = [1, 1], sizes = [16, 16], strides = [1, 1]} : vector<18x18xf32> to vector<16x16xf32>
    %551 = vector.broadcast %21 : f32 to vector<16x16xf32>
    %552 = arith.mulf %550, %551 : vector<16x16xf32>
    %553 = arith.addf %534, %552 : vector<16x16xf32>
    %554 = vector.broadcast %85 : f32 to vector<16x16xf32>
    %555 = arith.mulf %550, %554 : vector<16x16xf32>
    %556 = arith.addf %537, %555 : vector<16x16xf32>
    %557 = vector.extract_strided_slice %133 {offsets = [1, 2], sizes = [16, 16], strides = [1, 1]} : vector<18x18xf32> to vector<16x16xf32>
    %558 = vector.broadcast %23 : f32 to vector<16x16xf32>
    %559 = arith.mulf %557, %558 : vector<16x16xf32>
    %560 = arith.addf %553, %559 : vector<16x16xf32>
    %561 = vector.broadcast %87 : f32 to vector<16x16xf32>
    %562 = arith.mulf %557, %561 : vector<16x16xf32>
    %563 = arith.addf %556, %562 : vector<16x16xf32>
    %564 = vector.extract_strided_slice %133 {offsets = [2, 1], sizes = [16, 16], strides = [1, 1]} : vector<18x18xf32> to vector<16x16xf32>
    %565 = vector.broadcast %29 : f32 to vector<16x16xf32>
    %566 = arith.mulf %564, %565 : vector<16x16xf32>
    %567 = arith.addf %546, %566 : vector<16x16xf32>
    %568 = vector.broadcast %93 : f32 to vector<16x16xf32>
    %569 = arith.mulf %564, %568 : vector<16x16xf32>
    %570 = arith.addf %549, %569 : vector<16x16xf32>
    %571 = vector.extract_strided_slice %133 {offsets = [2, 2], sizes = [16, 16], strides = [1, 1]} : vector<18x18xf32> to vector<16x16xf32>
    %572 = vector.broadcast %31 : f32 to vector<16x16xf32>
    %573 = arith.mulf %571, %572 : vector<16x16xf32>
    %574 = arith.addf %567, %573 : vector<16x16xf32>
    %575 = vector.broadcast %95 : f32 to vector<16x16xf32>
    %576 = arith.mulf %571, %575 : vector<16x16xf32>
    %577 = arith.addf %570, %576 : vector<16x16xf32>
    %578 = vector.extract_strided_slice %135 {offsets = [1, 1], sizes = [16, 16], strides = [1, 1]} : vector<18x18xf32> to vector<16x16xf32>
    %579 = vector.broadcast %37 : f32 to vector<16x16xf32>
    %580 = arith.mulf %578, %579 : vector<16x16xf32>
    %581 = arith.addf %560, %580 : vector<16x16xf32>
    %582 = vector.broadcast %101 : f32 to vector<16x16xf32>
    %583 = arith.mulf %578, %582 : vector<16x16xf32>
    %584 = arith.addf %563, %583 : vector<16x16xf32>
    %585 = vector.extract_strided_slice %135 {offsets = [1, 2], sizes = [16, 16], strides = [1, 1]} : vector<18x18xf32> to vector<16x16xf32>
    %586 = vector.broadcast %39 : f32 to vector<16x16xf32>
    %587 = arith.mulf %585, %586 : vector<16x16xf32>
    %588 = arith.addf %581, %587 : vector<16x16xf32>
    %589 = vector.broadcast %103 : f32 to vector<16x16xf32>
    %590 = arith.mulf %585, %589 : vector<16x16xf32>
    %591 = arith.addf %584, %590 : vector<16x16xf32>
    %592 = vector.extract_strided_slice %135 {offsets = [2, 1], sizes = [16, 16], strides = [1, 1]} : vector<18x18xf32> to vector<16x16xf32>
    %593 = vector.broadcast %45 : f32 to vector<16x16xf32>
    %594 = arith.mulf %592, %593 : vector<16x16xf32>
    %595 = arith.addf %574, %594 : vector<16x16xf32>
    %596 = vector.broadcast %109 : f32 to vector<16x16xf32>
    %597 = arith.mulf %592, %596 : vector<16x16xf32>
    %598 = arith.addf %577, %597 : vector<16x16xf32>
    %599 = vector.extract_strided_slice %135 {offsets = [2, 2], sizes = [16, 16], strides = [1, 1]} : vector<18x18xf32> to vector<16x16xf32>
    %600 = vector.broadcast %47 : f32 to vector<16x16xf32>
    %601 = arith.mulf %599, %600 : vector<16x16xf32>
    %602 = arith.addf %595, %601 : vector<16x16xf32>
    %603 = vector.broadcast %111 : f32 to vector<16x16xf32>
    %604 = arith.mulf %599, %603 : vector<16x16xf32>
    %605 = arith.addf %598, %604 : vector<16x16xf32>
    %606 = vector.extract_strided_slice %137 {offsets = [1, 1], sizes = [16, 16], strides = [1, 1]} : vector<18x18xf32> to vector<16x16xf32>
    %607 = vector.broadcast %53 : f32 to vector<16x16xf32>
    %608 = arith.mulf %606, %607 : vector<16x16xf32>
    %609 = arith.addf %588, %608 : vector<16x16xf32>
    %610 = vector.broadcast %117 : f32 to vector<16x16xf32>
    %611 = arith.mulf %606, %610 : vector<16x16xf32>
    %612 = arith.addf %591, %611 : vector<16x16xf32>
    %613 = vector.extract_strided_slice %137 {offsets = [1, 2], sizes = [16, 16], strides = [1, 1]} : vector<18x18xf32> to vector<16x16xf32>
    %614 = vector.broadcast %55 : f32 to vector<16x16xf32>
    %615 = arith.mulf %613, %614 : vector<16x16xf32>
    %616 = arith.addf %609, %615 : vector<16x16xf32>
    %617 = vector.broadcast %119 : f32 to vector<16x16xf32>
    %618 = arith.mulf %613, %617 : vector<16x16xf32>
    %619 = arith.addf %612, %618 : vector<16x16xf32>
    %620 = vector.extract_strided_slice %137 {offsets = [2, 1], sizes = [16, 16], strides = [1, 1]} : vector<18x18xf32> to vector<16x16xf32>
    %621 = vector.broadcast %61 : f32 to vector<16x16xf32>
    %622 = arith.mulf %620, %621 : vector<16x16xf32>
    %623 = arith.addf %602, %622 : vector<16x16xf32>
    %624 = vector.broadcast %125 : f32 to vector<16x16xf32>
    %625 = arith.mulf %620, %624 : vector<16x16xf32>
    %626 = arith.addf %605, %625 : vector<16x16xf32>
    %627 = vector.extract_strided_slice %137 {offsets = [2, 2], sizes = [16, 16], strides = [1, 1]} : vector<18x18xf32> to vector<16x16xf32>
    %628 = vector.broadcast %63 : f32 to vector<16x16xf32>
    %629 = arith.mulf %627, %628 : vector<16x16xf32>
    %630 = arith.addf %623, %629 : vector<16x16xf32>
    %631 = vector.broadcast %127 : f32 to vector<16x16xf32>
    %632 = arith.mulf %627, %631 : vector<16x16xf32>
    %633 = arith.addf %626, %632 : vector<16x16xf32>
    %634 = arith.addf %616, %630 : vector<16x16xf32>
    %635 = vector.broadcast %128 : f32 to vector<16x16xf32>
    %636 = arith.addf %634, %635 : vector<16x16xf32>
    %cst_47 = arith.constant 0.000000e+00 : f32
    %637 = vector.broadcast %cst_47 : f32 to vector<16x16xf32>
    %638 = arith.cmpf ogt, %636, %637 : vector<16x16xf32>
    %cst_48 = arith.constant -4.000000e-01 : f32
    %639 = vector.broadcast %cst_48 : f32 to vector<16x16xf32>
    %640 = arith.mulf %636, %639 : vector<16x16xf32>
    %641 = arith.select %638, %636, %640 : vector<16x16xi1>, vector<16x16xf32>
    %cst_49 = arith.constant dense<0.000000e+00> : vector<14x16xf32>
    %642 = tpu.matmul %141, %641, %cst_49 {dimension_numbers = #tpu.dot_dimension_numbers<[1], [0], [0], [1], [0, 0, 1, 1], [], []>} : vector<14x16xf32>, vector<16x16xf32>, vector<14x16xf32> -> vector<14x16xf32>
    %643 = arith.addf %388, %642 : vector<14x16xf32>
    %644 = arith.addf %619, %633 : vector<16x16xf32>
    %645 = vector.broadcast %129 : f32 to vector<16x16xf32>
    %646 = arith.addf %644, %645 : vector<16x16xf32>
    %cst_50 = arith.constant 0.000000e+00 : f32
    %647 = vector.broadcast %cst_50 : f32 to vector<16x16xf32>
    %648 = arith.cmpf ogt, %646, %647 : vector<16x16xf32>
    %cst_51 = arith.constant -4.000000e-01 : f32
    %649 = vector.broadcast %cst_51 : f32 to vector<16x16xf32>
    %650 = arith.mulf %646, %649 : vector<16x16xf32>
    %651 = arith.select %648, %646, %650 : vector<16x16xi1>, vector<16x16xf32>
    %cst_52 = arith.constant dense<0.000000e+00> : vector<14x16xf32>
    %652 = tpu.matmul %141, %651, %cst_52 {dimension_numbers = #tpu.dot_dimension_numbers<[1], [0], [0], [1], [0, 0, 1, 1], [], []>} : vector<14x16xf32>, vector<16x16xf32>, vector<14x16xf32> -> vector<14x16xf32>
    %653 = arith.addf %397, %652 : vector<14x16xf32>
    %cst_53 = arith.constant dense<0.000000e+00> : vector<14x128xf32>
    %654 = tpu.matmul %515, %143, %cst_53 {dimension_numbers = #tpu.dot_dimension_numbers<[1], [0], [0], [1], [0, 0, 1, 1], [], []>} : vector<14x16xf32>, vector<16x128xf32>, vector<14x128xf32> -> vector<14x128xf32>
    %cst_54 = arith.constant dense<0.000000e+00> : vector<14x128xf32>
    %655 = tpu.matmul %643, %145, %cst_54 {dimension_numbers = #tpu.dot_dimension_numbers<[1], [0], [0], [1], [0, 0, 1, 1], [], []>} : vector<14x16xf32>, vector<16x128xf32>, vector<14x128xf32> -> vector<14x128xf32>
    %656 = arith.addf %654, %655 : vector<14x128xf32>
    %cst_55 = arith.constant -6.02771187 : f32
    %cst_56 = arith.constant 6.02771187 : f32
    %657 = vector.broadcast %cst_55 : f32 to vector<14x128xf32>
    %658 = arith.maximumf %657, %656 : vector<14x128xf32>
    %659 = vector.broadcast %cst_56 : f32 to vector<14x128xf32>
    %660 = arith.minimumf %659, %658 : vector<14x128xf32>
    %c0_57 = arith.constant 0 : index
    %c0_58 = arith.constant 0 : index
    %c0_59 = arith.constant 0 : index
    %c0_60 = arith.constant 0 : index
    %661 = vector.load %arg6[%c0_57, %c0_58, %c0_59, %c0_60] : memref<1x2x14x128xf32, #tpu.memory_space<vmem>>, vector<1x1x14x128xf32>
    %662 = vector.shape_cast %661 : vector<1x1x14x128xf32> to vector<14x128xf32>
    %663 = vector.shape_cast %660 : vector<14x128xf32> to vector<1x1x14x128xf32>
    tpu.vector_store %arg6[%c0_57, %c0_58, %c0_59, %c0_60], %663 {strides = array<i32>} : memref<1x2x14x128xf32, #tpu.memory_space<vmem>>, vector<1x1x14x128xf32>,
    %cst_61 = arith.constant dense<0.000000e+00> : vector<14x128xf32>
    %664 = tpu.matmul %525, %143, %cst_61 {dimension_numbers = #tpu.dot_dimension_numbers<[1], [0], [0], [1], [0, 0, 1, 1], [], []>} : vector<14x16xf32>, vector<16x128xf32>, vector<14x128xf32> -> vector<14x128xf32>
    %cst_62 = arith.constant dense<0.000000e+00> : vector<14x128xf32>
    %665 = tpu.matmul %653, %145, %cst_62 {dimension_numbers = #tpu.dot_dimension_numbers<[1], [0], [0], [1], [0, 0, 1, 1], [], []>} : vector<14x16xf32>, vector<16x128xf32>, vector<14x128xf32> -> vector<14x128xf32>
    %666 = arith.addf %664, %665 : vector<14x128xf32>
    %cst_63 = arith.constant -6.02771187 : f32
    %cst_64 = arith.constant 6.02771187 : f32
    %667 = vector.broadcast %cst_63 : f32 to vector<14x128xf32>
    %668 = arith.maximumf %667, %666 : vector<14x128xf32>
    %669 = vector.broadcast %cst_64 : f32 to vector<14x128xf32>
    %670 = arith.minimumf %669, %668 : vector<14x128xf32>
    %c0_65 = arith.constant 0 : index
    %c1_66 = arith.constant 1 : index
    %c0_67 = arith.constant 0 : index
    %c0_68 = arith.constant 0 : index
    %671 = vector.load %arg6[%c0_65, %c1_66, %c0_67, %c0_68] : memref<1x2x14x128xf32, #tpu.memory_space<vmem>>, vector<1x1x14x128xf32>
    %672 = vector.shape_cast %671 : vector<1x1x14x128xf32> to vector<14x128xf32>
    %673 = vector.shape_cast %670 : vector<14x128xf32> to vector<1x1x14x128xf32>
    tpu.vector_store %arg6[%c0_65, %c1_66, %c0_67, %c0_68], %673 {strides = array<i32>} : memref<1x2x14x128xf32, #tpu.memory_space<vmem>>, vector<1x1x14x128xf32>,
    return
  }
  func.func @transform_0(%arg0: i32) -> (i32, i32, i32, i32) {
    %c0_i32 = arith.constant 0 : i32
    %c0_i32_0 = arith.constant 0 : i32
    %c0_i32_1 = arith.constant 0 : i32
    %c0_i32_2 = arith.constant 0 : i32
    return %arg0, %c0_i32, %c0_i32_0, %c0_i32_1 : i32, i32, i32, i32
  }
  func.func @transform_1(%arg0: i32) -> i32 {
    %c0_i32 = arith.constant 0 : i32
    %c0_i32_0 = arith.constant 0 : i32
    return %c0_i32 : i32
  }
  func.func @transform_2(%arg0: i32) -> i32 {
    %c0_i32 = arith.constant 0 : i32
    %c0_i32_0 = arith.constant 0 : i32
    return %c0_i32 : i32
  }
  func.func @transform_3(%arg0: i32) -> (i32, i32, i32) {
    %c0_i32 = arith.constant 0 : i32
    %c0_i32_0 = arith.constant 0 : i32
    %c0_i32_1 = arith.constant 0 : i32
    %c0_i32_2 = arith.constant 0 : i32
    return %c0_i32, %c0_i32_0, %c0_i32_1 : i32, i32, i32
  }
  func.func @transform_4(%arg0: i32) -> (i32, i32, i32) {
    %c0_i32 = arith.constant 0 : i32
    %c0_i32_0 = arith.constant 0 : i32
    %c0_i32_1 = arith.constant 0 : i32
    %c0_i32_2 = arith.constant 0 : i32
    return %c0_i32, %c0_i32_0, %c0_i32_1 : i32, i32, i32
  }
  func.func @transform_5(%arg0: i32) -> (i32, i32, i32, i32) {
    %c0_i32 = arith.constant 0 : i32
    %c0_i32_0 = arith.constant 0 : i32
    %c0_i32_1 = arith.constant 0 : i32
    %c0_i32_2 = arith.constant 0 : i32
    return %arg0, %c0_i32, %c0_i32_0, %c0_i32_1 : i32, i32, i32, i32
  }
}

</mosaic_0001>

<bundles_post_ra>
// kernel: model_forward.1
= control target key start
LH: loop header
LB: loop body
LE: loop exit
PB: predicated region body
PF: predicated region fallthrough
CT: control target
= control target key end

     0   :  { %10 = vsyncpa [#allocation3], 0  ;;  %s6057_s0 = inlined_call_operand.vmem [shape: f32[2,4,18,18], index: 0, kind: input, shape index: {}]   ;;  %s6058_s1 = inlined_call_operand.vmem [shape: f32[128], index: 1, kind: input, shape index: {}]   ;;  %s6059_s2 = inlined_call_operand.vmem [shape: f32[2], index: 2, kind: input, shape index: {}]   ;;  %s6060_s3 = inlined_call_operand.vmem [shape: f32[2,14,16], index: 3, kind: input, shape index: {}]   ;;  %s6061_s4 = inlined_call_operand.vmem [shape: f32[2,16,128], index: 4, kind: input, shape index: {}]   ;;  %s6062_s5 = inlined_call_operand.vmem [shape: f32[2,2,14,128], index: 5, kind: output, shape index: {}]  }
   0x1   :  { %11 = vsyncpa [#allocation5], 0  ;;  %s3628_s18 = smov 0  }
   0x2 LB: > { %s3634_s19 = sadd.s32 4294967295, %s3593_s18   ;;  %p3179_p0 = scmp.ge.s32.totalorder %s3593_s18, 1  ;;  %s3593_s18 = sphi %s3628_s18, %s17_s18  }
   0x3   : > { %p158_p1 = scmp.lt.s32.totalorder %s3593_s18, 3  ;;  %s171_s22 = sshll.u32 %s6058_s1, 4  ;;  %s172_s22 = int_to_ptr.vmem [resolvable:$true] %s171_s22 }
   0x4   : > { %p6063_p3 = scmp.eq.s32.totalorder %s3634_s19, 0  ;;  %s182_s26 = sshll.u32 %s6059_s2, 4  ;;  %s183_s26 = int_to_ptr.vmem [resolvable:$true] %s182_s26 }
   0x5   : > { %p3641_p2 = pnand %p3179_p0, %p158_p1  ;;  %s3549_s28 = scalar_lea.vmem %s172_s22, 16 }
   0x6   : > { %p3550_p6 = scmp.ne.s32.totalorder %s172_s22, %s3549_s28  ;;  %p3557_p10 = scmp.lt.s32.totalorder %s172_s22, %s172_s22 }
   0x7   : > { %s6090_s23 = scalar_select %p3641_p2, 1, 0 }
   0x8   : > { %p3504_p4 = pneg %p3641_p2  ;;  %p3558_p11 = scmp.lt.s32.totalorder %s3549_s28, %s3549_s28 }
   0xa   : > { %p3653_p5 = pnand %p6063_p3, %p3504_p4  ;;  %p3559_p12 = por %p3558_p11, %p3557_p10 }
   0xc   : > { %p3551_p7 = pneg %p3653_p5 }
   0xe   : > { %p3552_p8 = pnand %p3551_p7, %p3550_p6 }
  0x10   : > { %p3553_p9 = pneg %p3552_p8 }
  0x12   : > { %p3560_p13 = pnand %p3559_p12, %p3553_p9 }
  0x14   : > { %3563 = shalt.err (!%p3560_p13)
}
  0x15   : > { %s3595_s29 = smov [#allocation2]   ;;  %s3564_s30 = scalar_lea.vmem %s183_s26, 16 }
  0x16   : > { %3507 = dma.vmem_to_smem (!%p3653_p5), %s172_s22, 16, %s3595_s29, [#allocation3]  }
  0x17   : > { %p3565_p0 = scmp.ne.s32.totalorder %s183_s26, %s3564_s30  ;;  %p3572_p3 = scmp.lt.s32.totalorder %s183_s26, %s183_s26 }
  0x18   : > { %p3573_p2 = scmp.lt.s32.totalorder %s3564_s30, %s3564_s30 }
  0x19   : > { %p3567_p1 = pnand %p3565_p0, %p3551_p7 }
  0x1a   : > { %p3574_p6 = por %p3573_p2, %p3572_p3 }
  0x1b   : > { %p3568_p4 = pneg %p3567_p1 }
  0x1d   : > { %p3575_p8 = pnand %p3574_p6, %p3568_p4 }
  0x1f   : > { %3578 = shalt.err (!%p3575_p8)
}
  0x20   : > { %s3596_s6 = smov [#allocation4]   ;;  %p6092_p9 = scmp.ne.s32.totalorder %s6090_s23, 0 }
  0x21   : > { %3510 = dma.vmem_to_smem (!%p3653_p5), %s183_s26, 16, %s3596_s6, [#allocation5]  }
  0x22   : > { %209 = sbr.rel (%p6092_p9) target bundleno = 954 (0x3ba), region = 40 }
  0x27   : > { %p6093_p10 = scmp.eq.s32.totalorder %s3634_s19, 0 }
  0x29   : > { %3584 = dma.done.wait (%p6093_p10), [#allocation3], 16   ;;  %p6094_p11 = pmov %p6093_p10 }
  0x2a   : > { %p6095_p7 = pmov %p6093_p10 }
  0x2b   : > { %3586 = vsyncadd (%p6094_p11), [#allocation3], 4294967280 }
  0x2c   : > { %3588 = dma.done.wait (%p6095_p7), [#allocation5], 16   ;;  %p6096_p2 = pmov %p6095_p7 }
  0x2e   : > { %3590 = vsyncadd (%p6096_p2), [#allocation5], 4294967280 }
  0x2f   : > { %219 = sfence }
  0x30   : > { %p242_p3 = scmp.lt.s32.totalorder %s3634_s19, 1  ;;  %s3203_s7 = sld [smem:[#allocation2 + $0xf]]  ;;  %vm752_vm0 = vcmask 1046528   ;;  %vm1614_vm3 = vcmask 130048  }
  0x31   : > { %s3199_s8 = sld [smem:[#allocation2 + $0xb]]  ;;  %s3597_s15 = smov 127  }
  0x32   : > { %s6499_s19 = smov (!%p242_p3, %s3634_s19), 1  ;;  %s3195_s9 = sld [smem:[#allocation2 + $0x7]] }
  0x33   : > { %s3495_s10 = smul.u32 96, %s6499_s19  ;;  %s3267_s14 = sld [smem:[#allocation2 + $0x4f]] }
  0x34   : > { %s3219_s16 = sld [smem:[#allocation2 + $0x1f]] }
  0x35   : > { %s3681_s13 = scalar_lea.vmem %s6057_s0, %s3495_s10  ;;  %s3709_s17 = sld [smem:[#allocation2 + $0x3]] }
  0x36   : > { %v2017_v0 = vstv %s3203_s7  ;;  %v3684_v1 = vld [vmem:[%s3681_s13 + $0x8] sm:$0xff]  ;;  %v3687_v2 = vld [vmem:[%s3681_s13] sm:$0xff]  ;;  %v3690_v3 = vld [vmem:[%s3681_s13 + $0x10] sm:$0x3]  ;;  %s3263_s20 = sld [smem:[#allocation2 + $0x4b]] }
  0x37   : > { %v832_v4 = vstv %s3199_s8  ;;  %v2019_v5 = vmul.f32 %v2017_v0, %v3684_v1  ;;  %v2018_v6 = vmul.f32 %v2017_v0, %v3687_v2  ;;  %v2020_v7 = vmul.f32 %v2017_v0, %v3690_v3  ;;  %v3707_v15 = vld [vmem:[%s3681_s13 + $0x20] sm:$0xff]  ;;  %v3716_v19 = vld [vmem:[%s3681_s13 + $0x28] sm:$0x3]  ;;  %v3728_v25 = vld [vmem:[%s3681_s13 + $0x18] sm:$0xff]  ;;  %s3215_s21 = sld [smem:[#allocation2 + $0x1b]] }
  0x38   : > { %v834_v8 = vmul.f32 %v832_v4, %v3684_v1  ;;  %v1971_v9 = vstv %s3195_s9  ;;  %v835_v10 = vmul.f32 %v832_v4, %v3690_v3  ;;  %v833_v21 = vmul.f32 %v832_v4, %v3687_v2  ;;  %s3259_s22 = sld [smem:[#allocation2 + $0x47]]  ;;  %v3755_v43 = vld [vmem:[%s3681_s13 + $0x38] sm:$0xff]  ;;  %v3762_v47 = vld [vmem:[%s3681_s13 + $0x40] sm:$0x3]  ;;  %v3787_v59 = vld [vmem:[%s3681_s13 + $0x30] sm:$0xff] }
  0x39   : > { %2026 = vrot.lane.b32.xlu0 %v2019_v5, %s3597_s15  ;;  %2024 = vrot.lane.b32.xlu1 %v2018_v6, %s3597_s15  ;;  %v1973_v11 = vmul.f32 %v1971_v9, %v3684_v1  ;;  %v2036_v12 = vstv %s3267_s14  ;;  %v1974_v13 = vmul.f32 %v1971_v9, %v3690_v3  ;;  %v1972_v23 = vmul.f32 %v1971_v9, %v3687_v2  ;;  %s3211_s23 = sld [smem:[#allocation2 + $0x17]] }
  0x3a   : > { %v2038_v14 = vmul.f32 %v2036_v12, %v3684_v1  ;;  %v2121_v16 = vstv %s3219_s16  ;;  %v2039_v17 = vmul.f32 %v2036_v12, %v3690_v3  ;;  %v2037_v26 = vmul.f32 %v2036_v12, %v3687_v2  ;;  %s3283_s24 = sld [smem:[#allocation2 + $0x5f]] }
  0x3b   : > { %v2123_v18 = vmul.f32 %v3707_v15, %v2121_v16  ;;  %v2124_v20 = vmul.f32 %v3716_v19, %v2121_v16  ;;  %v798_v22 = vstv %s3709_s17  ;;  %v2122_v27 = vmul.f32 %v3728_v25, %v2121_v16  ;;  %s3235_s25 = sld [smem:[#allocation2 + $0x2f]]  ;;  %v3814_v16 = vld [vmem:[%s3681_s13 + $0x50] sm:$0xff] }
  0x3c   : > { %v800_v24 = vmul.f32 %v798_v22, %v3684_v1  ;;  %v851_v28 = vstv %s3263_s20  ;;  %v799_v42 = vmul.f32 %v798_v22, %v3687_v2  ;;  %s3764_s26 = sld [smem:[#allocation2 + $0x43]] }
  0x3d   : > { %2028 = vrot.lane.b32.xlu0 %v2020_v7, %s3597_s15  ;;  %841 = vrot.lane.b32.xlu1 %v834_v8, %s3597_s15  ;;  %v853_v29 = vmul.f32 %v851_v28, %v3684_v1  ;;  %v854_v30 = vmul.f32 %v851_v28, %v3690_v3  ;;  %v920_v31 = vstv %s3215_s21  ;;  %v852_v48 = vmul.f32 %v851_v28, %v3687_v2  ;;  %s3770_s27 = sld [smem:[#allocation2 + $0x13]] }
  0x3e   : > { %v922_v32 = vmul.f32 %v3707_v15, %v920_v31  ;;  %v923_v33 = vmul.f32 %v3716_v19, %v920_v31  ;;  %v1990_v34 = vstv %s3259_s22  ;;  %v921_v51 = vmul.f32 %v3728_v25, %v920_v31  ;;  %s3279_s28 = sld [smem:[#allocation2 + $0x5b]] }
  0x3f   : > { %v1992_v35 = vmul.f32 %v1990_v34, %v3684_v1  ;;  %v1993_v36 = vmul.f32 %v1990_v34, %v3690_v3  ;;  %v2069_v37 = vstv %s3211_s23  ;;  %v1991_v50 = vmul.f32 %v1990_v34, %v3687_v2  ;;  %s3231_s29 = sld [smem:[#allocation2 + $0x2b]]  ;;  %v3846_v34 = vld [vmem:[%s3681_s13 + $0x48] sm:$0xff] }
  0x40   : > { %v2071_v38 = vmul.f32 %v3707_v15, %v2069_v37  ;;  %v2072_v39 = vmul.f32 %v3716_v19, %v2069_v37  ;;  %v2140_v40 = vstv %s3283_s24  ;;  %v2070_v54 = vmul.f32 %v3728_v25, %v2069_v37  ;;  %s3275_s30 = sld [smem:[#allocation2 + $0x57]] }
  0x41   : > { %843 = vrot.lane.b32.xlu0 %v835_v10, %s3597_s15  ;;  %1980 = vrot.lane.b32.xlu1 %v1973_v11, %s3597_s15  ;;  %v2142_v41 = vmul.f32 %v3707_v15, %v2140_v40  ;;  %v2225_v44 = vstv %s3235_s25  ;;  %v2143_v46 = vmul.f32 %v3716_v19, %v2140_v40  ;;  %v2141_v56 = vmul.f32 %v3728_v25, %v2140_v40  ;;  %s3227_s6 = sld [smem:[#allocation2 + $0x27]] }
  0x42   : > { %v2227_v45 = vmul.f32 %v3755_v43, %v2225_v44  ;;  %v2228_v49 = vmul.f32 %v3762_v47, %v2225_v44  ;;  %v811_v52 = vstv %s3764_s26  ;;  %v2226_v61 = vmul.f32 %v3787_v59, %v2225_v44  ;;  %s3299_s7 = sld [smem:[#allocation2 + $0x6f]] }
  0x43   : > { %v813_v53 = vmul.f32 %v811_v52, %v3684_v1  ;;  %v880_v55 = vstv %s3770_s27  ;;  %s3251_s8 = sld [smem:[#allocation2 + $0x3f]]  ;;  %v812_v10 = vmul.f32 %v811_v52, %v3687_v2 }
  0x44   : > { %v882_v57 = vmul.f32 %v3707_v15, %v880_v55  ;;  %v939_v58 = vstv %s3279_s28  ;;  %s3823_s9 = sld [smem:[#allocation2 + $0x53]] }
  0x45   : > { %1982 = vrot.lane.b32.xlu0 %v1974_v13, %s3597_s15  ;;  %2045 = vrot.lane.b32.xlu1 %v2038_v14, %s3597_s15  ;;  %v941_v60 = vmul.f32 %v3707_v15, %v939_v58  ;;  %v1008_v62 = vstv %s3231_s29  ;;  %v942_v0 = vmul.f32 %v3716_v19, %v939_v58  ;;  %v881_v14 = vmul.f32 %v3728_v25, %v880_v55  ;;  %s3829_s10 = sld [smem:[#allocation2 + $0x23]] }
  0x46   : > { %v1010_v63 = vmul.f32 %v3755_v43, %v1008_v62  ;;  %v2088_v4 = vstv %s3275_s30  ;;  %v1011_v6 = vmul.f32 %v3762_v47, %v1008_v62  ;;  %v940_v22 = vmul.f32 %v3728_v25, %v939_v58  ;;  %s3295_s11 = sld [smem:[#allocation2 + $0x6b]] }
  0x47   : > { %v2090_v5 = vmul.f32 %v3707_v15, %v2088_v4  ;;  %v2173_v7 = vstv %s3227_s6  ;;  %v2091_v9 = vmul.f32 %v3716_v19, %v2088_v4  ;;  %s3247_s12 = sld [smem:[#allocation2 + $0x3b]] }
  0x48   : > { %v2175_v8 = vmul.f32 %v3755_v43, %v2173_v7  ;;  %v2176_v11 = vmul.f32 %v3762_v47, %v2173_v7  ;;  %v2244_v12 = vstv %s3299_s7  ;;  %s3291_s14 = sld [smem:[#allocation2 + $0x67]] }
  0x49   : > { %2047 = vrot.lane.b32.xlu0 %v2039_v17, %s3597_s15  ;;  %2130 = vrot.lane.b32.xlu1 %v2123_v18, %s3597_s15  ;;  %v2246_v13 = vmul.f32 %v3755_v43, %v2244_v12  ;;  %v2329_v17 = vstv %s3251_s8  ;;  %v2245_v31 = vmul.f32 %v3787_v59, %v2244_v12  ;;  %s3243_s16 = sld [smem:[#allocation2 + $0x37]] }
  0x4a   : > { %v2331_v18 = vmul.f32 %v3814_v16, %v2329_v17  ;;  %s3315_s17 = sld [smem:[#allocation2 + $0x7f]] }
  0x4b   : > { %s3892_s20 = sld [smem:[#allocation2 + $0x63]] }
  0x4c   : > { %s3902_s21 = sld [smem:[#allocation2 + $0x33]] }
  0x4d   : > { %2132 = vrot.lane.b32.xlu0 %v2124_v20, %s3597_s15  ;;  %839 = vrot.lane.b32.xlu1 %v833_v21, %s3597_s15  ;;  %v2247_v20 = vmul.f32 %v3762_v47, %v2244_v12  ;;  %v3821_v21 = vld [vmem:[%s3681_s13 + $0x58] sm:$0x3]  ;;  %v1096_v37 = vstv %s3247_s12  ;;  %s3311_s22 = sld [smem:[#allocation2 + $0x7b]] }
  0x4e   : > { %v1098_v40 = vmul.f32 %v3814_v16, %v1096_v37  ;;  %s3307_s23 = sld [smem:[#allocation2 + $0x77]] }
  0x4f   : > { %s3303_s24 = sld [smem:[#allocation2 + $0x73]] }
  0x50   : > { %v2348_v58 = vstv %s3315_s17  ;;  %s3202_s25 = sld [smem:[#allocation2 + $0xe]] }
  0x51   : > { %1978 = vrot.lane.b32.xlu0 %v1972_v23, %s3597_s15  ;;  %805 = vrot.lane.b32.xlu1 %v800_v24, %s3597_s15  ;;  %v2332_v23 = vmul.f32 %v3821_v21, %v2329_v17  ;;  %v2089_v24 = vmul.f32 %v3728_v25, %v2088_v4  ;;  %s3198_s26 = sld [smem:[#allocation2 + $0xa]] }
  0x52   : > { %s3194_s27 = sld [smem:[#allocation2 + $0x6]] }
  0x53   : > { %s3266_s28 = sld [smem:[#allocation2 + $0x4e]] }
  0x54   : > { %s3218_s29 = sld [smem:[#allocation2 + $0x1e]] }
  0x55   : > { %2043 = vrot.lane.b32.xlu0 %v2037_v26, %s3597_s15  ;;  %2128 = vrot.lane.b32.xlu1 %v2122_v27, %s3597_s15  ;;  %v1009_v26 = vmul.f32 %v3787_v59, %v1008_v62  ;;  %v893_v27 = vstv %s3823_s9  ;;  %v2350_v62 = vmul.f32 %v3814_v16, %v2348_v58  ;;  %s4002_s30 = sld [smem:[#allocation2 + $0x2]] }
  0x56   : > { %v895_v28 = vmul.f32 %v3707_v15, %v893_v27  ;;  %s3262_s6 = sld [smem:[#allocation2 + $0x4a]] }
  0x57   : > { %s3214_s7 = sld [smem:[#allocation2 + $0x1a]] }
  0x58   : > { %s3258_s8 = sld [smem:[#allocation2 + $0x46]] }
  0x59   : > { %860 = vrot.lane.b32.xlu0 %v853_v29, %s3597_s15  ;;  %862 = vrot.lane.b32.xlu1 %v854_v30, %s3597_s15  ;;  %v2174_v29 = vmul.f32 %v3787_v59, %v2173_v7  ;;  %v968_v30 = vstv %s3829_s10  ;;  %s3210_s9 = sld [smem:[#allocation2 + $0x16]] }
  0x5a   : > { %s3282_s10 = sld [smem:[#allocation2 + $0x5e]] }
  0x5b   : > { %s3234_s12 = sld [smem:[#allocation2 + $0x2e]] }
  0x5c   : > { %s4085_s17 = sld [smem:[#allocation2 + $0x4d]] }
  0x5d   : > { %929 = vrot.lane.b32.xlu0 %v922_v32, %s3597_s15  ;;  %931 = vrot.lane.b32.xlu1 %v923_v33, %s3597_s15  ;;  %v970_v32 = vmul.f32 %v3755_v43, %v968_v30  ;;  %v1027_v33 = vstv %s3295_s11  ;;  %s4067_s11 = sld [smem:[#allocation2 + $0xd]] }
  0x61   : > { %1999 = vrot.lane.b32.xlu0 %v1992_v35, %s3597_s15  ;;  %2001 = vrot.lane.b32.xlu1 %v1993_v36, %s3597_s15  ;;  %v1029_v35 = vmul.f32 %v3755_v43, %v1027_v33  ;;  %v2330_v36 = vmul.f32 %v3846_v34, %v2329_v17 }
  0x65   : > { %2078 = vrot.lane.b32.xlu0 %v2071_v38, %s3597_s15  ;;  %2080 = vrot.lane.b32.xlu1 %v2072_v39, %s3597_s15 }
  0x69   : > { %2149 = vrot.lane.b32.xlu1 %v2142_v41, %s3597_s15  ;;  %803 = vrot.lane.b32.xlu0 %v799_v42, %s3597_s15  ;;  %v1030_v41 = vmul.f32 %v3762_v47, %v1027_v33  ;;  %v2192_v42 = vstv %s3291_s14  ;;  %s4077_s14 = sld [smem:[#allocation2 + $0x9]] }
  0x6d   : > { %2234 = vrot.lane.b32.xlu1 %v2227_v45, %s3597_s15  ;;  %2151 = vrot.lane.b32.xlu0 %v2143_v46, %s3597_s15  ;;  %v2194_v46 = vmul.f32 %v3755_v43, %v2192_v42 }
  0x71   : > { %858 = vrot.lane.b32.xlu1 %v852_v48, %s3597_s15  ;;  %2236 = vrot.lane.b32.xlu0 %v2228_v49, %s3597_s15  ;;  %v1099_v48 = vmul.f32 %v3821_v21, %v1096_v37  ;;  %v2277_v49 = vstv %s3243_s16  ;;  %s4083_s16 = sld [smem:[#allocation2 + $0x5]] }
  0x72   : > { %v2279_v52 = vmul.f32 %v3814_v16, %v2277_v49  ;;  %v2278_v17 = vmul.f32 %v3846_v34, %v2277_v49 }
  0x75   : > { %1997 = vrot.lane.b32.xlu1 %v1991_v50, %s3597_s15  ;;  %927 = vrot.lane.b32.xlu0 %v921_v51, %s3597_s15 }
  0x79   : > { %818 = vrot.lane.b32.xlu1 %v813_v53, %s3597_s15  ;;  %2076 = vrot.lane.b32.xlu0 %v2070_v54, %s3597_s15  ;;  %v2195_v53 = vmul.f32 %v3762_v47, %v2192_v42 }
  0x7d   : > { %2147 = vrot.lane.b32.xlu1 %v2141_v56, %s3597_s15  ;;  %887 = vrot.lane.b32.xlu0 %v882_v57, %s3597_s15  ;;  %v894_v56 = vmul.f32 %v3728_v25, %v893_v27  ;;  %v2280_v57 = vmul.f32 %v3821_v21, %v2277_v49 }
  0x81   : > { %948 = vrot.lane.b32.xlu1 %v941_v60, %s3597_s15  ;;  %2232 = vrot.lane.b32.xlu0 %v2226_v61, %s3597_s15 }
  0x85   : > { %1017 = vrot.lane.b32.xlu1 %v1010_v63, %s3597_s15  ;;  %950 = vrot.lane.b32.xlu0 %v942_v0, %s3597_s15  ;;  %v969_v63 = vmul.f32 %v3787_v59, %v968_v30 }
  0x89   : > { %2097 = vrot.lane.b32.xlu1 %v2090_v5, %s3597_s15  ;;  %1019 = vrot.lane.b32.xlu0 %v1011_v6, %s3597_s15  ;;  %v1028_v5 = vmul.f32 %v3787_v59, %v1027_v33  ;;  %v2351_v6 = vmul.f32 %v3821_v21, %v2348_v58 }
  0x8d   : > { %2182 = vrot.lane.b32.xlu1 %v2175_v8, %s3597_s15  ;;  %2099 = vrot.lane.b32.xlu0 %v2091_v9, %s3597_s15  ;;  %v2193_v9 = vmul.f32 %v3787_v59, %v2192_v42 }
  0x91   : > { %816 = vrot.lane.b32.xlu1 %v812_v10, %s3597_s15  ;;  %2184 = vrot.lane.b32.xlu0 %v2176_v11, %s3597_s15  ;;  %v1097_v10 = vmul.f32 %v3846_v34, %v1096_v37  ;;  %v981_v11 = vstv %s3892_s20  ;;  %s4093_s20 = sld [smem:[#allocation2 + $0x1d]] }
  0x92   : > { %v982_v42 = vmul.f32 %v3787_v59, %v981_v11 }
  0x95   : > { %2253 = vrot.lane.b32.xlu1 %v2246_v13, %s3597_s15  ;;  %885 = vrot.lane.b32.xlu0 %v881_v14, %s3597_s15  ;;  %v983_v14 = vmul.f32 %v3755_v43, %v981_v11  ;;  %v447_v11 = vstv %s3198_s26  ;;  %s4122_s26 = sld [smem:[#allocation2 + $0x5d]] }
  0x99   : > { %2338 = vrot.lane.b32.xlu1 %v2331_v18, %s3597_s15  ;;  %2255 = vrot.lane.b32.xlu0 %v2247_v20, %s3597_s15  ;;  %v1056_v18 = vstv %s3902_s21  ;;  %s4097_s21 = sld [smem:[#allocation2 + $0x1]] }
  0x9d   : > { %946 = vrot.lane.b32.xlu1 %v940_v22, %s3597_s15  ;;  %2340 = vrot.lane.b32.xlu0 %v2332_v23, %s3597_s15  ;;  %v2349_v23 = vmul.f32 %v3846_v34, %v2348_v58 }
  0xa1   : > { %2095 = vrot.lane.b32.xlu1 %v2089_v24, %s3597_s15  ;;  %1015 = vrot.lane.b32.xlu0 %v1009_v26, %s3597_s15  ;;  %v1058_v24 = vmul.f32 %v3814_v16, %v1056_v18  ;;  %v1115_v26 = vstv %s3311_s22  ;;  %s4103_s22 = sld [smem:[#allocation2 + $0x49]] }
  0xa2   : > { %v1117_v30 = vmul.f32 %v3814_v16, %v1115_v26 }
  0xa5   : > { %900 = vrot.lane.b32.xlu1 %v895_v28, %s3597_s15  ;;  %2180 = vrot.lane.b32.xlu0 %v2174_v29, %s3597_s15  ;;  %v1118_v29 = vmul.f32 %v3821_v21, %v1115_v26 }
  0xa9   : > { %2251 = vrot.lane.b32.xlu1 %v2245_v31, %s3597_s15  ;;  %975 = vrot.lane.b32.xlu0 %v970_v32, %s3597_s15  ;;  %v2296_v31 = vstv %s3307_s23  ;;  %s4105_s23 = sld [smem:[#allocation2 + $0x19]] }
  0xaa   : > { %v2297_v49 = vmul.f32 %v3846_v34, %v2296_v31 }
  0xab   : > { %v3852_v38 = vpop.permute.xlu0 %2026  ;;  %v3854_v39 = vpop.permute.xlu1 %2024 }
  0xad   : > { %1036 = vrot.lane.b32.xlu1 %v1029_v35, %s3597_s15  ;;  %2336 = vrot.lane.b32.xlu0 %v2330_v36, %s3597_s15  ;;  %v2299_v35 = vmul.f32 %v3821_v21, %v2296_v31  ;;  %v2298_v36 = vmul.f32 %v3814_v16, %v2296_v31  ;;  %v450_v31 = vmul.f32 %v447_v11, %v3690_v3 }
  0xaf   : > { %v3860_v44 = vpop.permute.xlu0 %2028  ;;  %v3862_v45 = vpop.permute.xlu1 %841 }
  0xb1   : > { %1105 = vrot.lane.b32.xlu1 %v1098_v40, %s3597_s15  ;;  %1038 = vrot.lane.b32.xlu0 %v1030_v41, %s3597_s15  ;;  %v1057_v41 = vmul.f32 %v3846_v34, %v1056_v18  ;;  %v449_v18 = vmul.f32 %v447_v11, %v3684_v1 }
  0xb3   : > { %v3868_v50 = vpop.permute.xlu0 %843  ;;  %v3870_v51 = vpop.permute.xlu1 %1980 }
  0xb5   : > { %2201 = vrot.lane.b32.xlu1 %v2194_v46, %s3597_s15  ;;  %1107 = vrot.lane.b32.xlu0 %v1099_v48, %s3597_s15 }
  0xb7   : > { %v3876_v54 = vpop.permute.xlu0 %1982  ;;  %v3878_v55 = vpop.permute.xlu1 %2045 }
  0xb9   : > { %2286 = vrot.lane.b32.xlu1 %v2279_v52, %s3597_s15  ;;  %2203 = vrot.lane.b32.xlu0 %v2195_v53, %s3597_s15  ;;  %v1116_v52 = vmul.f32 %v3846_v34, %v1115_v26  ;;  %v1069_v53 = vstv %s3303_s24  ;;  %s4112_s24 = sld [smem:[#allocation2 + $0x45]] }
  0xba   : > { %v1070_v58 = vmul.f32 %v3846_v34, %v1069_v53 }
  0xbb   : > { %v3884_v60 = vpop.permute.xlu0 %2047  ;;  %v3886_v61 = vpop.permute.xlu1 %2130 }
  0xbd   : > { %898 = vrot.lane.b32.xlu1 %v894_v56, %s3597_s15  ;;  %2288 = vrot.lane.b32.xlu0 %v2280_v57, %s3597_s15 }
  0xbf   : > { %v3894_v0 = vpop.permute.xlu0 %2132  ;;  %v3896_v4 = vpop.permute.xlu1 %839 }
  0xc1   : > { %2357 = vrot.lane.b32.xlu1 %v2350_v62, %s3597_s15  ;;  %973 = vrot.lane.b32.xlu0 %v969_v63, %s3597_s15  ;;  %v1071_v62 = vmul.f32 %v3814_v16, %v1069_v53  ;;  %v1228_v63 = vstv %s3202_s25  ;;  %s4116_s25 = sld [smem:[#allocation2 + $0x15]] }
  0xc3   : > { %v3904_v7 = vpop.permute.xlu0 %1978  ;;  %v3906_v8 = vpop.permute.xlu1 %805 }
  0xc5   : > { %1034 = vrot.lane.b32.xlu1 %v1028_v5, %s3597_s15  ;;  %2359 = vrot.lane.b32.xlu0 %v2351_v6, %s3597_s15 }
  0xc7   : > { %v3913_v12 = vpop.permute.xlu0 %2043  ;;  %v3915_v13 = vpop.permute.xlu1 %2128 }
  0xc9   : > { %2199 = vrot.lane.b32.xlu1 %v2193_v9, %s3597_s15  ;;  %1103 = vrot.lane.b32.xlu0 %v1097_v10, %s3597_s15  ;;  %v1231_v9 = vmul.f32 %v1228_v63, %v3690_v3  ;;  %v1230_v10 = vmul.f32 %v1228_v63, %v3684_v1 }
  0xcb   : > { %v3922_v20 = vpop.permute.xlu0 %860  ;;  %v3924_v22 = vpop.permute.xlu1 %862 }
  0xcc   : > { %6097 = vst [vmem:[#allocation8_spill] sm:$0xff] %v3922_v20  ;;  %6098 = vst [vmem:[#allocation9_spill] sm:$0xff] %v3924_v22 }
  0xcd   : > { %988 = vrot.lane.b32.xlu1 %v983_v14, %s3597_s15  ;;  %2284 = vrot.lane.b32.xlu0 %v2278_v17, %s3597_s15 }
  0xcf   : > { %v3930_v27 = vpop.permute.xlu0 %929  ;;  %v3932_v28 = vpop.permute.xlu1 %931 }
  0xd0   : > { %6099 = vst [vmem:[#allocation10_spill] sm:$0xff] %v3930_v27  ;;  %6100 = vst [vmem:[#allocation11_spill] sm:$0xff] %v3932_v28  ;;  %v2114_v27 = vstv %s4122_s26  ;;  %s4382_s26 = sld [smem:[#allocation2 + $0x7d]] }
  0xd1   : > { %2355 = vrot.lane.b32.xlu1 %v2349_v23, %s3597_s15  ;;  %1063 = vrot.lane.b32.xlu0 %v1058_v24, %s3597_s15  ;;  %v1229_v23 = vmul.f32 %v1228_v63, %v3687_v2  ;;  %v1182_v24 = vstv %s3194_s27  ;;  %s4125_s27 = sld [smem:[#allocation2 + $0x2d]] }
  0xd3   : > { %v3938_v32 = vpop.permute.xlu0 %1999  ;;  %v3940_v33 = vpop.permute.xlu1 %2001 }
  0xd4   : > { %6101 = vst [vmem:[#allocation12_spill] sm:$0xff] %v3938_v32  ;;  %6102 = vst [vmem:[#allocation13_spill] sm:$0xff] %v3940_v33  ;;  %v2055_v33 = vstv %s4116_s25  ;;  %s4370_s25 = sld [smem:[#allocation2 + $0x35]] }
  0xd5   : > { %1126 = vrot.lane.b32.xlu1 %v1118_v29, %s3597_s15  ;;  %1124 = vrot.lane.b32.xlu0 %v1117_v30, %s3597_s15  ;;  %v1184_v30 = vmul.f32 %v1182_v24, %v3684_v1 }
  0xd7   : > { %v3946_v37 = vpop.permute.xlu0 %2078  ;;  %v3948_v40 = vpop.permute.xlu1 %2080 }
  0xd8   : > { %6103 = vst [vmem:[#allocation14_spill] sm:$0xff] %v3946_v37  ;;  %6104 = vst [vmem:[#allocation15_spill] sm:$0xff] %v3948_v40 }
  0xd9   : > { %2307 = vrot.lane.b32.xlu1 %v2299_v35, %s3597_s15  ;;  %2305 = vrot.lane.b32.xlu0 %v2298_v36, %s3597_s15  ;;  %v1247_v35 = vstv %s3266_s28  ;;  %s4134_s28 = sld [smem:[#allocation2 + $0x42]] }
  0xda   : > { %v1250_v63 = vmul.f32 %v1247_v35, %v3690_v3 }
  0xdb   : > { %v3954_v46 = vpop.permute.xlu1 %2149  ;;  %v3956_v48 = vpop.permute.xlu0 %803 }
  0xdc   : > { %6105 = vst [vmem:[#allocation16_spill] sm:$0xff] %v3954_v46  ;;  %6106 = vst [vmem:[#allocation17_spill] sm:$0xff] %v3956_v48  ;;  %v906_v48 = vstv %s4105_s23  ;;  %v4210_v46 = vstv %s4112_s24  ;;  %s4340_s23 = sld [smem:[#allocation2 + $0x56]] }
  0xdd   : > { %1061 = vrot.lane.b32.xlu1 %v1057_v41, %s3597_s15  ;;  %986 = vrot.lane.b32.xlu0 %v982_v42, %s3597_s15  ;;  %v1249_v42 = vmul.f32 %v1247_v35, %v3684_v1  ;;  %v4251_v32 = vmul.f32 %v3716_v19, %v906_v48  ;;  %v4255_v28 = vmul.f32 %v4210_v46, %v3684_v1  ;;  %s4353_s24 = sld [smem:[#allocation2 + $0x65]] }
  0xdf   : > { %v3962_v56 = vpop.permute.xlu1 %2234  ;;  %v3964_v57 = vpop.permute.xlu0 %2151  ;;  %6145 = vst [vmem:[#allocation56_spill] sm:$0xff] %v4255_v28 }
  0xe0   : > { %6107 = vst [vmem:[#allocation18_spill] sm:$0xff] %v3962_v56  ;;  %6108 = vst [vmem:[#allocation19_spill] sm:$0xff] %v3964_v57  ;;  %v4201_v56 = vstv %s4103_s22  ;;  %s4321_s22 = sld [smem:[#allocation2 + $0x39]] }
  0xe1   : > { %2303 = vrot.lane.b32.xlu1 %v2297_v49, %s3597_s15  ;;  %1122 = vrot.lane.b32.xlu0 %v1116_v52, %s3597_s15  ;;  %v1185_v49 = vmul.f32 %v1182_v24, %v3690_v3  ;;  %v1332_v52 = vstv %s3218_s29  ;;  %s4137_s29 = sld [smem:[#allocation2 + $0x11]] }
  0xe3   : > { %v3970_v5 = vpop.permute.xlu1 %858  ;;  %v3972_v6 = vpop.permute.xlu0 %2236 }
  0xe4   : > { %6109 = vst [vmem:[#allocation20_spill] sm:$0xff] %v3970_v5  ;;  %6110 = vst [vmem:[#allocation21_spill] sm:$0xff] %v3972_v6 }
  0xe5   : > { %1074 = vrot.lane.b32.xlu1 %v1070_v58, %s3597_s15  ;;  %1076 = vrot.lane.b32.xlu0 %v1071_v62, %s3597_s15  ;;  %v1334_v62 = vmul.f32 %v3707_v15, %v1332_v52 }
  0xe7   : > { %v3978_v14 = vpop.permute.xlu1 %1997  ;;  %v3980_v17 = vpop.permute.xlu0 %927 }
  0xe8   : > { %6111 = vst [vmem:[#allocation22_spill] sm:$0xff] %v3978_v14  ;;  %6112 = vst [vmem:[#allocation23_spill] sm:$0xff] %v3980_v17  ;;  %v792_v14 = vstv %s4097_s21  ;;  %s4315_s21 = sld [smem:[#allocation2 + $0x69]] }
  0xe9   : > { %1239 = vrot.lane.b32.xlu1 %v1231_v9, %s3597_s15  ;;  %1237 = vrot.lane.b32.xlu0 %v1230_v10, %s3597_s15  ;;  %v4224_v40 = vmul.f32 %v792_v14, %v3684_v1  ;;  %v4259_v22 = vmul.f32 %v792_v14, %v3687_v2 }
  0xeb   : > { %v3986_v26 = vpop.permute.xlu1 %818  ;;  %v3988_v29 = vpop.permute.xlu0 %2076  ;;  %6146 = vst [vmem:[#allocation57_spill] sm:$0xff] %v4259_v22  ;;  %v4278_v22 = vmul.f32 %v3707_v15, %v2055_v33 }
  0xec   : > { %6113 = vst [vmem:[#allocation24_spill] sm:$0xff] %v3986_v26  ;;  %6114 = vst [vmem:[#allocation25_spill] sm:$0xff] %v3988_v29  ;;  %v2107_v26 = vstv %s4093_s20  ;;  %s4299_s20 = sld [smem:[#allocation2 + $0x21]] }
  0xed   : > { %456 = vrot.lane.b32.xlu1 %v449_v18, %s3597_s15  ;;  %1235 = vrot.lane.b32.xlu0 %v1229_v23, %s3597_s15  ;;  %v1335_v18 = vmul.f32 %v3716_v19, %v1332_v52  ;;  %v448_v23 = vmul.f32 %v447_v11, %v3687_v2  ;;  %v1248_v11 = vmul.f32 %v1247_v35, %v3687_v2  ;;  %v4049_v35 = vstv %s3214_s7  ;;  %s4176_s7 = sld [smem:[#allocation2 + $0x12]] }
  0xee   : > { %v4227_v37 = vmul.f32 %v3728_v25, %v2107_v26 }
  0xef   : > { %v3994_v36 = vpop.permute.xlu1 %2147  ;;  %v3996_v41 = vpop.permute.xlu0 %887 }
  0xf0   : > { %6115 = vst [vmem:[#allocation26_spill] sm:$0xff] %v3994_v36  ;;  %6116 = vst [vmem:[#allocation27_spill] sm:$0xff] %v3996_v41  ;;  %v2013_v41 = vstv %s4085_s17  ;;  %s4285_s17 = sld [smem:[#allocation2 + $0x2a]] }
  0xf1   : > { %1191 = vrot.lane.b32.xlu1 %v1184_v30, %s3597_s15  ;;  %458 = vrot.lane.b32.xlu0 %v450_v31, %s3597_s15  ;;  %v413_v30 = vstv %s4002_s30  ;;  %s4153_s30 = sld [smem:[#allocation2 + $0x59]]  ;;  %v4198_v57 = vmul.f32 %v2013_v41, %v3687_v2 }
  0xf3   : > { %v4004_v53 = vpop.permute.xlu1 %948  ;;  %v4006_v58 = vpop.permute.xlu0 %2232 }
  0xf4   : > { %6117 = vst [vmem:[#allocation28_spill] sm:$0xff] %v4004_v53  ;;  %6118 = vst [vmem:[#allocation29_spill] sm:$0xff] %v4006_v58 }
  0xf5   : > { %1256 = vrot.lane.b32.xlu1 %v1249_v42, %s3597_s15  ;;  %1193 = vrot.lane.b32.xlu0 %v1185_v49, %s3597_s15  ;;  %v1183_v49 = vmul.f32 %v1182_v24, %v3687_v2 }
  0xf7   : > { %v4012_v9 = vpop.permute.xlu1 %1017  ;;  %v4014_v10 = vpop.permute.xlu0 %950 }
  0xf8   : > { %6119 = vst [vmem:[#allocation30_spill] sm:$0xff] %v4012_v9  ;;  %6120 = vst [vmem:[#allocation31_spill] sm:$0xff] %v4014_v10  ;;  %v824_v9 = vstv %s4077_s14  ;;  %s4261_s14 = sld [smem:[#allocation2 + $0x41]] }
  0xf9   : > { %1341 = vrot.lane.b32.xlu1 %v1334_v62, %s3597_s15  ;;  %1258 = vrot.lane.b32.xlu0 %v1250_v63, %s3597_s15  ;;  %v415_v62 = vmul.f32 %v413_v30, %v3684_v1  ;;  %v4156_v36 = vmul.f32 %v824_v9, %v3684_v1 }
  0xfb   : > { %v4021_v31 = vpop.permute.xlu1 %2097  ;;  %v4023_v42 = vpop.permute.xlu0 %1019 }
  0xfc   : > { %6121 = vst [vmem:[#allocation32_spill] sm:$0xff] %v4021_v31  ;;  %6122 = vst [vmem:[#allocation33_spill] sm:$0xff] %v4023_v42  ;;  %v1333_v42 = vmul.f32 %v3728_v25, %v1332_v52 }
  0xfd   : > { %1343 = vrot.lane.b32.xlu0 %v1335_v18, %s3597_s15  ;;  %454 = vrot.lane.b32.xlu1 %v448_v23, %s3597_s15  ;;  %v4037_v18 = vstv %s3262_s6  ;;  %s4158_s6 = sld [smem:[#allocation2 + $0x29]] }
  0xff   : > { %v4029_v63 = vpop.permute.xlu1 %2182  ;;  %v4031_v10 = vpop.permute.xlu0 %2099 }
 0x100   : > { %6123 = vst [vmem:[#allocation34_spill] sm:$0xff] %v4029_v63  ;;  %6124 = vst [vmem:[#allocation35_spill] sm:$0xff] %v4031_v10 }
 0x101   : > { %1189 = vrot.lane.b32.xlu0 %v1183_v49, %s3597_s15  ;;  %420 = vrot.lane.b32.xlu1 %v415_v62, %s3597_s15  ;;  %v468_v49 = vmul.f32 %v4037_v18, %v3684_v1  ;;  %v469_v62 = vmul.f32 %v4037_v18, %v3690_v3 }
 0x103   : > { %v4039_v23 = vpop.permute.xlu1 %816  ;;  %v4041_v24 = vpop.permute.xlu0 %2184 }
 0x104   : > { %6125 = vst [vmem:[#allocation36_spill] sm:$0xff] %v4039_v23  ;;  %6126 = vst [vmem:[#allocation37_spill] sm:$0xff] %v4041_v24  ;;  %v4061_v24 = vstv %s3258_s8  ;;  %s4188_s8 = sld [smem:[#allocation2 + $0x55]] }
 0x105   : > { %1254 = vrot.lane.b32.xlu0 %v1248_v11, %s3597_s15  ;;  %1339 = vrot.lane.b32.xlu1 %v1333_v42, %s3597_s15  ;;  %v537_v42 = vmul.f32 %v3707_v15, %v4049_v35  ;;  %v538_v11 = vmul.f32 %v3716_v19, %v4049_v35 }
 0x107   : > { %v4051_v52 = vpop.permute.xlu1 %2253  ;;  %v4053_v10 = vpop.permute.xlu0 %885 }
 0x108   : > { %6127 = vst [vmem:[#allocation38_spill] sm:$0xff] %v4051_v52  ;;  %6128 = vst [vmem:[#allocation39_spill] sm:$0xff] %v4053_v10  ;;  %v4075_v10 = vstv %s3210_s9  ;;  %v4095_v52 = vstv %s3282_s10  ;;  %s4204_s9 = sld [smem:[#allocation2 + $0x25]] }
 0x109   : > { %475 = vrot.lane.b32.xlu0 %v468_v49, %s3597_s15  ;;  %477 = vrot.lane.b32.xlu1 %v469_v62, %s3597_s15  ;;  %v1203_v49 = vmul.f32 %v4061_v24, %v3684_v1  ;;  %v1204_v62 = vmul.f32 %v4061_v24, %v3690_v3  ;;  %s4212_s10 = sld [smem:[#allocation2 + $0x6d]]  ;;  %v1281_v14 = vmul.f32 %v3728_v25, %v4075_v10 }
 0x10b   : > { %v4063_v23 = vpop.permute.xlu1 %2338  ;;  %v4065_v63 = vpop.permute.xlu0 %2255 }
 0x10c   : > { %6129 = vst [vmem:[#allocation40_spill] sm:$0xff] %v4063_v23  ;;  %6130 = vst [vmem:[#allocation41_spill] sm:$0xff] %v4065_v63 }
 0x10d   : > { %544 = vrot.lane.b32.xlu0 %v537_v42, %s3597_s15  ;;  %546 = vrot.lane.b32.xlu1 %v538_v11, %s3597_s15  ;;  %v1282_v42 = vmul.f32 %v3707_v15, %v4075_v10  ;;  %v1283_v11 = vmul.f32 %v3716_v19, %v4075_v10  ;;  %v4294_v10 = vmul.f32 %v3716_v19, %v2114_v27 }
 0x10f   : > { %v4079_v23 = vpop.permute.xlu1 %946  ;;  %v4081_v63 = vpop.permute.xlu0 %2340  ;;  %6150 = vst [vmem:[#allocation60_spill] sm:$0xff] %v4294_v10  ;;  %v913_v10 = vstv %s4153_s30  ;;  %s4432_s30 = sld [smem:[#allocation2 + $0x31]] }
 0x110   : > { %6131 = vst [vmem:[#allocation42_spill] sm:$0xff] %v4079_v23  ;;  %6132 = vst [vmem:[#allocation43_spill] sm:$0xff] %v4081_v63 }
 0x111   : > { %1210 = vrot.lane.b32.xlu0 %v1203_v49, %s3597_s15  ;;  %1212 = vrot.lane.b32.xlu1 %v1204_v62, %s3597_s15  ;;  %v1353_v49 = vmul.f32 %v3707_v15, %v4095_v52  ;;  %v414_v62 = vmul.f32 %v413_v30, %v3687_v2 }
 0x113   : > { %v4099_v23 = vpop.permute.xlu1 %2095  ;;  %v4101_v63 = vpop.permute.xlu0 %1015 }
 0x114   : > { %6133 = vst [vmem:[#allocation44_spill] sm:$0xff] %v4099_v23  ;;  %6134 = vst [vmem:[#allocation45_spill] sm:$0xff] %v4101_v63  ;;  %v4114_v23 = vstv %s3234_s12  ;;  %s4244_s12 = sld [smem:[#allocation2 + $0x3d]] }
 0x115   : > { %1289 = vrot.lane.b32.xlu0 %v1282_v42, %s3597_s15  ;;  %1291 = vrot.lane.b32.xlu1 %v1283_v11, %s3597_s15  ;;  %v2009_v42 = vstv %s4067_s11  ;;  %v1438_v30 = vmul.f32 %v3755_v43, %v4114_v23  ;;  %v1354_v11 = vmul.f32 %v3716_v19, %v4095_v52  ;;  %s4230_s11 = sld [smem:[#allocation2 + $0x5a]] }
 0x116   : > { %v4150_v53 = vmul.f32 %v2009_v42, %v3690_v3 }
 0x117   : > { %v4118_v63 = vpop.permute.xlu1 %900  ;;  %v4120_v31 = vpop.permute.xlu0 %2180 }
 0x118   : > { %6135 = vst [vmem:[#allocation46_spill] sm:$0xff] %v4118_v63  ;;  %6136 = vst [vmem:[#allocation47_spill] sm:$0xff] %v4120_v31  ;;  %v1963_v31 = vstv %s4083_s16  ;;  %s4268_s16 = sld [smem:[#allocation2 + $0x51]] }
 0x119   : > { %1360 = vrot.lane.b32.xlu1 %v1353_v49, %s3597_s15  ;;  %418 = vrot.lane.b32.xlu0 %v414_v62, %s3597_s15  ;;  %v4144_v49 = vmul.f32 %v2009_v42, %v3684_v1  ;;  %v4147_v62 = vmul.f32 %v2009_v42, %v3687_v2  ;;  %v1439_v42 = vmul.f32 %v3762_v47, %v4114_v23 }
 0x11a   : > { %v4170_v29 = vmul.f32 %v1963_v31, %v3684_v1  ;;  %v4185_v17 = vmul.f32 %v1963_v31, %v3687_v2 }
 0x11b   : > { %v4139_v63 = vpop.permute.xlu1 %2251  ;;  %v4141_v58 = vpop.permute.xlu0 %975 }
 0x11c   : > { %6137 = vst [vmem:[#allocation48_spill] sm:$0xff] %v4139_v63  ;;  %6138 = vst [vmem:[#allocation49_spill] sm:$0xff] %v4141_v58  ;;  %v467_v58 = vmul.f32 %v4037_v18, %v3687_v2  ;;  %v4167_v63 = vmul.f32 %v824_v9, %v3690_v3  ;;  %v4179_v18 = vmul.f32 %v1963_v31, %v3690_v3 }
 0x11d   : > { %1445 = vrot.lane.b32.xlu1 %v1438_v30, %s3597_s15  ;;  %1362 = vrot.lane.b32.xlu0 %v1354_v11, %s3597_s15  ;;  %v4174_v30 = vmul.f32 %v824_v9, %v3687_v2  ;;  %v4182_v11 = vmul.f32 %v2013_v41, %v3684_v1  ;;  %v4195_v9 = vmul.f32 %v2013_v41, %v3690_v3 }
 0x11e   : > { %v4207_v31 = vmul.f32 %v3707_v15, %v2107_v26  ;;  %v1202_v41 = vmul.f32 %v4061_v24, %v3687_v2  ;;  %v4234_v24 = vmul.f32 %v4201_v56, %v3684_v1 }
 0x11f   : > { %v4190_v6 = vpop.permute.xlu1 %1036  ;;  %v4192_v5 = vpop.permute.xlu0 %2336 }
 0x120   : > { %6139 = vst [vmem:[#allocation50_spill] sm:$0xff] %v4190_v6  ;;  %6140 = vst [vmem:[#allocation51_spill] sm:$0xff] %v4192_v5  ;;  %v536_v6 = vmul.f32 %v3728_v25, %v4049_v35  ;;  %v4221_v5 = vmul.f32 %v3716_v19, %v2107_v26  ;;  %v4238_v35 = vmul.f32 %v4201_v56, %v3690_v3 }
 0x121   : > { %473 = vrot.lane.b32.xlu1 %v467_v58, %s3597_s15  ;;  %1447 = vrot.lane.b32.xlu0 %v1439_v42, %s3597_s15  ;;  %6141 = vst [vmem:[#allocation52_spill] sm:$0xff] %v4234_v24  ;;  %v4241_v42 = vmul.f32 %v3707_v15, %v906_v48  ;;  %v4312_v24 = vmul.f32 %v3728_v25, %v2114_v27 }
 0x122   : > { %6142 = vst [vmem:[#allocation53_spill] sm:$0xff] %v4238_v35  ;;  %v2211_v35 = vstv %s4125_s27  ;;  %s4396_s27 = sld [smem:[#allocation2 + $0x26]] }
 0x123   : > { %v4246_v26 = vpop.permute.xlu1 %1105  ;;  %v4248_v58 = vpop.permute.xlu0 %1038  ;;  %v4306_v20 = vmul.f32 %v3755_v43, %v2211_v35  ;;  %6156 = vst [vmem:[#allocation66_spill] sm:$0xff] %v4312_v24  ;;  %v4331_v24 = vmul.f32 %v3787_v59, %v2211_v35 }
 0x124   : > { %6143 = vst [vmem:[#allocation54_spill] sm:$0xff] %v4246_v26  ;;  %6144 = vst [vmem:[#allocation55_spill] sm:$0xff] %v4248_v58  ;;  %v4265_v26 = vmul.f32 %v4210_v46, %v3690_v3  ;;  %v6148_v58 = vstv %s4134_s28  ;;  %v4281_v3 = vmul.f32 %v3728_v25, %v906_v48 }
 0x125   : > { %1208 = vrot.lane.b32.xlu1 %v1202_v41, %s3597_s15  ;;  %542 = vrot.lane.b32.xlu0 %v536_v6, %s3597_s15  ;;  %v428_v28 = vmul.f32 %v6148_v58, %v3684_v1  ;;  %v4288_v6 = vmul.f32 %v3716_v19, %v2055_v33  ;;  %v4291_v1 = vmul.f32 %v3707_v15, %v2114_v27 }
 0x126   : > { %6147 = vst [vmem:[#allocation58_spill] sm:$0xff] %v4265_v26  ;;  %6149 = vst [vmem:[#allocation59_spill] sm:$0xff] %v4281_v3  ;;  %v870_v26 = vstv %s4137_s29  ;;  %v4297_v41 = vmul.f32 %v3728_v25, %v2055_v33  ;;  %v4309_v3 = vmul.f32 %v3762_v47, %v2211_v35  ;;  %v2159_v35 = vstv %s4204_s9  ;;  %s4412_s29 = sld [smem:[#allocation2 + $0x61]] }
 0x127   : > { %v4301_v48 = vpop.permute.xlu1 %2201  ;;  %v4303_v58 = vpop.permute.xlu0 %1107  ;;  %6154 = vst [vmem:[#allocation64_spill] sm:$0xff] %v4306_v20  ;;  %v4318_v33 = vmul.f32 %v3707_v15, %v870_v26  ;;  %6159 = vst [vmem:[#allocation68_spill] sm:$0xff] %v4331_v24  ;;  %v4338_v20 = vstv %s4230_s11  ;;  %s4500_s9 = sld [smem:[#allocation2 + $0x6e]] }
 0x128   : > { %6151 = vst [vmem:[#allocation61_spill] sm:$0xff] %v4297_v41  ;;  %6152 = vst [vmem:[#allocation62_spill] sm:$0xff] %v4301_v48  ;;  %v994_v48 = vstv %s4158_s6  ;;  %v6158_v41 = vstv %s4176_s7  ;;  %s4464_s6 = sld [smem:[#allocation2 + $0x79]] }
 0x129   : > { %6153 = vst [vmem:[#allocation63_spill] sm:$0xff] %v4303_v58  ;;  %6155 = vst [vmem:[#allocation65_spill] sm:$0xff] %v4309_v3  ;;  %433 = vrot.lane.b32.xlu1 %v428_v28, %s3597_s15  ;;  %1287 = vrot.lane.b32.xlu0 %v1281_v14, %s3597_s15  ;;  %v1352_v58 = vmul.f32 %v3728_v25, %v4095_v52  ;;  %v497_v27 = vmul.f32 %v3707_v15, %v6158_v41  ;;  %v2062_v3 = vstv %s4188_s8  ;;  %s4476_s8 = sld [smem:[#allocation2 + $0x75]] }
 0x12a   : > { %6157 = vst [vmem:[#allocation67_spill] sm:$0xff] %v4318_v33  ;;  %v4335_v33 = vmul.f32 %v3728_v25, %v870_v26  ;;  %6161 = vst [vmem:[#allocation70_spill] sm:$0xff] %v4338_v20  ;;  %v4344_v28 = vmul.f32 %v4201_v56, %v3687_v2  ;;  %v4347_v52 = vmul.f32 %v3707_v15, %v913_v10  ;;  %s4582_s11 = sld [smem:[#allocation2 + $0x71]] }
 0x12b   : > { %v4350_v14 = vmul.f32 %v3716_v19, %v913_v10  ;;  %v4355_v26 = vpop.permute.xlu1 %2286  ;;  %v4357_v41 = vpop.permute.xlu0 %2203  ;;  %v4364_v56 = vmul.f32 %v3755_v43, %v994_v48 }
 0x12c   : > { %6160 = vst [vmem:[#allocation69_spill] sm:$0xff] %v4335_v33  ;;  %6162 = vst [vmem:[#allocation71_spill] sm:$0xff] %v4344_v28  ;;  %v4361_v33 = vmul.f32 %v4210_v46, %v3687_v2  ;;  %v4367_v28 = vmul.f32 %v3762_v47, %v994_v48  ;;  %v556_v2 = vmul.f32 %v3707_v15, %v4338_v20 }
 0x12d   : > { %6163 = vst [vmem:[#allocation72_spill] sm:$0xff] %v4347_v52  ;;  %6164 = vst [vmem:[#allocation73_spill] sm:$0xff] %v4350_v14  ;;  %v2218_v14 = vstv %s4212_s10  ;;  %v4373_v52 = vmul.f32 %v3707_v15, %v2062_v3  ;;  %1358 = vrot.lane.b32.xlu1 %v1352_v58, %s3597_s15  ;;  %502 = vrot.lane.b32.xlu0 %v497_v27, %s3597_s15  ;;  %v1437_v46 = vmul.f32 %v3787_v59, %v4114_v23  ;;  %s4559_s10 = sld [smem:[#allocation2 + $0x3e]] }
 0x12e   : > { %6165 = vst [vmem:[#allocation74_spill] sm:$0xff] %v4355_v26  ;;  %6166 = vst [vmem:[#allocation75_spill] sm:$0xff] %v4357_v41  ;;  %v2315_v26 = vstv %s4244_s12  ;;  %v4385_v41 = vmul.f32 %v3755_v43, %v2159_v35  ;;  %v4391_v58 = vmul.f32 %v3728_v25, %v913_v10  ;;  %v4394_v27 = vstv %s4285_s17  ;;  %s4683_s12 = sld [smem:[#allocation2 + $0xc]] }
 0x12f   : > { %6167 = vst [vmem:[#allocation76_spill] sm:$0xff] %v4361_v33  ;;  %6168 = vst [vmem:[#allocation77_spill] sm:$0xff] %v4364_v56  ;;  %v4388_v33 = vmul.f32 %v3716_v19, %v2062_v3  ;;  %v795_v15 = vstv %s4261_s14  ;;  %v4400_v23 = vmul.f32 %v3762_v47, %v2159_v35  ;;  %v4415_v10 = vmul.f32 %v3814_v16, %v2315_v26  ;;  %v4448_v56 = vld [vmem:[%s3681_s13 + $0x20] sm:$0xff]  ;;  %s4699_s14 = sld [smem:[#allocation2 + $0x6a]] }
 0x130   : > { %6169 = vst [vmem:[#allocation78_spill] sm:$0xff] %v4367_v28  ;;  %6170 = vst [vmem:[#allocation79_spill] sm:$0xff] %v4373_v52  ;;  %v4403_v52 = vmul.f32 %v3755_v43, %v2218_v14  ;;  %v4410_v28 = vpop.permute.xlu0 %2288  ;;  %s4725_s17 = sld [smem:[#allocation2 + $0x3a]] }
 0x131   : > { %6171 = vst [vmem:[#allocation80_spill] sm:$0xff] %v4385_v41  ;;  %6172 = vst [vmem:[#allocation81_spill] sm:$0xff] %v4388_v33  ;;  %v4406_v41 = vmul.f32 %v3787_v59, %v994_v48  ;;  %v4408_v33 = vpop.permute.xlu1 %898  ;;  %v875_v48 = vstv %s4268_s16  ;;  %563 = vrot.lane.b32.xlu1 %v556_v2, %s3597_s15  ;;  %1443 = vrot.lane.b32.xlu0 %v1437_v46, %s3597_s15  ;;  %v1082_v2 = vstv %s4321_s22  ;;  %s4711_s16 = sld [smem:[#allocation2 + $0x1c]] }
 0x132   : > { %6173 = vst [vmem:[#allocation82_spill] sm:$0xff] %v4391_v58  ;;  %6174 = vst [vmem:[#allocation83_spill] sm:$0xff] %v4394_v27  ;;  %v4418_v58 = vmul.f32 %v3762_v47, %v2218_v14  ;;  %v4445_v46 = vstv %s4340_s23  ;;  %v4451_v24 = vmul.f32 %v4448_v56, %v875_v48  ;;  %s4771_s22 = sld [smem:[#allocation2 + $0x66]] }
 0x133   : > { %6175 = vst [vmem:[#allocation84_spill] sm:$0xff] %v4400_v23  ;;  %6176 = vst [vmem:[#allocation85_spill] sm:$0xff] %v4403_v52  ;;  %v4421_v52 = vmul.f32 %v3821_v21, %v2315_v26  ;;  %v4441_v23 = vmul.f32 %v3728_v25, %v2062_v3  ;;  %s4783_s23 = sld [smem:[#allocation2 + $0x4]] }
 0x134   : > { %6177 = vst [vmem:[#allocation86_spill] sm:$0xff] %v4406_v41  ;;  %6178 = vst [vmem:[#allocation87_spill] sm:$0xff] %v4408_v33  ;;  %v958_v41 = vstv %s4299_s20  ;;  %v1001_v33 = vstv %s4315_s21  ;;  %v4462_v25 = vpop.permute.xlu0 %973  ;;  %s4735_s20 = sld [smem:[#allocation2 + $0x8]] }
 0x135   : > { %6179 = vst [vmem:[#allocation88_spill] sm:$0xff] %v4410_v28  ;;  %6180 = vst [vmem:[#allocation89_spill] sm:$0xff] %v4415_v10  ;;  %v625_v28 = vmul.f32 %v3755_v43, %v4394_v27  ;;  %v557_v10 = vmul.f32 %v3716_v19, %v4338_v20  ;;  %v4454_v19 = vmul.f32 %v3787_v59, %v2159_v35  ;;  %s4762_s21 = sld [smem:[#allocation2 + $0x18]] }
 0x136   : > { %6181 = vst [vmem:[#allocation90_spill] sm:$0xff] %v4418_v58  ;;  %6182 = vst [vmem:[#allocation91_spill] sm:$0xff] %v4421_v52  ;;  %v4435_v58 = vld [vmem:[%s3681_s13 + $0x8] sm:$0xff]  ;;  %v4457_v20 = vmul.f32 %v3787_v59, %v2218_v14  ;;  %v4467_v3 = vmul.f32 %v3755_v43, %v958_v41  ;;  %v4473_v35 = vmul.f32 %v3846_v34, %v2315_v26  ;;  %v2263_v14 = vstv %s4370_s25  ;;  %s4808_s25 = sld [smem:[#allocation2 + $0x36]] }
 0x137   : > { %6183 = vst [vmem:[#allocation92_spill] sm:$0xff] %v4435_v58  ;;  %v4438_v52 = vmul.f32 %v4435_v58, %v795_v15  ;;  %6185 = vst [vmem:[#allocation94_spill] sm:$0xff] %v4441_v23  ;;  %v2166_v58 = vstv %s4353_s24  ;;  %632 = vrot.lane.b32.xlu1 %v625_v28, %s3597_s15  ;;  %565 = vrot.lane.b32.xlu0 %v557_v10, %s3597_s15  ;;  %v626_v26 = vmul.f32 %v3762_v47, %v4394_v27  ;;  %v4503_v28 = vld [vmem:[%s3681_s13] sm:$0xff]  ;;  %s4798_s24 = sld [smem:[#allocation2 + $0x14]] }
 0x138   : > { %6186 = vst [vmem:[#allocation95_spill] sm:$0xff] %v4448_v56  ;;  %6187 = vst [vmem:[#allocation96_spill] sm:$0xff] %v4451_v24  ;;  %v4470_v24 = vmul.f32 %v3755_v43, %v1001_v33  ;;  %v4506_v10 = vmul.f32 %v4503_v28, %v795_v15  ;;  %v963_v23 = vstv %s4412_s29  ;;  %v4526_v15 = vmul.f32 %v3821_v21, %v2263_v14  ;;  %s4885_s29 = sld [smem:[#allocation2 + $0x2c]] }
 0x139   : > { %6184 = vst [vmem:[#allocation93_spill] sm:$0xff] %v4438_v52  ;;  %6188 = vst [vmem:[#allocation97_spill] sm:$0xff] %v4454_v19  ;;  %v4460_v52 = vpop.permute.xlu1 %2357  ;;  %v4509_v19 = vmul.f32 %v3814_v16, %v2263_v14 }
 0x13a   : > { %6189 = vst [vmem:[#allocation98_spill] sm:$0xff] %v4457_v20  ;;  %6190 = vst [vmem:[#allocation99_spill] sm:$0xff] %v4460_v52  ;;  %v4479_v52 = vmul.f32 %v3814_v16, %v1082_v2  ;;  %v4498_v20 = vstv %s4396_s27  ;;  %s4866_s27 = sld [smem:[#allocation2 + $0x5c]] }
 0x13b   : > { %6191 = vst [vmem:[#allocation100_spill] sm:$0xff] %v4462_v25  ;;  %6192 = vst [vmem:[#allocation101_spill] sm:$0xff] %v4467_v3  ;;  %v2322_v25 = vstv %s4382_s26  ;;  %v1301_v3 = vmul.f32 %v4448_v56, %v4445_v46  ;;  %v4520_v56 = vld [vmem:[%s3681_s13 + $0x18] sm:$0xff]  ;;  %634 = vrot.lane.b32.xlu0 %v626_v26, %s3597_s15  ;;  %v4557_v26 = vmul.f32 %v3755_v43, %v963_v23  ;;  %s4821_s26 = sld [smem:[#allocation2 + $0x4c]] }
 0x13c   : > { %6193 = vst [vmem:[#allocation102_spill] sm:$0xff] %v4470_v24  ;;  %6194 = vst [vmem:[#allocation103_spill] sm:$0xff] %v4473_v35  ;;  %v4489_v35 = vmul.f32 %v3762_v47, %v1001_v33  ;;  %v4492_v24 = vmul.f32 %v3755_v43, %v2166_v58  ;;  %v4523_v27 = vmul.f32 %v4520_v56, %v875_v48 }
 0x13d   : > { %6195 = vst [vmem:[#allocation104_spill] sm:$0xff] %v4479_v52  ;;  %v4495_v52 = vmul.f32 %v3821_v21, %v1082_v2  ;;  %6199 = vst [vmem:[#allocation108_spill] sm:$0xff] %v4506_v10  ;;  %v4529_v10 = vmul.f32 %v3814_v16, %v2322_v25  ;;  %1308 = vrot.lane.b32.xlu1 %v1301_v3, %s3597_s15  ;;  %v1386_v48 = vmul.f32 %v3755_v43, %v4498_v20 }
 0x13e   : > { %6196 = vst [vmem:[#allocation105_spill] sm:$0xff] %v4489_v35  ;;  %6197 = vst [vmem:[#allocation106_spill] sm:$0xff] %v4492_v24  ;;  %v4512_v35 = vmul.f32 %v3762_v47, %v2166_v58  ;;  %v4514_v24 = vpop.permute.xlu1 %1034  ;;  %v4535_v47 = vmul.f32 %v3821_v21, %v2322_v25  ;;  %v4554_v3 = vmul.f32 %v3846_v34, %v1082_v2  ;;  %v1089_v43 = vstv %s4464_s6  ;;  %s4941_s6 = sld [smem:[#allocation2]] }
 0x13f   : > { %6198 = vst [vmem:[#allocation107_spill] sm:$0xff] %v4495_v52  ;;  %6200 = vst [vmem:[#allocation109_spill] sm:$0xff] %v4509_v19  ;;  %v4516_v52 = vpop.permute.xlu0 %2359  ;;  %v4532_v19 = vmul.f32 %v3787_v59, %v958_v41  ;;  %v4548_v41 = vmul.f32 %v3787_v59, %v1001_v33  ;;  %v4571_v2 = vmul.f32 %v3846_v34, %v2322_v25  ;;  %v6218_v25 = vstv %s4134_s28  ;;  %s4658_s28 = sld [smem:[#allocation2 + $0x52]] }
 0x140   : > { %6201 = vst [vmem:[#allocation110_spill] sm:$0xff] %v4514_v24  ;;  %6202 = vst [vmem:[#allocation111_spill] sm:$0xff] %v4516_v52  ;;  %v4542_v24 = vld [vmem:[%s3681_s13 + $0x28] sm:$0x3] }
 0x141   : > { %6203 = vst [vmem:[#allocation112_spill] sm:$0xff] %v4520_v56  ;;  %6204 = vst [vmem:[#allocation113_spill] sm:$0xff] %v4523_v27  ;;  %v1302_v52 = vmul.f32 %v4542_v24, %v4445_v46  ;;  %1393 = vrot.lane.b32.xlu1 %v1386_v48, %s3597_s15 }
 0x142   : > { %6205 = vst [vmem:[#allocation114_spill] sm:$0xff] %v4526_v15  ;;  %6206 = vst [vmem:[#allocation115_spill] sm:$0xff] %v4529_v10  ;;  %v1046_v10 = vstv %s4432_s30  ;;  %v4563_v15 = vpop.permute.xlu1 %2199  ;;  %s4897_s30 = sld [smem:[#allocation2 + $0x7e]] }
 0x143   : > { %6207 = vst [vmem:[#allocation116_spill] sm:$0xff] %v4532_v19  ;;  %6208 = vst [vmem:[#allocation117_spill] sm:$0xff] %v4535_v47  ;;  %v4551_v47 = vmul.f32 %v3787_v59, %v2166_v58  ;;  %v2034_v19 = vadd.f32 %v3852_v38, %v4144_v49  ;;  %v4565_v33 = vpop.permute.xlu0 %1103  ;;  %v4568_v58 = vmul.f32 %v3846_v34, %v2263_v14  ;;  %v2270_v49 = vstv %s4476_s8  ;;  %s4991_s8 = sld [smem:[#allocation2 + $0x62]] }
 0x144   : > { %6209 = vst [vmem:[#allocation118_spill] sm:$0xff] %v4548_v41  ;;  %6211 = vst [vmem:[#allocation120_spill] sm:$0xff] %v4554_v3  ;;  %v2035_v3 = vadd.f32 %v3860_v44, %v4150_v53  ;;  %v4579_v38 = vmul.f32 %v3814_v16, %v1046_v10  ;;  %v849_v14 = vadd.f32 %v3862_v45, %v4156_v36  ;;  %1310 = vrot.lane.b32.xlu0 %v1302_v52, %s3597_s15 }
 0x145   : > { %6210 = vst [vmem:[#allocation119_spill] sm:$0xff] %v4551_v47  ;;  %6212 = vst [vmem:[#allocation121_spill] sm:$0xff] %v4557_v26  ;;  %v2033_v26 = vadd.f32 %v3854_v39, %v4147_v62  ;;  %v4592_v39 = vld [vmem:[%s3681_s13 + $0x40] sm:$0x3]  ;;  %v850_v53 = vadd.f32 %v3868_v50, %v4167_v63  ;;  %v4599_v62 = vstv %s4500_s9  ;;  %v4602_v45 = vmul.f32 %v3821_v21, %v1089_v43  ;;  %s5037_s9 = sld [smem:[#allocation2 + $0x32]] }
 0x146   : > { %6213 = vst [vmem:[#allocation122_spill] sm:$0xff] %v4563_v15  ;;  %6214 = vst [vmem:[#allocation123_spill] sm:$0xff] %v4565_v33  ;;  %v427_v15 = vmul.f32 %v4503_v28, %v6218_v25  ;;  %v1387_v44 = vmul.f32 %v4592_v39, %v4498_v20  ;;  %v4605_v36 = vmul.f32 %v3814_v16, %v1089_v43  ;;  %v4610_v25 = vpop.permute.xlu1 %988 }
 0x147   : > { %6215 = vst [vmem:[#allocation124_spill] sm:$0xff] %v4568_v58  ;;  %6216 = vst [vmem:[#allocation125_spill] sm:$0xff] %v4571_v2  ;;  %v1988_v52 = vadd.f32 %v3870_v51, %v4170_v29  ;;  %v2112_v48 = vadd.f32 %v4207_v31, %v2034_v19  ;;  %v4612_v33 = vpop.permute.xlu0 %2284  ;;  %v4615_v50 = vmul.f32 %v3821_v21, %v2270_v49  ;;  %v4631_v21 = vld [vmem:[%s3681_s13 + $0x38] sm:$0xff] }
 0x148   : > { %6217 = vst [vmem:[#allocation126_spill] sm:$0xff] %v4579_v38  ;;  %6219 = vst [vmem:[#allocation127_spill] sm:$0xff] %v4602_v45  ;;  %v4618_v63 = vmul.f32 %v3814_v16, %v2270_v49  ;;  %v2113_v45 = vadd.f32 %v4221_v5, %v2035_v3  ;;  %v2111_v51 = vadd.f32 %v4227_v37, %v2033_v26  ;;  %431 = vrot.lane.b32.xlu1 %v427_v15, %s3597_s15 }
 0x149   : > { %6220 = vst [vmem:[#allocation128_spill] sm:$0xff] %v4605_v36  ;;  %6221 = vst [vmem:[#allocation129_spill] sm:$0xff] %v4610_v25  ;;  %v1989_v36 = vadd.f32 %v3876_v54, %v4179_v18  ;;  %v4625_v29 = vmul.f32 %v3787_v59, %v963_v23  ;;  %v911_v31 = vadd.f32 %v4241_v42, %v849_v14  ;;  %1395 = vrot.lane.b32.xlu0 %v1387_v44, %s3597_s15  ;;  %v6234_v14 = vld [vmem:[#allocation60_spill] sm:$0xff] }
 0x14a   : > { %6222 = vst [vmem:[#allocation130_spill] sm:$0xff] %v4612_v33  ;;  %6223 = vst [vmem:[#allocation131_spill] sm:$0xff] %v4615_v50  ;;  %v1457_v19 = vmul.f32 %v4631_v21, %v4599_v62  ;;  %v6227_v25 = vstv %s4176_s7  ;;  %v2053_v37 = vadd.f32 %v3878_v55, %v4182_v11  ;;  %v912_v59 = vadd.f32 %v4251_v32, %v850_v53  ;;  %v4651_v3 = vpop.permute.xlu1 %2355  ;;  %s4673_s7 = sld [smem:[#allocation2 + $0x22]]  ;;  %v6241_v53 = vld [vmem:[#allocation9_spill] sm:$0xff]  ;;  %v6294_v33 = vld [vmem:[#allocation90_spill] sm:$0xff] }
 0x14b   : > { %6224 = vst [vmem:[#allocation132_spill] sm:$0xff] %v4618_v63  ;;  %6225 = vst [vmem:[#allocation133_spill] sm:$0xff] %v4625_v29  ;;  %v496_v54 = vmul.f32 %v4520_v56, %v6227_v25  ;;  %v4642_v5 = vstv %s4559_s10  ;;  %v4645_v18 = vmul.f32 %v3846_v34, %v1046_v10  ;;  %v2054_v42 = vadd.f32 %v3884_v60, %v4195_v9  ;;  %v4653_v26 = vpop.permute.xlu0 %1063  ;;  %v6293_v50 = vld [vmem:[#allocation89_spill] sm:$0xff]  ;;  %s5083_s10 = sld [smem:[#allocation2 + $0x7a]] }
 0x14c   : > { %6226 = vst [vmem:[#allocation134_spill] sm:$0xff] %v4631_v21  ;;  %v2138_v23 = vadd.f32 %v3886_v61, %v2112_v48  ;;  %v2060_v15 = vadd.f32 %v4278_v22, %v1988_v52  ;;  %6229 = vst [vmem:[#allocation136_spill] sm:$0xff] %v4651_v3  ;;  %v4656_v55 = vmul.f32 %v3846_v34, %v1089_v43  ;;  %v1051_v9 = vstv %s4582_s11  ;;  %v6243_v48 = vld [vmem:[#allocation59_spill] sm:$0xff]  ;;  %v6285_v3 = vld [vmem:[#allocation85_spill] sm:$0xff]  ;;  %s5100_s11 = sld [smem:[#allocation2 + $0x76]] }
 0x14d   : > { %6228 = vst [vmem:[#allocation135_spill] sm:$0xff] %v4645_v18  ;;  %6230 = vst [vmem:[#allocation137_spill] sm:$0xff] %v4653_v26  ;;  %v2139_v32 = vadd.f32 %v3894_v0, %v2113_v45  ;;  %v848_v11 = vadd.f32 %v3896_v4, %v4174_v30  ;;  %v2061_v60 = vadd.f32 %v4288_v6, %v1989_v36  ;;  %1464 = vrot.lane.b32.xlu1 %v1457_v19, %s3597_s15  ;;  %v6233_v6 = vld [vmem:[#allocation64_spill] sm:$0xff]  ;;  %v6242_v36 = vld [vmem:[#allocation65_spill] sm:$0xff] }
 0x14e   : > { %6231 = vst [vmem:[#allocation138_spill] sm:$0xff] %v4656_v55  ;;  %v1987_v61 = vadd.f32 %v3904_v7, %v4185_v17  ;;  %500 = vrot.lane.b32.xlu0 %v496_v54, %s3597_s15  ;;  %v1542_v22 = vmul.f32 %v3814_v16, %v4642_v5  ;;  %v1458_v10 = vmul.f32 %v4592_v39, %v4599_v62  ;;  %v4895_v26 = vstv %s4771_s22  ;;  %v6292_v18 = vld [vmem:[#allocation21_spill] sm:$0xff]  ;;  %s5475_s22 = sld [smem:[#allocation2 + $0x48]] }
 0x14f   : > { %v810_v0 = vadd.f32 %v3906_v8, %v4224_v40  ;;  %v2052_v4 = vadd.f32 %v3913_v12, %v4198_v57  ;;  %v2119_v7 = vadd.f32 %v4291_v1, %v2053_v37  ;;  %v4681_v17 = vmul.f32 %v3846_v34, %v2270_v49  ;;  %v4692_v8 = vpop.permute.xlu1 %1126  ;;  %v4694_v40 = vpop.permute.xlu0 %1124  ;;  %v6238_v57 = vld [vmem:[#allocation52_spill] sm:$0xff]  ;;  %v4721_v37 = vld [vmem:[%s3681_s13 + $0x58] sm:$0x3] }
 0x150   : > { %v2137_v30 = vadd.f32 %v3915_v13, %v2111_v51  ;;  %v4687_v43 = vadd.f32 %v6233_v6, %v2138_v23  ;;  %v4690_v44 = vadd.f32 %v6234_v14, %v2054_v42  ;;  %6235 = vst [vmem:[#allocation64_spill] sm:$0xff] %v4692_v8  ;;  %6236 = vst [vmem:[#allocation60_spill] sm:$0xff] %v4694_v40  ;;  %v6239_v1 = vld [vmem:[#allocation8_spill] sm:$0xff]  ;;  %v6240_v13 = vld [vmem:[#allocation53_spill] sm:$0xff] }
 0x151   : > { %6232 = vst [vmem:[#allocation139_spill] sm:$0xff] %v4681_v17  ;;  %v4697_v12 = vmul.f32 %v3814_v16, %v1051_v9  ;;  %v868_v49 = vadd.f32 %v6239_v1, %v6238_v57  ;;  %v869_v45 = vadd.f32 %v6241_v53, %v6240_v13  ;;  %v4706_v52 = vadd.f32 %v6242_v36, %v2139_v32  ;;  %v6244_v51 = vld [vmem:[#allocation61_spill] sm:$0xff]  ;;  %v6245_v16 = vld [vmem:[#allocation70_spill] sm:$0xff]  ;;  %v6249_v14 = vld [vmem:[#allocation67_spill] sm:$0xff] }
 0x152   : > { %v4709_v25 = vadd.f32 %v6243_v48, %v848_v11  ;;  %v4714_v19 = vadd.f32 %v6244_v51, %v1987_v61  ;;  %1549 = vrot.lane.b32.xlu1 %v1542_v22, %s3597_s15  ;;  %1466 = vrot.lane.b32.xlu0 %v1458_v10, %s3597_s15  ;;  %v555_v54 = vmul.f32 %v4520_v56, %v6245_v16  ;;  %v6246_v23 = vld [vmem:[#allocation10_spill] sm:$0xff]  ;;  %v6247_v11 = vld [vmem:[#allocation11_spill] sm:$0xff]  ;;  %v6250_v57 = vld [vmem:[#allocation56_spill] sm:$0xff] }
 0x153   : > { %6237 = vst [vmem:[#allocation140_spill] sm:$0xff] %v4697_v12  ;;  %v1543_v42 = vmul.f32 %v4721_v37, %v4642_v5  ;;  %v937_v32 = vadd.f32 %v6246_v23, %v911_v31  ;;  %v938_v61 = vadd.f32 %v6247_v11, %v912_v59  ;;  %v6248_v6 = vld [vmem:[#allocation66_spill] sm:$0xff]  ;;  %v4733_v10 = vadd.f32 %v6249_v14, %v810_v0  ;;  %v6251_v1 = vld [vmem:[#allocation12_spill] sm:$0xff]  ;;  %v6253_v36 = vld [vmem:[#allocation13_spill] sm:$0xff]  ;;  %v4744_v31 = vpop.permute.xlu1 %2307  ;;  %v4746_v59 = vpop.permute.xlu0 %2305 }
 0x154   : > { %v4730_v22 = vadd.f32 %v6248_v6, %v2052_v4  ;;  %v2007_v13 = vadd.f32 %v6251_v1, %v6250_v57  ;;  %v6252_v53 = vld [vmem:[#allocation58_spill] sm:$0xff]  ;;  %v6254_v51 = vld [vmem:[#allocation68_spill] sm:$0xff]  ;;  %6255 = vst [vmem:[#allocation52_spill] sm:$0xff] %v4744_v31  ;;  %6256 = vst [vmem:[#allocation8_spill] sm:$0xff] %v4746_v59  ;;  %v1300_v14 = vmul.f32 %v4520_v56, %v4445_v46 }
 0x155   : > { %v2008_v48 = vadd.f32 %v6253_v36, %v6252_v53  ;;  %v4742_v16 = vadd.f32 %v6254_v51, %v2137_v30  ;;  %v6257_v23 = vld [vmem:[#allocation72_spill] sm:$0xff]  ;;  %v6258_v11 = vld [vmem:[#allocation73_spill] sm:$0xff]  ;;  %v4758_v57 = vld [vmem:[%s3681_s13 + $0x30] sm:$0xff]  ;;  %v2243_v29 = vadd.f32 %v6292_v18, %v4706_v52  ;;  %v4926_v18 = vstv %s4798_s24  ;;  %s5540_s24 = sld [smem:[#allocation2 + $0x28]] }
 0x156   : > { %v4750_v0 = vadd.f32 %v6257_v23, %v868_v49  ;;  %v4753_v6 = vadd.f32 %v6258_v11, %v869_v45  ;;  %6259 = vst [vmem:[#allocation53_spill] sm:$0xff] %v4758_v57  ;;  %v6260_v30 = vld [vmem:[#allocation83_spill] sm:$0xff]  ;;  %v6261_v53 = vld [vmem:[#allocation14_spill] sm:$0xff]  ;;  %561 = vrot.lane.b32.xlu1 %v555_v54, %s3597_s15  ;;  %1551 = vrot.lane.b32.xlu0 %v1543_v42, %s3597_s15  ;;  %v6264_v46 = vld [vmem:[#allocation77_spill] sm:$0xff] }
 0x157   : > { %v624_v1 = vmul.f32 %v4758_v57, %v6260_v30  ;;  %v2086_v36 = vadd.f32 %v6261_v53, %v2060_v15  ;;  %v6262_v51 = vld [vmem:[#allocation15_spill] sm:$0xff]  ;;  %v4769_v49 = vmul.f32 %v3846_v34, %v1051_v9  ;;  %v4774_v45 = vadd.f32 %v6264_v46, %v937_v32  ;;  %v6265_v23 = vld [vmem:[#allocation78_spill] sm:$0xff]  ;;  %v6269_v34 = vld [vmem:[#allocation81_spill] sm:$0xff]  ;;  %v4793_v32 = vpop.permute.xlu0 %986 }
 0x158   : > { %v2087_v4 = vadd.f32 %v6262_v51, %v2061_v60  ;;  %v4777_v11 = vadd.f32 %v6265_v23, %v938_v61  ;;  %v6266_v15 = vstv %s4658_s28  ;;  %v6267_v30 = vld [vmem:[#allocation95_spill] sm:$0xff]  ;;  %v4789_v9 = vadd.f32 %v6269_v34, %v2008_v48  ;;  %v4791_v51 = vpop.permute.xlu1 %1061  ;;  %6271 = vst [vmem:[#allocation59_spill] sm:$0xff] %v4793_v32  ;;  %v6272_v23 = vld [vmem:[#allocation16_spill] sm:$0xff]  ;;  %v4850_v59 = vld [vmem:[%s3681_s13 + $0x48] sm:$0xff] }
 0x159   : > { %6263 = vst [vmem:[#allocation9_spill] sm:$0xff] %v4769_v49  ;;  %v510_v53 = vmul.f32 %v6267_v30, %v6266_v15  ;;  %v6268_v54 = vld [vmem:[#allocation79_spill] sm:$0xff]  ;;  %6270 = vst [vmem:[#allocation65_spill] sm:$0xff] %v4791_v51  ;;  %v1385_v61 = vmul.f32 %v4758_v57, %v4498_v20  ;;  %v1220_v46 = vstv %s4683_s12  ;;  %v6273_v15 = vld [vmem:[#allocation57_spill] sm:$0xff]  ;;  %v1456_v34 = vmul.f32 %v4758_v57, %v4599_v62  ;;  %s5208_s12 = sld [smem:[#allocation4 + $0x1]] }
 0x15a   : > { %v4786_v42 = vadd.f32 %v6268_v54, %v2007_v13  ;;  %v2157_v13 = vadd.f32 %v6272_v23, %v2119_v7  ;;  %v6274_v54 = vld [vmem:[#allocation17_spill] sm:$0xff]  ;;  %v4806_v60 = vstv %s4699_s14  ;;  %v6275_v49 = vld [vmem:[#allocation80_spill] sm:$0xff]  ;;  %1306 = vrot.lane.b32.xlu1 %v1300_v14, %s3597_s15  ;;  %630 = vrot.lane.b32.xlu0 %v624_v1, %s3597_s15  ;;  %v6277_v7 = vstv %s4673_s7  ;;  %v6280_v14 = vld [vmem:[#allocation18_spill] sm:$0xff]  ;;  %6284 = vst [vmem:[#allocation11_spill] sm:$0xff] %v4850_v59  ;;  %s5257_s14 = sld [smem:[#allocation2 + $0x10]] }
 0x15b   : > { %v809_v48 = vadd.f32 %v6274_v54, %v6273_v15  ;;  %v4811_v32 = vadd.f32 %v6275_v49, %v2086_v36  ;;  %v6276_v20 = vld [vmem:[#allocation84_spill] sm:$0xff]  ;;  %v585_v23 = vmul.f32 %v4631_v21, %v6277_v7  ;;  %v1318_v62 = vstv %s4711_s16  ;;  %v4825_v15 = vld [vmem:[%s3681_s13 + $0x10] sm:$0x3]  ;;  %v6281_v7 = vld [vmem:[#allocation19_spill] sm:$0xff]  ;;  %v4845_v8 = vpop.permute.xlu0 %1122  ;;  %s5809_s16 = sld [smem:[#allocation2 + $0x78]] }
 0x15c   : > { %v4814_v12 = vadd.f32 %v6276_v20, %v2087_v4  ;;  %6278 = vst [vmem:[#allocation61_spill] sm:$0xff] %v4825_v15  ;;  %v4828_v54 = vmul.f32 %v4825_v15, %v1220_v46  ;;  %v6279_v36 = vld [vmem:[#allocation92_spill] sm:$0xff]  ;;  %v4834_v4 = vstv %s4735_s20  ;;  %v4837_v20 = vstv %s4725_s17  ;;  %v4843_v40 = vpop.permute.xlu1 %2303  ;;  %6283 = vst [vmem:[#allocation10_spill] sm:$0xff] %v4845_v8  ;;  %v6302_v52 = vld [vmem:[#allocation22_spill] sm:$0xff]  ;;  %s5819_s17 = sld [smem:[#allocation2 + $0x74]] }
 0x15d   : > { %v4831_v49 = vmul.f32 %v6279_v36, %v1220_v46  ;;  %v2242_v1 = vadd.f32 %v6280_v14, %v4687_v43  ;;  %v2158_v51 = vadd.f32 %v6281_v7, %v4690_v44  ;;  %6282 = vst [vmem:[#allocation70_spill] sm:$0xff] %v4843_v40  ;;  %v644_v17 = vmul.f32 %v4631_v21, %v4806_v60  ;;  %v6286_v43 = vld [vmem:[#allocation69_spill] sm:$0xff] }
 0x15e   : > { %v1541_v31 = vmul.f32 %v4850_v59, %v4642_v5  ;;  %v4855_v55 = vadd.f32 %v6285_v3, %v2157_v13  ;;  %v4858_v44 = vadd.f32 %v6286_v43, %v809_v48  ;;  %v4861_v14 = vmul.f32 %v4503_v28, %v1220_v46  ;;  %515 = vrot.lane.b32.xlu1 %v510_v53, %s3597_s15  ;;  %v4875_v3 = vld [vmem:[%s3681_s13 + $0x50] sm:$0xff]  ;;  %v6290_v53 = vld [vmem:[#allocation71_spill] sm:$0xff] }
 0x15f   : > { %v4864_v7 = vmul.f32 %v6267_v30, %v1318_v62  ;;  %1391 = vrot.lane.b32.xlu0 %v1385_v61, %s3597_s15  ;;  %v4872_v5 = vmul.f32 %v6279_v36, %v4834_v4  ;;  %6289 = vst [vmem:[#allocation56_spill] sm:$0xff] %v4875_v3  ;;  %v713_v13 = vmul.f32 %v4875_v3, %v4837_v20  ;;  %v4883_v48 = vstv %s4762_s21  ;;  %v6291_v61 = vld [vmem:[#allocation20_spill] sm:$0xff] }
 0x160   : > { %6287 = vst [vmem:[#allocation66_spill] sm:$0xff] %v4861_v14  ;;  %v4880_v46 = vmul.f32 %v4542_v24, %v1318_v62  ;;  %v867_v43 = vadd.f32 %v6291_v61, %v6290_v53  ;;  %v645_v40 = vmul.f32 %v4592_v39, %v4806_v60  ;;  %v4892_v8 = vstv %s4783_s23  ;;  %v4907_v53 = vpop.permute.xlu1 %1074  ;;  %v4909_v61 = vpop.permute.xlu0 %1076  ;;  %s5502_s23 = sld [smem:[#allocation2 + $0x58]] }
 0x161   : > { %6288 = vst [vmem:[#allocation67_spill] sm:$0xff] %v4872_v5  ;;  %v4902_v63 = vadd.f32 %v6293_v50, %v2242_v1  ;;  %v4905_v38 = vadd.f32 %v6294_v33, %v2158_v51  ;;  %6296 = vst [vmem:[#allocation58_spill] sm:$0xff] %v4907_v53  ;;  %v4912_v2 = vmul.f32 %v4520_v56, %v1318_v62  ;;  %v4919_v5 = vstv %s4808_s25  ;;  %v6301_v33 = vld [vmem:[#allocation76_spill] sm:$0xff]  ;;  %s5542_s25 = sld [smem:[#allocation2 + $0x44]] }
 0x162   : > { %6297 = vst [vmem:[#allocation13_spill] sm:$0xff] %v4909_v61  ;;  %v4916_v58 = vmul.f32 %v4825_v15, %v4834_v4  ;;  %v4923_v50 = vmul.f32 %v6267_v30, %v4883_v48  ;;  %v2006_v51 = vadd.f32 %v6302_v52, %v6301_v33  ;;  %1462 = vrot.lane.b32.xlu1 %v1456_v34, %s3597_s15  ;;  %v4939_v53 = vstv %s4821_s26  ;;  %v6304_v61 = vld [vmem:[#allocation23_spill] sm:$0xff]  ;;  %v6305_v33 = vld [vmem:[#allocation82_spill] sm:$0xff]  ;;  %s5575_s26 = sld [smem:[#allocation2 + $0x54]] }
 0x163   : > { %6295 = vst [vmem:[#allocation12_spill] sm:$0xff] %v4905_v38  ;;  %6298 = vst [vmem:[#allocation68_spill] sm:$0xff] %v4912_v2  ;;  %590 = vrot.lane.b32.xlu0 %v585_v23, %s3597_s15  ;;  %v4934_v62 = vmul.f32 %v6279_v36, %v4892_v8  ;;  %v1405_v1 = vmul.f32 %v4631_v21, %v4895_v26  ;;  %v4946_v52 = vadd.f32 %v6305_v33, %v867_v43  ;;  %v6311_v33 = vld [vmem:[#allocation93_spill] sm:$0xff] }
 0x164   : > { %6299 = vst [vmem:[#allocation72_spill] sm:$0xff] %v4916_v58  ;;  %6300 = vst [vmem:[#allocation73_spill] sm:$0xff] %v4923_v50  ;;  %v936_v50 = vadd.f32 %v6304_v61, %v4709_v25  ;;  %v714_v34 = vmul.f32 %v4721_v37, %v4837_v20  ;;  %v4952_v23 = vmul.f32 %v4542_v24, %v4883_v48  ;;  %v4957_v47 = vpop.permute.xlu1 %1239  ;;  %v1238_v2 = vpop.permute.xlu0 %1237 }
 0x165   : > { %6303 = vst [vmem:[#allocation83_spill] sm:$0xff] %v4934_v62  ;;  %6306 = vst [vmem:[#allocation14_spill] sm:$0xff] %v4946_v52  ;;  %v6308_v62 = vld [vmem:[#allocation91_spill] sm:$0xff]  ;;  %v4961_v25 = vmul.f32 %v4825_v15, %v4892_v8  ;;  %v4965_v43 = vmul.f32 %v4875_v3, %v4919_v5  ;;  %v4969_v61 = vmul.f32 %v6267_v30, %v4926_v18  ;;  %v6316_v52 = vld [vmem:[#allocation94_spill] sm:$0xff] }
 0x166   : > { %6307 = vst [vmem:[#allocation15_spill] sm:$0xff] %v4952_v23  ;;  %v4955_v58 = vadd.f32 %v6308_v62, %v2243_v29  ;;  %v6312_v29 = vld [vmem:[#allocation24_spill] sm:$0xff]  ;;  %v6313_v23 = vld [vmem:[#allocation25_spill] sm:$0xff]  ;;  %v4977_v14 = vmul.f32 %v6279_v36, %v4939_v53  ;;  %v4983_v27 = vadd.f32 %v6316_v52, %v2006_v51  ;;  %651 = vrot.lane.b32.xlu1 %v644_v17, %s3597_s15  ;;  %v5005_v17 = vstv %s4897_s30  ;;  %v6323_v52 = vld [vmem:[#allocation26_spill] sm:$0xff]  ;;  %s3240_s30 = sld [smem:[#allocation2 + $0x34]] }
 0x167   : > { %6309 = vst [vmem:[#allocation77_spill] sm:$0xff] %v4961_v25  ;;  %6310 = vst [vmem:[#allocation78_spill] sm:$0xff] %v4969_v61  ;;  %v823_v62 = vadd.f32 %v6312_v29, %v6311_v33  ;;  %v2085_v41 = vadd.f32 %v6313_v23, %v4714_v19  ;;  %v4980_v25 = vstv %s4866_s27  ;;  %1547 = vrot.lane.b32.xlu0 %v1541_v31, %s3597_s15  ;;  %v6319_v23 = vld [vmem:[#allocation86_spill] sm:$0xff]  ;;  %v5008_v31 = vstv %s4885_s29  ;;  %s3224_s27 = sld [smem:[#allocation2 + $0x24]] }
 0x168   : > { %6314 = vst [vmem:[#allocation95_spill] sm:$0xff] %v4977_v14  ;;  %6315 = vst [vmem:[#allocation79_spill] sm:$0xff] %v4980_v25  ;;  %v4989_v33 = vmul.f32 %v4592_v39, %v4895_v26  ;;  %v4995_v19 = vmul.f32 %v4542_v24, %v4926_v18  ;;  %v4998_v29 = vadd.f32 %v6319_v23, %v936_v50  ;;  %v6324_v14 = vld [vmem:[#allocation27_spill] sm:$0xff]  ;;  %v5014_v38 = vpop.permute.xlu1 %456  ;;  %v6325_v50 = vstv %s4658_s28  ;;  %s5163_s28 = sld [smem:[#allocation4]] }
 0x169   : > { %6317 = vst [vmem:[#allocation81_spill] sm:$0xff] %v4983_v27  ;;  %v5002_v51 = vmul.f32 %v4825_v15, %v4939_v53  ;;  %6322 = vst [vmem:[#allocation80_spill] sm:$0xff] %v5008_v31  ;;  %v2156_v61 = vadd.f32 %v6323_v52, %v4730_v22  ;;  %v892_v27 = vadd.f32 %v6324_v14, %v4733_v10  ;;  %v6328_v22 = vld [vmem:[#allocation97_spill] sm:$0xff]  ;;  %s3244_s29 = sld [smem:[#allocation2 + $0x38]] }
 0x16a   : > { %6318 = vst [vmem:[#allocation16_spill] sm:$0xff] %v4995_v19  ;;  %6320 = vst [vmem:[#allocation57_spill] sm:$0xff] %v4998_v29  ;;  %v5016_v19 = vpop.permute.xlu0 %1235  ;;  %v5021_v23 = vmul.f32 %v4520_v56, %v6325_v50  ;;  %v5025_v15 = vmul.f32 %v6267_v30, %v4980_v25  ;;  %v5031_v52 = vadd.f32 %v6328_v22, %v2085_v41  ;;  %720 = vrot.lane.b32.xlu1 %v713_v13, %s3597_s15  ;;  %v6333_v13 = vld [vmem:[#allocation29_spill] sm:$0xff] }
 0x16b   : > { %6321 = vst [vmem:[#allocation17_spill] sm:$0xff] %v5002_v51  ;;  %v6327_v51 = vld [vmem:[#allocation96_spill] sm:$0xff]  ;;  %v5035_v10 = vmul.f32 %v4721_v37, %v4919_v5  ;;  %v5041_v14 = vmul.f32 %v4542_v24, %v4980_v25  ;;  %653 = vrot.lane.b32.xlu0 %v645_v40, %s3597_s15  ;;  %v5047_v30 = vmul.f32 %v4503_v28, %v4834_v4  ;;  %v6334_v22 = vstv %s4673_s7  ;;  %s5193_s7 = sld [smem:[#allocation2 + $0x72]] }
 0x16c   : > { %6326 = vst [vmem:[#allocation84_spill] sm:$0xff] %v5025_v15  ;;  %v5028_v29 = vadd.f32 %v6327_v51, %v823_v62  ;;  %v5051_v41 = vmul.f32 %v4875_v3, %v5005_v17  ;;  %v5056_v51 = vmul.f32 %v4631_v21, %v5008_v31  ;;  %v6332_v24 = vld [vmem:[#allocation28_spill] sm:$0xff]  ;;  %v2241_v40 = vadd.f32 %v6333_v13, %v4742_v16  ;;  %v6336_v62 = vld [vmem:[#allocation30_spill] sm:$0xff]  ;;  %v6340_v13 = vld [vmem:[#allocation31_spill] sm:$0xff] }
 0x16d   : > { %6329 = vst [vmem:[#allocation92_spill] sm:$0xff] %v5041_v14  ;;  %6330 = vst [vmem:[#allocation18_spill] sm:$0xff] %v5047_v30  ;;  %v956_v50 = vadd.f32 %v6332_v24, %v4750_v0  ;;  %v5065_v4 = vmul.f32 %v4758_v57, %v6334_v22  ;;  %v5069_v25 = vmul.f32 %v4503_v28, %v4892_v8  ;;  %v6337_v14 = vld [vmem:[#allocation98_spill] sm:$0xff]  ;;  %v5079_v24 = vpop.permute.xlu1 %1191 }
 0x16e   : > { %6331 = vst [vmem:[#allocation19_spill] sm:$0xff] %v5056_v51  ;;  %v1025_v30 = vadd.f32 %v6336_v62, %v4774_v45  ;;  %v5074_v15 = vadd.f32 %v6337_v14, %v2156_v61  ;;  %v6338_v51 = vld [vmem:[#allocation101_spill] sm:$0xff]  ;;  %v5081_v16 = vpop.permute.xlu0 %458  ;;  %v5087_v8 = vmul.f32 %v4592_v39, %v5008_v31  ;;  %v957_v45 = vadd.f32 %v6340_v13, %v4753_v6  ;;  %v6344_v39 = vld [vmem:[#allocation32_spill] sm:$0xff]  ;;  %v6347_v13 = vld [vmem:[#allocation102_spill] sm:$0xff] }
 0x16f   : > { %6335 = vst [vmem:[#allocation85_spill] sm:$0xff] %v5069_v25  ;;  %v5077_v0 = vadd.f32 %v6338_v51, %v892_v27  ;;  %v6341_v62 = vstv %s4941_s6  ;;  %v5098_v27 = vmul.f32 %v4758_v57, %v4806_v60  ;;  %v5104_v14 = vmul.f32 %v4520_v56, %v4883_v48  ;;  %1412 = vrot.lane.b32.xlu1 %v1405_v1, %s3597_s15  ;;  %v6346_v48 = vld [vmem:[#allocation33_spill] sm:$0xff]  ;;  %v6348_v1 = vld [vmem:[#allocation103_spill] sm:$0xff] }
 0x170   : > { %6339 = vst [vmem:[#allocation69_spill] sm:$0xff] %v5087_v8  ;;  %v5094_v61 = vmul.f32 %v6279_v36, %v6341_v62  ;;  %v2105_v51 = vadd.f32 %v6344_v39, %v4786_v42  ;;  %722 = vrot.lane.b32.xlu0 %v714_v34, %s3597_s15  ;;  %v5112_v6 = vmul.f32 %v4721_v37, %v5005_v17  ;;  %v6075_v36 = vstv %s4991_s8  ;;  %v6349_v39 = vld [vmem:[#allocation104_spill] sm:$0xff] }
 0x171   : > { %6343 = vst [vmem:[#allocation20_spill] sm:$0xff] %v5104_v14  ;;  %v5116_v60 = vmul.f32 %v4503_v28, %v4939_v53  ;;  %v1026_v22 = vadd.f32 %v6346_v48, %v4777_v11  ;;  %v5122_v42 = vadd.f32 %v6347_v13, %v956_v50  ;;  %v5125_v62 = vadd.f32 %v6348_v1, %v2241_v40  ;;  %v6353_v48 = vld [vmem:[#allocation35_spill] sm:$0xff]  ;;  %v6354_v13 = vld [vmem:[#allocation106_spill] sm:$0xff] }
 0x172   : > { %6342 = vst [vmem:[#allocation71_spill] sm:$0xff] %v5094_v61  ;;  %v1245_v34 = vadd.f32 %v1238_v2, %v4831_v49  ;;  %v5129_v31 = vadd.f32 %v6349_v39, %v1025_v30  ;;  %v5131_v61 = vpop.permute.xlu1 %1256  ;;  %v5133_v14 = vpop.permute.xlu0 %1193  ;;  %v5137_v28 = vmul.f32 %v4758_v57, %v4895_v26  ;;  %v5141_v11 = vmul.f32 %v4850_v59, %v4837_v20  ;;  %v6351_v2 = vld [vmem:[#allocation34_spill] sm:$0xff]  ;;  %v6352_v30 = vld [vmem:[#allocation105_spill] sm:$0xff] }
 0x173   : > { %6345 = vst [vmem:[#allocation21_spill] sm:$0xff] %v5116_v60  ;;  %v5145_v53 = vmul.f32 %v4520_v56, %v4926_v18  ;;  %v2190_v49 = vadd.f32 %v6351_v2, %v4811_v32  ;;  %v5150_v50 = vadd.f32 %v6352_v30, %v957_v45  ;;  %v5155_v40 = vmul.f32 %v4631_v21, %v6075_v36  ;;  %v6355_v18 = vld [vmem:[#allocation107_spill] sm:$0xff]  ;;  %v6357_v2 = vld [vmem:[#allocation36_spill] sm:$0xff]  ;;  %v6358_v30 = vld [vmem:[#allocation37_spill] sm:$0xff] }
 0x174   : > { %v671_v26 = vstv %s5037_s9  ;;  %v2106_v20 = vadd.f32 %v6353_v48, %v4789_v9  ;;  %v5161_v1 = vadd.f32 %v6354_v13, %v2105_v51  ;;  %1497 = vrot.lane.b32.xlu1 %v4965_v43, %s3597_s15  ;;  %1414 = vrot.lane.b32.xlu0 %v4989_v33, %s3597_s15  ;;  %v5171_v32 = vmul.f32 %v4850_v59, %v4919_v5  ;;  %v6356_v43 = vld [vmem:[#allocation108_spill] sm:$0xff]  ;;  %s5711_s9 = sld [smem:[#allocation2 + $0x50]] }
 0x175   : > { %6350 = vst [vmem:[#allocation89_spill] sm:$0xff] %v5145_v53  ;;  %v5174_v45 = vadd.f32 %v6355_v18, %v1026_v22  ;;  %v1246_v9 = vadd.f32 %v4957_v47, %v4828_v54  ;;  %v1323_v51 = vadd.f32 %v4864_v7, %v1245_v34  ;;  %v5181_v39 = vmul.f32 %v4850_v59, %v5005_v17  ;;  %v6359_v47 = vld [vmem:[#allocation43_spill] sm:$0xff]  ;;  %v6360_v7 = vld [vmem:[#allocation109_spill] sm:$0xff] }
 0x176   : > { %v822_v33 = vadd.f32 %v6357_v2, %v6356_v43  ;;  %v2191_v48 = vadd.f32 %v6358_v30, %v4814_v12  ;;  %v1342_v5 = vpop.permute.xlu1 %1341  ;;  %v5187_v13 = vpop.permute.xlu0 %1258  ;;  %v5190_v22 = vmul.f32 %v4875_v3, %v671_v26  ;;  %v730_v18 = vstv %s5083_s10  ;;  %v6361_v2 = vld [vmem:[#allocation38_spill] sm:$0xff]  ;;  %v6362_v30 = vld [vmem:[#allocation39_spill] sm:$0xff]  ;;  %s5721_s10 = sld [smem:[#allocation2 + $0x20]] }
 0x177   : > { %v2347_v54 = vadd.f32 %v6359_v47, %v4955_v58  ;;  %v2268_v17 = vadd.f32 %v6360_v7, %v2190_v49  ;;  %v5198_v34 = vadd.f32 %v1342_v5, %v1323_v51  ;;  %v1507_v43 = vstv %s5100_s11  ;;  %v6363_v58 = vld [vmem:[#allocation40_spill] sm:$0xff]  ;;  %v6365_v51 = vld [vmem:[#allocation41_spill] sm:$0xff]  ;;  %v6367_v7 = vld [vmem:[#allocation114_spill] sm:$0xff]  ;;  %s5727_s11 = sld [smem:[#allocation2 + $0x7c]] }
 0x178   : > { %v2261_v12 = vadd.f32 %v6361_v2, %v4855_v55  ;;  %v891_v36 = vadd.f32 %v6362_v30, %v4858_v44  ;;  %v5206_v21 = vadd.f32 %v4512_v35, %v2106_v20  ;;  %513 = vrot.lane.b32.xlu1 %v5021_v23, %s3597_s15  ;;  %1499 = vrot.lane.b32.xlu0 %v5035_v10, %s3597_s15  ;;  %v6364_v20 = vld [vmem:[#allocation12_spill] sm:$0xff]  ;;  %v6366_v23 = vld [vmem:[#allocation113_spill] sm:$0xff]  ;;  %v5296_v8 = vstv %s5208_s12  ;;  %s5773_s12 = sld [smem:[#allocation2 + $0x60]] }
 0x179   : > { %v5216_v49 = vadd.f32 %v6363_v58, %v4902_v63  ;;  %v1324_v55 = vadd.f32 %v4880_v46, %v1246_v9  ;;  %v5220_v44 = vmul.f32 %v4721_v37, %v730_v18  ;;  %v5223_v35 = vmul.f32 %v4875_v3, %v730_v18  ;;  %v6368_v46 = vld [vmem:[#allocation14_spill] sm:$0xff]  ;;  %6385 = vst [vmem:[#allocation22_spill] sm:$0xff] %v5296_v8 }
 0x17a   : > { %v2262_v5 = vadd.f32 %v6365_v51, %v6364_v20  ;;  %v5228_v47 = vadd.f32 %v6366_v23, %v822_v33  ;;  %v2269_v10 = vadd.f32 %v6367_v7, %v2191_v48  ;;  %v1344_v2 = vpop.permute.xlu0 %1343  ;;  %v5231_v30 = vpop.permute.xlu1 %454  ;;  %v5234_v63 = vmul.f32 %v4721_v37, %v1507_v43  ;;  %v6369_v9 = vld [vmem:[#allocation42_spill] sm:$0xff]  ;;  %v6371_v23 = vld [vmem:[#allocation115_spill] sm:$0xff]  ;;  %v6372_v37 = vld [vmem:[#allocation116_spill] sm:$0xff] }
 0x17b   : > { %v955_v58 = vadd.f32 %v6369_v9, %v6368_v46  ;;  %v2373_v53 = vrot.slane %v2347_v54, 1  ;;  %v5238_v60 = vadd.f32 %v1344_v2, %v1324_v55  ;;  %v5241_v20 = vmul.f32 %v4875_v3, %v1507_v43  ;;  %v6370_v51 = vld [vmem:[#allocation74_spill] sm:$0xff]  ;;  %v6373_v55 = vld [vmem:[#allocation88_spill] sm:$0xff] }
 0x17c   : > { %v5244_v33 = vstv %s5163_s28  ;;  %v2294_v48 = vadd.f32 %v6370_v51, %v2268_v17  ;;  %v5248_v7 = vadd.f32 %v6371_v23, %v2261_v12  ;;  %v5251_v56 = vadd.f32 %v6372_v37, %v891_v36  ;;  %1568 = vrot.lane.b32.xlu1 %v5051_v41, %s3597_s15  ;;  %588 = vrot.lane.b32.xlu0 %v5065_v4, %s3597_s15  ;;  %v6374_v46 = vld [vmem:[#allocation66_spill] sm:$0xff]  ;;  %v6375_v36 = vld [vmem:[#allocation117_spill] sm:$0xff]  ;;  %s5729_s28 = sld [smem:[#allocation2 + $0x68]] }
 0x17d   : > { %v2371_v54 = vrot.slane %v5216_v49, 1  ;;  %v2295_v2 = vadd.f32 %v6373_v55, %v2269_v10  ;;  %v1244_v17 = vadd.f32 %v5016_v19, %v6374_v46  ;;  %v5264_v12 = vmul.f32 %v4850_v59, %v671_v26  ;;  %v6379_v19 = vld [vmem:[#allocation51_spill] sm:$0xff]  ;;  %v6380_v55 = vld [vmem:[#allocation118_spill] sm:$0xff] }
 0x17e   : > { %v5267_v9 = vadd.f32 %v6375_v36, %v2262_v5  ;;  %v5269_v41 = vpop.permute.xlu0 %1189  ;;  %v5271_v51 = vpop.permute.xlu1 %420  ;;  %v6378_v4 = vstv %s4991_s8  ;;  %v5279_v49 = vmul.f32 %v4850_v59, %v1507_v43  ;;  %v684_v10 = vstv %s5193_s7  ;;  %v6381_v36 = vld [vmem:[#allocation81_spill] sm:$0xff]  ;;  %s5703_s8 = sld [smem:[#allocation2 + $0x40]] }
 0x17f   : > { %6376 = vst [vmem:[#allocation90_spill] sm:$0xff] %v5269_v41  ;;  %6377 = vst [vmem:[#allocation76_spill] sm:$0xff] %v5271_v51  ;;  %v5276_v23 = vmul.f32 %v4758_v57, %v6378_v4  ;;  %v2345_v37 = vadd.f32 %v6379_v19, %v5125_v62  ;;  %v2374_v26 = vsel %vm752_vm0, %v2371_v54, %v2373_v53  ;;  %v6382_v51 = vld [vmem:[#allocation44_spill] sm:$0xff]  ;;  %v6383_v4 = vld [vmem:[#allocation57_spill] sm:$0xff]  ;;  %s5736_s7 = sld [smem:[#allocation2 + $0x64]] }
 0x180   : > { %v5286_v5 = vadd.f32 %v6380_v55, %v955_v58  ;;  %v5289_v46 = vmul.f32 %v4850_v59, %v730_v18  ;;  %v2104_v41 = vadd.f32 %v6382_v51, %v6381_v36  ;;  %v6384_v57 = vld [vmem:[#allocation45_spill] sm:$0xff]  ;;  %v2379_v43 = vadd.f32 %v2374_v26, %v2294_v48  ;;  %649 = vrot.lane.b32.xlu1 %v5098_v27, %s3597_s15  ;;  %v6386_v58 = vld [vmem:[#allocation68_spill] sm:$0xff]  ;;  %v6388_v26 = vld [vmem:[#allocation47_spill] sm:$0xff] }
 0x181   : > { %v1024_v25 = vadd.f32 %v6384_v57, %v6383_v4  ;;  %1570 = vrot.lane.b32.xlu0 %v5112_v6, %s3597_s15  ;;  %v2380_v62 = vadd.f32 %v2373_v53, %v2295_v2  ;;  %v1322_v19 = vadd.f32 %v6386_v58, %v1244_v17  ;;  %v5304_v18 = vmul.f32 %v4850_v59, %v684_v10  ;;  %v6387_v57 = vld [vmem:[#allocation46_spill] sm:$0xff]  ;;  %v6389_v27 = vld [vmem:[#allocation48_spill] sm:$0xff]  ;;  %v6390_v6 = vld [vmem:[#allocation49_spill] sm:$0xff] }
 0x182   : > { %v5307_v51 = vmul.f32 %v4875_v3, %v684_v10  ;;  %v905_v48 = vadd.f32 %v6387_v57, %v5028_v29  ;;  %v2189_v55 = vadd.f32 %v6388_v26, %v5031_v52  ;;  %v2260_v36 = vadd.f32 %v6389_v27, %v5074_v15  ;;  %v5317_v2 = vpop.permute.xlu0 %1254  ;;  %v1340_v17 = vpop.permute.xlu1 %1339  ;;  %v6391_v4 = vld [vmem:[#allocation50_spill] sm:$0xff]  ;;  %v6392_v59 = vld [vmem:[#allocation55_spill] sm:$0xff] }
 0x183   : > { %v980_v53 = vadd.f32 %v6390_v6, %v5077_v0  ;;  %v1044_v10 = vadd.f32 %v6391_v4, %v5122_v42  ;;  %v2370_v58 = vrot.slane %v2345_v37, 1  ;;  %v1045_v3 = vadd.f32 %v6392_v59, %v5150_v50  ;;  %v6393_v52 = vld [vmem:[#allocation63_spill] sm:$0xff]  ;;  %v6395_v37 = vld [vmem:[#allocation120_spill] sm:$0xff] }
 0x184   : > { %v5323_v29 = vadd.f32 %v1340_v17, %v1322_v19  ;;  %v1114_v57 = vadd.f32 %v6393_v52, %v5174_v45  ;;  %v2382_v15 = vadd.f32 %v2379_v43, %v5244_v33  ;;  %v6394_v26 = vld [vmem:[#allocation119_spill] sm:$0xff]  ;;  %1410 = vrot.lane.b32.xlu1 %v5137_v28, %s3597_s15  ;;  %v2383_v42 = vadd.f32 %v2380_v62, %v5244_v33  ;;  %v6397_v6 = vld [vmem:[#allocation72_spill] sm:$0xff]  ;;  %v6398_v43 = vld [vmem:[#allocation121_spill] sm:$0xff] }
 0x185   : > { %v2170_v27 = vadd.f32 %v6394_v26, %v2104_v41  ;;  %718 = vrot.lane.b32.xlu0 %v5141_v11, %s3597_s15  ;;  %v1086_v59 = vadd.f32 %v6395_v37, %v1024_v25  ;;  %v6396_v50 = vld [vmem:[#allocation67_spill] sm:$0xff]  ;;  %v465_v45 = vadd.f32 %v5081_v16, %v6397_v6  ;;  %v5341_v17 = vadd.f32 %v6398_v43, %v905_v48  ;;  %v6399_v41 = vld [vmem:[#allocation124_spill] sm:$0xff]  ;;  %v6400_v28 = vld [vmem:[#allocation125_spill] sm:$0xff] }
 0x186   : > { %v464_v19 = vadd.f32 %v5014_v38, %v6396_v50  ;;  %v2267_v4 = vadd.f32 %v6399_v41, %v2189_v55  ;;  %v2326_v52 = vadd.f32 %v6400_v28, %v2260_v36  ;;  %v6401_v26 = vld [vmem:[#allocation126_spill] sm:$0xff]  ;;  %v5346_v0 = vpop.permute.xlu0 %475  ;;  %v5348_v62 = vpop.permute.xlu1 %477  ;;  %v2372_v38 = vsel %vm752_vm0, %v2370_v58, %v2371_v54  ;;  %v6403_v16 = vld [vmem:[#allocation127_spill] sm:$0xff]  ;;  %v6404_v48 = vld [vmem:[#allocation128_spill] sm:$0xff] }
 0x187   : > { %v1050_v11 = vadd.f32 %v6401_v26, %v980_v53  ;;  %v6402_v25 = vld [vmem:[#allocation54_spill] sm:$0xff]  ;;  %v5356_v50 = vadd.f32 %v6403_v16, %v1045_v3  ;;  %v5359_v6 = vadd.f32 %v6404_v48, %v1044_v10  ;;  %v1140_v53 = vrot.slane %v1114_v57, 1  ;;  %v6406_v41 = vld [vmem:[#allocation75_spill] sm:$0xff] }
 0x188   : > { %v5352_v37 = vadd.f32 %v6402_v25, %v5129_v31  ;;  %v6405_v55 = vld [vmem:[#allocation62_spill] sm:$0xff]  ;;  %v2388_v43 = vmul.f32 -0.4, %v2382_v15  ;;  %v2210_v28 = vadd.f32 %v6406_v41, %v5206_v21  ;;  %603 = vrot.lane.b32.xlu1 %v5155_v40, %s3597_s15  ;;  %vm2385_vm1 = vcmp.gt.f32.partialorder %v2382_v15, 0.0  ;;  %v6407_v31 = vld [vmem:[#allocation73_spill] sm:$0xff]  ;;  %v6408_v10 = vld [vmem:[#allocation15_spill] sm:$0xff] }
 0x189   : > { %v2209_v36 = vadd.f32 %v6405_v55, %v5161_v1  ;;  %1495 = vrot.lane.b32.xlu0 %v5171_v32, %s3597_s15  ;;  %v2389_v3 = vmul.f32 -0.4, %v2383_v42  ;;  %v526_v54 = vadd.f32 %v6407_v31, %v464_v19  ;;  %v527_v58 = vadd.f32 %v6408_v10, %v465_v45  ;;  %v6409_v26 = vld [vmem:[#allocation87_spill] sm:$0xff]  ;;  %v6412_v32 = vld [vmem:[#allocation100_spill] sm:$0xff]  ;;  %v6413_v41 = vld [vmem:[#allocation130_spill] sm:$0xff] }
 0x18a   : > { %v904_v1 = vadd.f32 %v6409_v26, %v5228_v47  ;;  %vm2386_vm2 = vcmp.gt.f32.partialorder %v2383_v42, 0.0  ;;  %v6410_v57 = vld [vmem:[#allocation99_spill] sm:$0xff]  ;;  %v545_v16 = vpop.permute.xlu0 %544  ;;  %v547_v48 = vpop.permute.xlu1 %546  ;;  %v979_v55 = vadd.f32 %v6412_v32, %v5251_v56  ;;  %v2293_v19 = vadd.f32 %v6413_v41, %v2267_v4 }
 0x18b   : > { %v5375_v25 = vadd.f32 %v6410_v57, %v5248_v7  ;;  %v6411_v21 = vld [vmem:[#allocation111_spill] sm:$0xff]  ;;  %v5382_v31 = vadd.f32 %v545_v16, %v526_v54  ;;  %v5384_v45 = vadd.f32 %v547_v48, %v527_v58  ;;  %v1138_v47 = vrot.slane %v5352_v37, 1  ;;  %v6415_v7 = vld [vmem:[#allocation132_spill] sm:$0xff]  ;;  %v6418_v37 = vld [vmem:[#allocation77_spill] sm:$0xff] }
 0x18c   : > { %v2366_v40 = vadd.f32 %v6411_v21, %v5267_v9  ;;  %v6414_v10 = vld [vmem:[#allocation123_spill] sm:$0xff]  ;;  %v2275_v57 = vadd.f32 %v6415_v7, %v2209_v36  ;;  %1566 = vrot.lane.b32.xlu1 %v5181_v39, %s3597_s15  ;;  %v5394_v56 = vsel %vm2385_vm1, %v2382_v15, %v2388_v43  ;;  %v6416_v9 = vld [vmem:[#allocation110_spill] sm:$0xff]  ;;  %v5403_v36 = vsel %vm2386_vm2, %v2383_v42, %v2389_v3  ;;  %v6420_v48 = vld [vmem:[#allocation133_spill] sm:$0xff] }
 0x18d   : > { %v1112_v26 = vadd.f32 %v6414_v10, %v1086_v59  ;;  %678 = vrot.lane.b32.xlu0 %v5190_v22, %s3597_s15  ;;  %v1043_v4 = vadd.f32 %v6416_v9, %v5286_v5  ;;  %v6417_v54 = vld [vmem:[#allocation83_spill] sm:$0xff]  ;;  %v1200_v59 = vadd.f32 %v5133_v14, %v6418_v37  ;;  %v1141_v39 = vsel %vm752_vm0, %v1138_v47, %v1140_v53  ;;  %v6422_v42 = vld [vmem:[#allocation122_spill] sm:$0xff]  ;;  %v6423_v7 = vld [vmem:[#allocation137_spill] sm:$0xff] }
 0x18e   : > { %v1199_v58 = vadd.f32 %v5079_v24, %v6417_v54  ;;  %v2571_v21 = vrot.slane %v2366_v40, 1  ;;  %v6419_v16 = vld [vmem:[#allocation131_spill] sm:$0xff]  ;;  %v966_v15 = vadd.f32 %v6420_v48, %v904_v1  ;;  %v5408_v43 = vpop.permute.xlu0 %1210  ;;  %v5410_v32 = vpop.permute.xlu1 %1212  ;;  %v2569_v5 = vrot.slane %v5375_v25, 1  ;;  %v6424_v1 = vld [vmem:[#allocation138_spill] sm:$0xff]  ;;  %v6427_v37 = vld [vmem:[#allocation16_spill] sm:$0xff] }
 0x18f   : > { %v2276_v22 = vadd.f32 %v6419_v16, %v2210_v28  ;;  %v2378_v24 = vadd.f32 %v2372_v38, %v2293_v19  ;;  %v6421_v41 = vld [vmem:[#allocation135_spill] sm:$0xff]  ;;  %v2397_v14 = vrot.slane %v5394_v56, 1  ;;  %v2208_v3 = vadd.f32 %v6422_v42, %v2170_v27  ;;  %v6426_v19 = vld [vmem:[#allocation78_spill] sm:$0xff] }
 0x190   : > { %v1049_v10 = vadd.f32 %v6421_v41, %v979_v55  ;;  %v1137_v40 = vrot.slane %v1112_v26, 1  ;;  %v1068_v53 = vadd.f32 %v6423_v7, %v1050_v11  ;;  %741 = vrot.lane.b32.xlu1 %v5220_v44, %s3597_s15  ;;  %v2399_v28 = vrot.slane %v5403_v36, 1  ;;  %v6425_v38 = vld [vmem:[#allocation95_spill] sm:$0xff]  ;;  %v6428_v26 = vld [vmem:[#allocation136_spill] sm:$0xff] }
 0x191   : > { %739 = vrot.lane.b32.xlu0 %v5223_v35, %s3597_s15  ;;  %v1093_v9 = vadd.f32 %v6424_v1, %v1043_v4  ;;  %v1264_v55 = vadd.f32 %v5131_v61, %v6425_v38  ;;  %v1271_v54 = vadd.f32 %v6426_v19, %v1199_v58  ;;  %v1272_v27 = vadd.f32 %v6427_v37, %v1200_v59  ;;  %v6429_v11 = vld [vmem:[#allocation52_spill] sm:$0xff]  ;;  %v6431_v4 = vld [vmem:[#allocation129_spill] sm:$0xff]  ;;  %v6432_v38 = vld [vmem:[#allocation139_spill] sm:$0xff] }
 0x192   : > { %v2364_v16 = vadd.f32 %v6428_v26, %v2326_v52  ;;  %v2314_v48 = vadd.f32 %v6429_v11, %v2276_v22  ;;  %v2572_v44 = vsel %vm752_vm0, %v2569_v5, %v2571_v21  ;;  %v6430_v35 = vld [vmem:[#allocation8_spill] sm:$0xff]  ;;  %v1290_v42 = vpop.permute.xlu0 %1289  ;;  %v1292_v7 = vpop.permute.xlu1 %1291  ;;  %v993_v1 = vadd.f32 %v6431_v4, %v5341_v17  ;;  %v5449_v17 = vld [vmem:[%s6060_s3 + $0x10] sm:$0xff] }
 0x193   : > { %v2313_v41 = vadd.f32 %v6430_v35, %v2275_v57  ;;  %v2381_v61 = vadd.f32 %v2378_v24, %v5244_v33  ;;  %v5436_v58 = vadd.f32 %v1290_v42, %v1271_v54  ;;  %v5438_v59 = vadd.f32 %v1292_v7, %v1272_v27  ;;  %6433 = vst [vmem:[#allocation23_spill] sm:$0xff] %v5449_v17  ;;  %v6434_v57 = vld [vmem:[#allocation64_spill] sm:$0xff]  ;;  %v6438_v27 = vld [vmem:[#allocation65_spill] sm:$0xff] }
 0x194   : > { %v1145_v52 = vadd.f32 %v1141_v39, %v1068_v53  ;;  %v1139_v22 = vsel %vm752_vm0, %v1137_v40, %v1138_v47  ;;  %v2274_v19 = vadd.f32 %v6432_v38, %v2208_v3  ;;  %1518 = vrot.lane.b32.xlu1 %v5234_v63, %s3597_s15  ;;  %v1133_v24 = vadd.f32 %v6434_v57, %v5356_v50  ;;  %v6435_v39 = vld [vmem:[#allocation60_spill] sm:$0xff]  ;;  %v6436_v40 = vld [vmem:[#allocation17_spill] sm:$0xff]  ;;  %v6439_v50 = vld [vmem:[#allocation10_spill] sm:$0xff] }
 0x195   : > { %1516 = vrot.lane.b32.xlu0 %v5241_v20, %s3597_s15  ;;  %v1132_v47 = vadd.f32 %v6435_v39, %v5359_v6  ;;  %v1265_v3 = vadd.f32 %v5187_v13, %v6436_v40  ;;  %v6437_v53 = vld [vmem:[#allocation84_spill] sm:$0xff]  ;;  %3415 = vmatprep.mubr.msk.f32.mxu0 %vm1614_vm3, %v5449_v17  ;;  %v2568_v20 = vrot.slane %v2364_v16, 1  ;;  %v2578_v54 = vadd.f32 %v2571_v21, %v2314_v48  ;;  %v6442_v16 = vld [vmem:[#allocation59_spill] sm:$0xff]  ;;  %v6443_v48 = vld [vmem:[#allocation70_spill] sm:$0xff] }
 0x196   : > { %v1330_v63 = vadd.f32 %v6437_v53, %v1264_v55  ;;  %v2577_v37 = vadd.f32 %v2572_v44, %v2313_v41  ;;  %v1067_v26 = vadd.f32 %v6438_v27, %v1049_v10  ;;  %v1361_v11 = vpop.permute.xlu1 %1360  ;;  %v5461_v35 = vpop.permute.xlu0 %418  ;;  %vm2384_vm4 = vcmp.gt.f32.partialorder %v2381_v61, 0.0  ;;  %v6440_v6 = vld [vmem:[#allocation140_spill] sm:$0xff]  ;;  %v6446_v40 = vld [vmem:[#allocation13_spill] sm:$0xff] }
 0x197   : > { %v1131_v42 = vadd.f32 %v6439_v50, %v1093_v9  ;;  %v1055_v7 = vadd.f32 %v6440_v6, %v993_v1  ;;  %v5470_v13 = vld [vmem:[%s6060_s3] sm:$0xff]  ;;  %v2387_v55 = vmul.f32 -0.4, %v2381_v61  ;;  %v1147_v21 = vadd.f32 %v1145_v52, %v5244_v33  ;;  %v6444_v1 = vld [vmem:[#allocation19_spill] sm:$0xff]  ;;  %v6447_v27 = vld [vmem:[#allocation9_spill] sm:$0xff] }
 0x198   : > { %v5465_v4 = vadd.f32 %v1361_v11, %v1330_v63  ;;  %6441 = vst [vmem:[#allocation82_spill] sm:$0xff] %v5470_v13  ;;  %v992_v10 = vadd.f32 %v6442_v16, %v966_v15  ;;  %v2312_v44 = vadd.f32 %v6443_v48, %v2274_v19  ;;  %676 = vrot.lane.b32.xlu1 %v5264_v12, %s3597_s15  ;;  %v1160_v9 = vrot.slane %v1133_v24, 1  ;;  %v6445_v57 = vld [vmem:[#allocation92_spill] sm:$0xff]  ;;  %v6450_v50 = vld [vmem:[#allocation58_spill] sm:$0xff] }
 0x199   : > { %601 = vrot.lane.b32.xlu0 %v5276_v23, %s3597_s15  ;;  %v1158_v41 = vrot.slane %v1132_v47, 1  ;;  %v1427_v38 = vadd.f32 %v6444_v1, %v5198_v34  ;;  %v1331_v39 = vadd.f32 %v6445_v57, %v1265_v3  ;;  %3422 = vmatprep.mubr.msk.f32.mxu1 %vm1614_vm3, %v5470_v13  ;;  %v2581_v15 = vadd.f32 %v2578_v54, %v5296_v8  ;;  %v6449_v54 = vld [vmem:[#allocation69_spill] sm:$0xff]  ;;  %v5525_v48 = vld [vmem:[%s3681_s13 + $0x20] sm:$0xff]  ;;  %v6453_v1 = vld [vmem:[#allocation90_spill] sm:$0xff] }
 0x19a   : > { %v2580_v52 = vadd.f32 %v2577_v37, %v5296_v8  ;;  %v1144_v19 = vadd.f32 %v1139_v22, %v1067_v26  ;;  %v2570_v12 = vsel %vm752_vm0, %v2568_v20, %v2569_v5  ;;  %v1446_v23 = vpop.permute.xlu1 %1445  ;;  %v1363_v24 = vpop.permute.xlu0 %1362  ;;  %v1157_v47 = vrot.slane %v1131_v42, 1  ;;  %v6448_v22 = vld [vmem:[#allocation18_spill] sm:$0xff]  ;;  %v6454_v57 = vld [vmem:[#allocation20_spill] sm:$0xff] }
 0x19b   : > { %v1081_v53 = vadd.f32 %v6446_v40, %v1055_v7  ;;  %v5492_v34 = vadd.f32 %v1446_v23, %v1427_v38  ;;  %v5494_v3 = vadd.f32 %v1363_v24, %v1331_v39  ;;  %v2576_v63 = vadd.f32 %v2570_v12, %v2312_v44  ;;  %v6456_v12 = vld [vmem:[#allocation112_spill] sm:$0xff] }
 0x19c   : > { %v1054_v11 = vadd.f32 %v6447_v27, %v992_v10  ;;  %1514 = vrot.lane.b32.xlu1 %v5279_v49, %s3597_s15  ;;  %vm1149_vm5 = vcmp.gt.f32.partialorder %v1147_v21, 0.0  ;;  %v2390_v25 = vsel %vm2384_vm4, %v2381_v61, %v2387_v55  ;;  %v1161_v5 = vsel %vm752_vm0, %v1158_v41, %v1160_v9 }
 0x19d   : > { %737 = vrot.lane.b32.xlu0 %v5289_v46, %s3597_s15  ;;  %v463_v20 = vadd.f32 %v5231_v30, %v6448_v22  ;;  %v1428_v37 = vadd.f32 %v6449_v54, %v5238_v60  ;;  %v1151_v26 = vmul.f32 -0.4, %v1147_v21  ;;  %v2587_v49 = vmul.f32 -0.4, %v2581_v15  ;;  %v5555_v22 = vld [vmem:[%s3681_s13 + $0x8] sm:$0xff] }
 0x19e   : > { %vm2583_vm6 = vcmp.gt.f32.partialorder %v2580_v52, 0.0  ;;  %v2586_v46 = vmul.f32 -0.4, %v2580_v52  ;;  %v1080_v42 = vadd.f32 %v6450_v50, %v1054_v11  ;;  %v5510_v61 = vpop.permute.xlu1 %473  ;;  %v1448_v6 = vpop.permute.xlu0 %1447  ;;  %v1146_v7 = vadd.f32 %v1144_v19, %v5244_v33  ;;  %v6455_v19 = vld [vmem:[#allocation79_spill] sm:$0xff] }
 0x19f   : > { %v1159_v55 = vsel %vm752_vm0, %v1157_v47, %v1158_v41  ;;  %v1165_v16 = vadd.f32 %v1161_v5, %v1081_v53  ;;  %v5514_v30 = vadd.f32 %v1448_v6, %v1428_v37  ;;  %vm2584_vm7 = vcmp.gt.f32.partialorder %v2581_v15, 0.0  ;;  %v6452_v41 = vld [vmem:[#allocation85_spill] sm:$0xff] }
 0x1a0   : > { %v2579_v60 = vadd.f32 %v2576_v63, %v5296_v8  ;;  %v5518_v10 = vstv %s5475_s22  ;;  %689 = vrot.lane.b32.xlu1 %v5304_v18, %s3597_s15  ;;  %v6451_v44 = vstv %s5257_s14  ;;  %v1198_v38 = vadd.f32 %v6453_v1, %v6452_v41  ;;  %v6459_v37 = vld [vmem:[#allocation21_spill] sm:$0xff] }
 0x1a1   : > { %691 = vrot.lane.b32.xlu0 %v5307_v51, %s3597_s15  ;;  %v487_v9 = vmul.f32 %v5525_v48, %v6451_v44  ;;  %v525_v39 = vadd.f32 %v6454_v57, %v463_v20  ;;  %v2400_v18 = vsel %vm752_vm0, %v2397_v14, %v2399_v28  ;;  %v1326_v51 = vmul.f32 %v6456_v12, %v6455_v19  ;;  %v6462_v44 = vld [vmem:[#allocation53_spill] sm:$0xff] }
 0x1a2   : > { %v1164_v23 = vadd.f32 %v1159_v55, %v1080_v42  ;;  %v5544_v24 = vpop.permute.xlu1 %1208  ;;  %v543_v47 = vpop.permute.xlu0 %542  ;;  %v1153_v40 = vsel %vm1149_vm5, %v1147_v21, %v1151_v26  ;;  %v2396_v36 = vrot.slane %v2390_v25, 1  ;;  %v5548_v53 = vsel %vm2583_vm6, %v2580_v52, %v2586_v46  ;;  %v6457_v52 = vld [vmem:[#allocation71_spill] sm:$0xff]  ;;  %v6458_v25 = vld [vmem:[#allocation76_spill] sm:$0xff]  ;;  %v6460_v26 = vld [vmem:[#allocation89_spill] sm:$0xff] }
 0x1a3   : > { %v1167_v28 = vadd.f32 %v1165_v16, %v5296_v8  ;;  %v5551_v63 = vadd.f32 %v543_v47, %v525_v39  ;;  %v1150_v27 = vmul.f32 -0.4, %v1146_v7  ;;  %v2590_v11 = vsel %vm2584_vm7, %v2581_v15, %v2587_v49  ;;  %v6461_v16 = vld [vmem:[#allocation80_spill] sm:$0xff]  ;;  %v6463_v39 = vld [vmem:[#allocation61_spill] sm:$0xff] }
 0x1a4   : > { %v2585_v5 = vmul.f32 -0.4, %v2579_v60  ;;  %v445_v20 = vmul.f32 %v5555_v22, %v5518_v10  ;;  %2486 = vrot.lane.b32.xlu1 %v1153_v40, %s3597_s15  ;;  %vm1148_vm8 = vcmp.gt.f32.partialorder %v1146_v7, 0.0  ;;  %v5562_v21 = vstv %s5502_s23 }
 0x1a5   : > { %2403 = vrot.lane.b32.xlu0 %v2400_v18, %s3597_s15  ;;  %vm2582_vm9 = vcmp.gt.f32.partialorder %v2579_v60, 0.0  ;;  %v425_v54 = vadd.f32 %v6458_v25, %v6457_v52  ;;  %v1263_v15 = vadd.f32 %v5317_v2, %v6459_v37  ;;  %v1270_v49 = vadd.f32 %v6460_v26, %v1198_v38 }
 0x1a6   : > { %v1166_v46 = vadd.f32 %v1164_v23, %v5296_v8  ;;  %v5570_v50 = vpop.permute.xlu1 %433  ;;  %v1288_v42 = vpop.permute.xlu0 %1287  ;;  %v2595_v6 = vrot.slane %v5548_v53, 1  ;;  %v2597_v55 = vrot.slane %v2590_v11, 1  ;;  %v1423_v41 = vmul.f32 %v6462_v44, %v6461_v16 }
 0x1a7   : > { %v5577_v1 = vadd.f32 %v1288_v42, %v1270_v49  ;;  %v1152_v2 = vsel %vm1148_vm8, %v1146_v7, %v1150_v27  ;;  %v2398_v38 = vsel %vm752_vm0, %v2396_v36, %v2397_v14  ;;  %v1171_v57 = vmul.f32 -0.4, %v1167_v28 }
 0x1a8   : > { %v446_v18 = vmul.f32 %v6463_v39, %v5518_v10  ;;  %2484 = vrot.lane.b32.xlu1 %v1152_v2, %s3597_s15  ;;  %vm1169_vm10 = vcmp.gt.f32.partialorder %v1167_v28, 0.0  ;;  %v530_v19 = vmul.f32 %v5525_v48, %v5562_v21  ;;  %v2588_v12 = vsel %vm2582_vm9, %v2579_v60, %v2585_v5  ;;  %v5624_v2 = vld [vmem:[%s3681_s13 + $0x40] sm:$0x3] }
 0x1a9   : > { %2401 = vrot.lane.b32.xlu0 %v2398_v38, %s3597_s15  ;;  %v483_v7 = vadd.f32 %v5346_v0, %v445_v20  ;;  %v1329_v23 = vadd.f32 %v1326_v51, %v1263_v15  ;;  %v489_v56 = vadd.f32 %v487_v9, %v425_v54  ;;  %v5591_v14 = vstv %s5540_s24  ;;  %v6464_v0 = vld [vmem:[#allocation134_spill] sm:$0xff]  ;;  %v3540_v51 = vld [vmem:[%s3681_s13 + $0x28] sm:$0x3] }
 0x1aa   : > { %v5594_v47 = vstv %s5542_s25  ;;  %v1359_v40 = vpop.permute.xlu1 %1358  ;;  %v503_v36 = vpop.permute.xlu0 %502  ;;  %v2598_v53 = vsel %vm752_vm0, %v2595_v6, %v2597_v55  ;;  %v1170_v27 = vmul.f32 -0.4, %v1166_v46  ;;  %v1173_v60 = vsel %vm1169_vm10, %v1167_v28, %v1171_v57 }
 0x1ab   : > { %v5597_v11 = vadd.f32 %v1359_v40, %v1329_v23  ;;  %v5599_v52 = vadd.f32 %v503_v36, %v489_v56  ;;  %v2594_v5 = vrot.slane %v2588_v12, 1  ;;  %vm1168_vm11 = vcmp.gt.f32.partialorder %v1166_v46, 0.0 }
 0x1ac   : > { %2684 = vrot.lane.b32.xlu1 %v1173_v60, %s3597_s15  ;;  %v611_v9 = vmul.f32 %v6464_v0, %v5591_v14  ;;  %v531_v20 = vmul.f32 %v3540_v51, %v5562_v21  ;;  %v484_v25 = vadd.f32 %v5348_v62, %v446_v18  ;;  %v1180_v54 = vmul.f32 %v5555_v22, %v5594_v47 }
 0x1ad   : > { %2601 = vrot.lane.b32.xlu0 %v2598_v53, %s3597_s15  ;;  %v533_v37 = vadd.f32 %v530_v19, %v483_v7  ;;  %v1426_v28 = vadd.f32 %v1423_v41, %v5323_v29  ;;  %v5612_v49 = vstv %s5575_s26  ;;  %v1172_v16 = vsel %vm1168_vm11, %v1166_v46, %v1170_v27  ;;  %v5644_v53 = vld [vmem:[%s3681_s13] sm:$0xff] }
 0x1ae   : > { %v564_v15 = vpop.permute.xlu1 %563  ;;  %v1444_v26 = vpop.permute.xlu0 %1443  ;;  %v2596_v44 = vsel %vm752_vm0, %v2594_v5, %v2595_v6  ;;  %v1181_v62 = vmul.f32 %v6463_v39, %v5594_v47  ;;  %v612_v29 = vmul.f32 %v5624_v2, %v5591_v14  ;;  %v1218_v41 = vadd.f32 %v5408_v43, %v1180_v54 }
 0x1af   : > { %v5614_v42 = vadd.f32 %v564_v15, %v533_v37  ;;  %v5616_v55 = vadd.f32 %v1444_v26, %v1426_v28  ;;  %v614_v38 = vadd.f32 %v611_v9, %v5382_v31  ;;  %v534_v46 = vadd.f32 %v531_v20, %v484_v25 }
 0x1b0   : > { %2682 = vrot.lane.b32.xlu1 %v1172_v16, %s3597_s15  ;;  %v1275_v6 = vmul.f32 %v5525_v48, %v5612_v49  ;;  %v1219_v12 = vadd.f32 %v5410_v32, %v1181_v62  ;;  %v615_v43 = vadd.f32 %v612_v29, %v5384_v45  ;;  %v1276_v31 = vmul.f32 %v3540_v51, %v5612_v49  ;;  %v5653_v51 = vld [vmem:[%s3681_s13 + $0x18] sm:$0xff]  ;;  %v6469_v62 = vld [vmem:[#allocation56_spill] sm:$0xff] }
 0x1b1   : > { %2599 = vrot.lane.b32.xlu0 %v2596_v44, %s3597_s15  ;;  %s3248_s15 = sld [smem:[#allocation2 + $0x3c]]  ;;  %v6465_v27 = vstv %s4941_s6  ;;  %v6467_v20 = vstv %s5257_s14 }
 0x1b2   : > { %v633_v57 = vpop.permute.xlu1 %632  ;;  %v566_v39 = vpop.permute.xlu0 %565  ;;  %v1278_v7 = vadd.f32 %v1275_v6, %v1218_v41  ;;  %v408_v60 = vmul.f32 %v5644_v53, %v6465_v27  ;;  %v1279_v32 = vadd.f32 %v1276_v31, %v1219_v12  ;;  %v486_v25 = vmul.f32 %v5653_v51, %v6467_v20  ;;  %v5668_v41 = vld [vmem:[%s3681_s13 + $0x58] sm:$0x3]  ;;  %s3296_s6 = sld [smem:[#allocation2 + $0x6c]] }
 0x1b3   : > { %v5632_v18 = vadd.f32 %v633_v57, %v614_v38  ;;  %v5634_v19 = vadd.f32 %v566_v39, %v534_v46  ;;  %s5801_s14 = sld [smem:[#allocation2 + $0x30]] }
 0x1b4   : > { %v424_v45 = vadd.f32 %v5461_v35, %v408_v60 }
 0x1b6   : > { %v1309_v23 = vpop.permute.xlu1 %1308  ;;  %v635_v56 = vpop.permute.xlu0 %634  ;;  %v488_v15 = vadd.f32 %v486_v25, %v424_v45  ;;  %v1370_v25 = vstv %s3224_s27 }
 0x1b7   : > { %v5639_v40 = vadd.f32 %v1309_v23, %v1278_v7  ;;  %v5641_v36 = vadd.f32 %v635_v56, %v615_v43  ;;  %v1526_v28 = vstv %s3248_s15  ;;  %v1373_v13 = vmul.f32 %v5624_v2, %v1370_v25 }
 0x1b8   : > { %v1528_v29 = vmul.f32 %v6469_v62, %v1526_v28  ;;  %v1529_v35 = vmul.f32 %v5668_v41, %v1526_v28 }
 0x1ba   : > { %v1394_v5 = vpop.permute.xlu1 %1393  ;;  %v1311_v0 = vpop.permute.xlu0 %1310  ;;  %v1531_v6 = vadd.f32 %v1528_v29, %v5492_v34  ;;  %v1532_v39 = vadd.f32 %v1529_v35, %v5514_v30 }
 0x1bb   : > { %v5649_v9 = vadd.f32 %v1311_v0, %v1279_v32  ;;  %v6472_v32 = vld [vmem:[#allocation11_spill] sm:$0xff] }
 0x1bc   : > { %v1527_v0 = vmul.f32 %v6472_v32, %v1526_v28 }
 0x1bd   : > { %6466 = vst [vmem:[#allocation91_spill] sm:$0xff] %v5649_v9 }
 0x1be   : > { %v5658_v54 = vpop.permute.xlu1 %431  ;;  %v5660_v37 = vpop.permute.xlu0 %1395 }
 0x1c2   : > { %v5662_v26 = vpop.permute.xlu1 %1464  ;;  %v501_v16 = vpop.permute.xlu0 %500 }
 0x1c3   : > { %v5664_v44 = vadd.f32 %v501_v16, %v488_v15  ;;  %v5698_v15 = vstv %s3244_s29  ;;  %v1530_v16 = vadd.f32 %v1527_v0, %v5616_v55  ;;  %v5717_v0 = vstv %s3240_s30 }
 0x1c5   : > { %6468 = vst [vmem:[#allocation93_spill] sm:$0xff] %v5664_v44 }
 0x1c6   : > { %v1550_v38 = vpop.permute.xlu1 %1549  ;;  %v5671_v46 = vpop.permute.xlu0 %1466 }
 0x1c7   : > { %v1557_v57 = vadd.f32 %v1550_v38, %v1531_v6  ;;  %v5706_v38 = vld [vmem:[%s3681_s13 + $0x38] sm:$0xff] }
 0x1c8   : > { %v1372_v28 = vmul.f32 %v5706_v38, %v1370_v25 }
 0x1c9   : > { %v1582_v31 = vrot.slane %v1557_v57, 1  ;;  %v699_v57 = vmul.f32 %v6469_v62, %v5698_v15 }
 0x1ca   : > { %v5675_v12 = vpop.permute.xlu1 %561  ;;  %v1552_v7 = vpop.permute.xlu0 %1551 }
 0x1cb   : > { %v5677_v43 = vadd.f32 %v1552_v7, %v1532_v39  ;;  %v700_v7 = vmul.f32 %v5668_v41, %v5698_v15 }
 0x1cd   : > { %v6082_v23 = vrot.slane %v5677_v43, 1 }
 0x1ce   : > { %v5680_v56 = vpop.permute.xlu1 %1306  ;;  %v5682_v27 = vpop.permute.xlu0 %630 }
 0x1cf   : > { %6470 = vst [vmem:[#allocation24_spill] sm:$0xff] %v5680_v56  ;;  %v5687_v34 = vsel %vm752_vm0, %v1582_v31, %v6082_v23  ;;  %v1375_v23 = vadd.f32 %v1372_v28, %v5436_v58  ;;  %v703_v58 = vadd.f32 %v700_v7, %v5641_v36  ;;  %v1476_v28 = vmul.f32 %v6469_v62, %v5717_v0 }
 0x1d0   : > { %v1477_v36 = vmul.f32 %v5668_v41, %v5717_v0 }
 0x1d1   : > { %v1401_v8 = vadd.f32 %v1394_v5, %v1375_v23  ;;  %v410_v23 = vstv %s5703_s8  ;;  %s3362_s8 = sshll.u32 %s6499_s19, 5 }
 0x1d2   : > { %v5689_v30 = vpop.permute.xlu1 %515  ;;  %v5691_v60 = vpop.permute.xlu0 %1391 }
 0x1d3   : > { %6471 = vst [vmem:[#allocation25_spill] sm:$0xff] %v5689_v30  ;;  %v1479_v44 = vadd.f32 %v1476_v28, %v1401_v8 }
 0x1d6   : > { %v5694_v45 = vpop.permute.xlu1 %1462  ;;  %v5696_v20 = vpop.permute.xlu0 %590 }
 0x1da   : > { %v5701_v29 = vpop.permute.xlu1 %651  ;;  %v1548_v35 = vpop.permute.xlu0 %1547 }
 0x1db   : > { %v1556_v6 = vadd.f32 %v1548_v35, %v1530_v16  ;;  %v702_v16 = vadd.f32 %v699_v57, %v5632_v18  ;;  %v1376_v57 = vadd.f32 %v1373_v13, %v5438_v59  ;;  %v5751_v59 = vmul.f32 %v5644_v53, %v5518_v10 }
 0x1dc   : > { %v5755_v13 = vmul.f32 %v5644_v53, %v5594_v47  ;;  %v5770_v10 = vmul.f32 %v5653_v51, %v5612_v49  ;;  %v573_v47 = vstv %s5721_s10  ;;  %v1533_v49 = vstv %s5727_s11  ;;  %s251_s11 = scalar_lea.vmem %s6062_s5, %s3362_s8 }
 0x1dd   : > { %v1581_v39 = vrot.slane %v1556_v6, 1  ;;  %v1429_v6 = vstv %s3296_s6  ;;  %v1402_v62 = vadd.f32 %v5660_v37, %v1376_v57 }
 0x1de   : > { %v721_v55 = vpop.permute.xlu1 %720  ;;  %v5715_v32 = vpop.permute.xlu0 %653  ;;  %6475 = vst [vmem:[#allocation26_spill] sm:$0xff] %v5770_v10 }
 0x1df   : > { %v5725_v35 = vsel %vm752_vm0, %v1581_v39, %v1582_v31  ;;  %v5731_v17 = vadd.f32 %v721_v55, %v702_v16  ;;  %v1431_v39 = vmul.f32 %v5706_v38, %v1429_v6  ;;  %v1432_v55 = vmul.f32 %v5624_v2, %v1429_v6 }
 0x1e0   : > { %v490_v16 = vstv %s5711_s9  ;;  %v1480_v9 = vadd.f32 %v1477_v36, %v1402_v62  ;;  %v5806_v36 = vld [vmem:[%s3681_s13 + $0x50] sm:$0xff] }
 0x1e1   : > { %v6089_v7 = vrot.slane %v5731_v17, 1 }
 0x1e2   : > { %v5738_v18 = vpop.permute.xlu1 %1412  ;;  %v723_v31 = vpop.permute.xlu0 %722 }
 0x1e3   : > { %6473 = vst [vmem:[#allocation94_spill] sm:$0xff] %v5738_v18  ;;  %v729_v5 = vadd.f32 %v723_v31, %v703_v58  ;;  %v5759_v58 = vmul.f32 %v5653_v51, %v5562_v21  ;;  %v5762_v31 = vld [vmem:[%s3681_s13 + $0x30] sm:$0xff]  ;;  %v1435_v18 = vadd.f32 %v1432_v55, %v5494_v3  ;;  %v1535_v3 = vmul.f32 %v5806_v36, %v1533_v49 }
 0x1e4   : > { %v610_v37 = vmul.f32 %v5762_v31, %v5591_v14  ;;  %v5784_v14 = vmul.f32 %v5525_v48, %v490_v16  ;;  %v1371_v56 = vmul.f32 %v5762_v31, %v1370_v25  ;;  %v1377_v48 = vstv %s5736_s7 }
 0x1e5   : > { %v756_v30 = vrot.slane %v729_v5, 1  ;;  %v5781_v5 = vmul.f32 %v5555_v22, %v410_v23  ;;  %v5796_v22 = vmul.f32 %v5706_v38, %v573_v47  ;;  %v5840_v10 = vmul.f32 %v5762_v31, %v573_v47 }
 0x1e6   : > { %v1498_v8 = vpop.permute.xlu1 %1497  ;;  %v5766_v28 = vpop.permute.xlu0 %1414  ;;  %6477 = vst [vmem:[#allocation96_spill] sm:$0xff] %v5784_v14 }
 0x1e7   : > { %6474 = vst [vmem:[#allocation86_spill] sm:$0xff] %v5766_v28  ;;  %v1505_v57 = vadd.f32 %v1498_v8, %v1479_v44  ;;  %v5778_v21 = vsel %vm752_vm0, %v6089_v7, %v756_v30  ;;  %v1434_v28 = vadd.f32 %v1431_v39, %v5465_v4  ;;  %v616_v44 = vstv %s5729_s28 }
 0x1e8   : > { %6476 = vst [vmem:[#allocation27_spill] sm:$0xff] %v5778_v21  ;;  %v5793_v30 = vmul.f32 %v5762_v31, %v1429_v6  ;;  %v1473_v6 = vadd.f32 %v5671_v46, %v1435_v18  ;;  %v5813_v55 = vmul.f32 %v5706_v38, %v616_v44  ;;  %v5816_v62 = vmul.f32 %v5624_v2, %v616_v44 }
 0x1e9   : > { %v1590_v8 = vadd.f32 %v5687_v34, %v1505_v57  ;;  %v1472_v4 = vadd.f32 %v5662_v26, %v1434_v28  ;;  %v1536_v26 = vmul.f32 %v5668_v41, %v1533_v49  ;;  %v5825_v28 = vmul.f32 %v5706_v38, %v1377_v48 }
 0x1ea   : > { %v5799_v7 = vpop.permute.xlu1 %513  ;;  %v1500_v25 = vpop.permute.xlu0 %1499  ;;  %v6479_v46 = vrot.slane %v5677_v43, 1  ;;  %v578_v43 = vstv %s5773_s12 }
 0x1eb   : > { %6478 = vst [vmem:[#allocation97_spill] sm:$0xff] %v5799_v7  ;;  %v1593_v39 = vadd.f32 %v1590_v8, %v5244_v33  ;;  %v1506_v34 = vadd.f32 %v1500_v25, %v1480_v9  ;;  %v5822_v9 = vmul.f32 %v5644_v53, %v410_v23  ;;  %v613_v8 = vadd.f32 %v610_v37, %v5551_v63 }
 0x1ec   : > { %v5831_v25 = vmul.f32 %v5624_v2, %v1377_v48  ;;  %v5834_v7 = vmul.f32 %v5653_v51, %v490_v16  ;;  %v1538_v23 = vadd.f32 %v1535_v3, %v1472_v4  ;;  %v5845_v2 = vmul.f32 %v5762_v31, %v616_v44  ;;  %v5848_v51 = vld [vmem:[%s3681_s13 + $0x48] sm:$0xff]  ;;  %s5947_s13 = sld [smem:[#allocation2 + $0x70]] }
 0x1ed   : > { %v1599_v57 = vmul.f32 -0.4, %v1593_v39  ;;  %v1591_v18 = vadd.f32 %v6479_v46, %v1506_v34  ;;  %vm1596_vm12 = vcmp.gt.f32.partialorder %v1593_v39, 0.0  ;;  %v639_v63 = vadd.f32 %v5682_v27, %v613_v8 }
 0x1ee   : > { %v1569_v21 = vpop.permute.xlu1 %1568  ;;  %v5836_v14 = vpop.permute.xlu0 %588  ;;  %v1539_v37 = vadd.f32 %v1536_v26, %v1473_v6  ;;  %v698_v16 = vmul.f32 %v5848_v51, %v5698_v15  ;;  %v5859_v44 = vmul.f32 %v5762_v31, %v1377_v48  ;;  %v5862_v3 = vmul.f32 %v5706_v38, %v578_v43 }
 0x1ef   : > { %v1594_v53 = vadd.f32 %v1591_v18, %v5244_v33  ;;  %v5852_v46 = vadd.f32 %v1569_v21, %v1538_v23  ;;  %v5854_v47 = vsel %vm1596_vm12, %v1593_v39, %v1599_v57  ;;  %v1475_v6 = vmul.f32 %v5848_v51, %v5717_v0 }
 0x1f0   : > { %6481 = vst [vmem:[#allocation29_spill] sm:$0xff] %v5862_v3  ;;  %v661_v15 = vstv %s5801_s14  ;;  %v1374_v21 = vadd.f32 %v1371_v56, %v5577_v1  ;;  %v704_v39 = vstv %s5809_s16  ;;  %v1608_v57 = vrot.slane %v5854_v47, 1 }
 0x1f1   : > { %v1600_v34 = vmul.f32 -0.4, %v1594_v53  ;;  %vm1597_vm13 = vcmp.gt.f32.partialorder %v1594_v53, 0.0  ;;  %v1534_v23 = vmul.f32 %v5848_v51, %v1533_v49  ;;  %v5874_v48 = vstv %s5819_s17 }
 0x1f2   : > { %v5856_v4 = vpop.permute.xlu1 %649  ;;  %v1400_v38 = vadd.f32 %v5691_v60, %v1374_v21  ;;  %v1781_v3 = vrot.slane %v5852_v46, 1  ;;  %v482_v1 = vadd.f32 %v5510_v61, %v5751_v59  ;;  %v663_v49 = vmul.f32 %v5806_v36, %v661_v15 }
 0x1f3   : > { %6480 = vst [vmem:[#allocation28_spill] sm:$0xff] %v5856_v4  ;;  %v1571_v27 = vpop.permute.xlu0 %1570  ;;  %v1603_v18 = vsel %vm1597_vm13, %v1594_v53, %v1600_v34  ;;  %v701_v4 = vadd.f32 %v698_v16, %v639_v63  ;;  %v706_v34 = vmul.f32 %v5806_v36, %v704_v39  ;;  %v1433_v60 = vadd.f32 %v5793_v30, %v5597_v11 }
 0x1f4   : > { %v5868_v26 = vadd.f32 %v1571_v27, %v1539_v37  ;;  %v1610_v8 = vrot.slane %v1603_v18, 1  ;;  %v577_v63 = vadd.f32 %v5796_v22, %v5599_v52  ;;  %v707_v59 = vmul.f32 %v5668_v41, %v704_v39 }
 0x1f5   : > { %v1484_v27 = vmul.f32 %v5668_v41, %v5874_v48  ;;  %v1483_v11 = vmul.f32 %v5806_v36, %v5874_v48  ;;  %v5905_v52 = vmul.f32 %v5762_v31, %v578_v43  ;;  %v1471_v30 = vadd.f32 %v5694_v45, %v1433_v60 }
 0x1f6   : > { %v1783_v0 = vrot.slane %v5868_v26, 1  ;;  %v5881_v56 = vpop.permute.xlu1 %1410  ;;  %v1611_v37 = vsel %vm752_vm0, %v1608_v57, %v1610_v8  ;;  %v595_v22 = vadd.f32 %v5696_v20, %v577_v63  ;;  %v1478_v21 = vadd.f32 %v1475_v6, %v1400_v38  ;;  %v6486_v63 = vld [vmem:[#allocation96_spill] sm:$0xff] }
 0x1f7   : > { %v719_v53 = vpop.permute.xlu0 %718  ;;  %3411 = vmatprep.subr.mxu0 %v1611_v37  ;;  %v1217_v18 = vadd.f32 %v5544_v24, %v5755_v13  ;;  %v621_v8 = vadd.f32 %v5813_v55, %v5614_v42  ;;  %v622_v41 = vadd.f32 %v5816_v62, %v5634_v19  ;;  %v5918_v31 = vmul.f32 %v5848_v51, %v661_v15  ;;  %v6483_v15 = vld [vmem:[#allocation26_spill] sm:$0xff] }
 0x1f8   : > { %v727_v16 = vadd.f32 %v719_v53, %v701_v4  ;;  %v5897_v61 = vsel %vm752_vm0, %v1781_v3, %v1783_v0  ;;  %3412 = vmatpush3.msra.mxu0 %v1611_v37  ;;  %v438_v45 = vadd.f32 %v5570_v50, %v5781_v5  ;;  %v532_v20 = vadd.f32 %v5759_v58, %v482_v1  ;;  %v6484_v1 = vld [vmem:[#allocation94_spill] sm:$0xff] }
 0x1f9   : > { %v6482_v24 = vrot.slane %v5731_v17, 1  ;;  %v437_v42 = vadd.f32 %v5658_v54, %v5822_v9  ;;  %v659_v19 = vadd.f32 %v5701_v29, %v621_v8  ;;  %v660_v55 = vadd.f32 %v5715_v32, %v622_v41  ;;  %v6485_v9 = vld [vmem:[#allocation91_spill] sm:$0xff]  ;;  %v6490_v41 = vld [vmem:[#allocation93_spill] sm:$0xff] }
 0x1fa   : > { %v753_v4 = vrot.slane %v727_v16, 1  ;;  %v5915_v53 = vpop.permute.xlu1 %603  ;;  %v1382_v62 = vadd.f32 %v5825_v28, %v5639_v40  ;;  %v1537_v5 = vadd.f32 %v1534_v23, %v1471_v30  ;;  %v665_v58 = vadd.f32 %v663_v49, %v595_v22  ;;  %v6487_v49 = vld [vmem:[#allocation86_spill] sm:$0xff] }
 0x1fb   : > { %v1496_v37 = vpop.permute.xlu0 %1495  ;;  %v5936_v6 = vmul.f32 %v5848_v51, %v704_v39  ;;  %v570_v17 = vadd.f32 %v5675_v12, %v532_v20  ;;  %v1277_v38 = vadd.f32 %v6483_v15, %v1217_v18  ;;  %v1383_v29 = vadd.f32 %v5831_v25, %v6485_v9  ;;  %v6489_v18 = vld [vmem:[#allocation24_spill] sm:$0xff] }
 0x1fc   : > { %v1504_v43 = vadd.f32 %v1496_v37, %v1478_v21  ;;  %v5926_v13 = vsel %vm752_vm0, %v753_v4, %v6482_v24  ;;  %v1420_v54 = vadd.f32 %v6484_v1, %v1382_v62  ;;  %v494_v40 = vadd.f32 %v6486_v63, %v438_v45  ;;  %v6488_v21 = vld [vmem:[#allocation27_spill] sm:$0xff] }
 0x1fd   : > { %v1421_v39 = vadd.f32 %v6487_v49, %v1383_v29  ;;  %v493_v16 = vadd.f32 %v5834_v7, %v437_v42  ;;  %v710_v12 = vadd.f32 %v707_v59, %v660_v55  ;;  %v709_v30 = vadd.f32 %v706_v34, %v659_v19 }
 0x1fe   : > { %v1589_v50 = vadd.f32 %v5725_v35, %v1504_v43  ;;  %v1567_v32 = vpop.permute.xlu1 %1566  ;;  %v1315_v8 = vadd.f32 %v6489_v18, %v1277_v38  ;;  %v576_v37 = vadd.f32 %v5840_v10, %v6490_v41  ;;  %v620_v45 = vadd.f32 %v5845_v2, %v570_v17  ;;  %v6492_v17 = vld [vmem:[#allocation97_spill] sm:$0xff] }
 0x1ff   : > { %v679_v60 = vpop.permute.xlu0 %678  ;;  %v1575_v28 = vadd.f32 %v1567_v32, %v1537_v5  ;;  %v1486_v24 = vadd.f32 %v1483_v11, %v1420_v54  ;;  %v1487_v55 = vadd.f32 %v1484_v27, %v1421_v39  ;;  %v6491_v11 = vld [vmem:[#allocation25_spill] sm:$0xff]  ;;  %v519_v15 = vadd.f32 %v6492_v17, %v493_v16  ;;  %v6495_v16 = vld [vmem:[#allocation23_spill] sm:$0xff] }
 0x200   : > { %v1592_v35 = vadd.f32 %v1589_v50, %v5244_v33  ;;  %v683_v23 = vadd.f32 %v679_v60, %v665_v58  ;;  %v594_v19 = vadd.f32 %v5836_v14, %v576_v37  ;;  %v520_v58 = vadd.f32 %v6491_v11, %v494_v40 }
 0x201   : > { %v1780_v4 = vrot.slane %v1575_v28, 1  ;;  %v1381_v38 = vadd.f32 %v5859_v44, %v1315_v8  ;;  %v6493_v44 = vld [vmem:[#allocation28_spill] sm:$0xff]  ;;  %v666_v60 = vstv %s5947_s13  ;;  %v6494_v28 = vld [vmem:[#allocation29_spill] sm:$0xff] }
 0x202   : > { %v1598_v22 = vmul.f32 -0.4, %v1592_v35  ;;  %v761_v25 = vadd.f32 %v6488_v21, %v683_v23  ;;  %vm1595_vm14 = vcmp.gt.f32.partialorder %v1592_v35, 0.0  ;;  %v742_v20 = vpop.permute.xlu1 %741  ;;  %v658_v32 = vadd.f32 %v6493_v44, %v620_v45 }
 0x203   : > { %v740_v43 = vpop.permute.xlu0 %739  ;;  %v748_v34 = vadd.f32 %v742_v20, %v710_v12  ;;  %v1782_v50 = vsel %vm752_vm0, %v1780_v4, %v1781_v3  ;;  %v5971_v3 = vld [vmem:[%s6060_s3 + $0x18] sm:$0x3f]  ;;  %v664_v47 = vadd.f32 %v5918_v31, %v594_v19  ;;  %v1419_v63 = vadd.f32 %v5881_v56, %v1381_v38 }
 0x204   : > { %v764_v7 = vadd.f32 %v5244_v33, %v761_v25  ;;  %v5955_v59 = vadd.f32 %v740_v43, %v709_v30  ;;  %v1601_v42 = vsel %vm1595_vm14, %v1592_v35, %v1598_v22  ;;  %v582_v23 = vadd.f32 %v6494_v28, %v520_v58  ;;  %v403_v28 = vld [vmem:[%s6061_s4 + $0x8] sm:$0xff] }
 0x205   : > { %v1607_v62 = vrot.slane %v1601_v42, 1  ;;  %v777_v10 = vrot.slane %v748_v34, 1  ;;  %v581_v31 = vadd.f32 %v5905_v52, %v519_v15  ;;  %v708_v22 = vadd.f32 %v5936_v6, %v658_v32 }
 0x206   : > { %v775_v2 = vrot.slane %v5955_v59, 1  ;;  %vm766_vm15 = vcmp.gt.f32.partialorder %v764_v7, 0.0  ;;  %v768_v5 = vmul.f32 -0.4, %v764_v7  ;;  %v1519_v1 = vpop.permute.xlu1 %1518  ;;  %v608_v12 = vadd.f32 %v5915_v53, %v582_v23  ;;  %v402_v23 = vld [vmem:[%s6061_s4] sm:$0xff] }
 0x207   : > { %v1517_v14 = vpop.permute.xlu0 %1516  ;;  %v1609_v46 = vsel %vm752_vm0, %v1607_v62, %v1608_v57  ;;  %v1525_v27 = vadd.f32 %v1519_v1, %v1487_v55  ;;  %v1482_v57 = vmul.f32 %v5848_v51, %v5874_v48  ;;  %v6496_v48 = vld [vmem:[#allocation22_spill] sm:$0xff]  ;;  %v667_v4 = vmul.f32 %v5848_v51, %v666_v60 }
 0x208   : > { %v1524_v54 = vadd.f32 %v1517_v14, %v1486_v24  ;;  %3413 = vmatprep.subr.mxu0 %v1609_v46  ;;  %v770_v9 = vsel %vm766_vm15, %v764_v7, %v768_v5  ;;  %v778_v29 = vsel %vm752_vm0, %v775_v2, %v777_v10 }
 0x209   : > { %3414 = vmatpush3.msra.mxu0 %v1609_v46  ;;  %3418 = vmatprep.subr.mxu1 %v770_v9  ;;  %v1790_v40 = vadd.f32 %v1783_v0, %v1525_v27  ;;  %v1485_v18 = vadd.f32 %v1482_v57, %v1419_v63  ;;  %v6497_v27 = vld [vmem:[#allocation82_spill] sm:$0xff] }
 0x20a   : > { %v1789_v35 = vadd.f32 %v5897_v61, %v1524_v54  ;;  %3419 = vmatpush3.msra.mxu1 %v770_v9  ;;  %3416 = vmatmul.mubr.msk.f32.vlgmr.msra.gmra.mxu0 %vm1614_vm3, %v5971_v3  ;;  %v677_v49 = vpop.permute.xlu1 %676  ;;  %v668_v61 = vmul.f32 %v5806_v36, %v666_v60 }
 0x20b   : > { %v602_v39 = vpop.permute.xlu0 %601  ;;  %3429 = vmatprep.mubr.msk.f32.mxu0 %vm1614_vm3, %v6495_v16  ;;  %v1793_v56 = vadd.f32 %v1790_v40, %v6496_v48  ;;  %v682_v0 = vadd.f32 %v677_v49, %v664_v47  ;;  %v3328_v49 = vld [vmem:[%s6061_s4 + $0x10] sm:$0xff] }
 0x20c   : > { %v1792_v26 = vadd.f32 %v1789_v35, %v6496_v48  ;;  %v607_v30 = vadd.f32 %v602_v39, %v581_v31  ;;  %v670_v43 = vadd.f32 %v668_v61, %v608_v12 }
 0x20d   : > { %v1799_v21 = vmul.f32 -0.4, %v1793_v56  ;;  %v760_v52 = vadd.f32 %v5926_v13, %v682_v0  ;;  %vm1796_vm2 = vcmp.gt.f32.partialorder %v1793_v56, 0.0 }
 0x20e   : > { %v1798_v25 = vmul.f32 -0.4, %v1792_v26  ;;  %v1515_v8 = vpop.permute.xlu1 %1514  ;;  %vm1795_vm1 = vcmp.gt.f32.partialorder %v1792_v26, 0.0  ;;  %v669_v53 = vadd.f32 %v667_v4, %v607_v30 }
 0x20f   : > { %v738_v41 = vpop.permute.xlu0 %737  ;;  %v763_v37 = vadd.f32 %v5244_v33, %v760_v52  ;;  %v1523_v45 = vadd.f32 %v1515_v8, %v1485_v18  ;;  %v1802_v24 = vsel %vm1796_vm2, %v1793_v56, %v1799_v21 }
 0x210   : > { %v746_v36 = vadd.f32 %v738_v41, %v708_v22  ;;  %v1801_v20 = vsel %vm1795_vm1, %v1792_v26, %v1798_v25  ;;  %v1809_v34 = vrot.slane %v1802_v24, 1 }
 0x211   : > { %v1807_v6 = vrot.slane %v1801_v20, 1  ;;  %v1788_v7 = vadd.f32 %v1782_v50, %v1523_v45  ;;  %vm765_vm4 = vcmp.gt.f32.partialorder %v763_v37, 0.0  ;;  %v767_v19 = vmul.f32 -0.4, %v763_v37  ;;  %v398_v50 = vld [vmem:[%s6060_s3 + $0x8] sm:$0x3f] }
 0x212   : > { %v774_v51 = vrot.slane %v746_v36, 1  ;;  %v690_v42 = vpop.permute.xlu1 %689 }
 0x213   : > { %v692_v13 = vpop.permute.xlu0 %691  ;;  %v1791_v55 = vadd.f32 %v1788_v7, %v6496_v48  ;;  %v695_v62 = vadd.f32 %v690_v42, %v669_v53  ;;  %v1810_v5 = vsel %vm752_vm0, %v1807_v6, %v1809_v34  ;;  %v769_v11 = vsel %vm765_vm4, %v763_v37, %v767_v19 }
 0x214   : > { %v776_v33 = vsel %vm752_vm0, %v774_v51, %v775_v2  ;;  %v696_v10 = vadd.f32 %v692_v13, %v670_v43  ;;  %3425 = vmatprep.subr.mxu0 %v1810_v5  ;;  %3420 = vmatprep.subr.mxu1 %v769_v11 }
 0x215   : > { %v1797_v58 = vmul.f32 -0.4, %v1791_v55  ;;  %v781_v17 = vadd.f32 %v776_v33, %v695_v62  ;;  %vm1794_vm5 = vcmp.gt.f32.partialorder %v1791_v55, 0.0  ;;  %3426 = vmatpush3.msra.mxu0 %v1810_v5  ;;  %3421 = vmatpush3.msra.mxu1 %v769_v11 }
 0x216   : > { %v782_v15 = vadd.f32 %v778_v29, %v696_v10  ;;  %v2487_v38 = vpop.permute.xlu1 %2486  ;;  %3423 = vmatmul.mubr.msk.f32.vlgmr.msra.gmra.mxu1 %vm1614_vm3, %v398_v50 }
 0x217   : > { %v2404_v59 = vpop.permute.xlu0 %2403  ;;  %v784_v2 = vadd.f32 %v6496_v48, %v781_v17  ;;  %v1800_v14 = vsel %vm1794_vm5, %v1791_v55, %v1797_v58  ;;  %3436 = vmatprep.mubr.msk.f32.mxu1 %vm1614_vm3, %v6497_v27 }
 0x218   : > { %v785_v1 = vadd.f32 %v6496_v48, %v782_v15  ;;  %v1806_v46 = vrot.slane %v1800_v14, 1 }
 0x219   : > { %v788_v9 = vmul.f32 -0.4, %v784_v2  ;;  %vm786_vm7 = vcmp.gt.f32.partialorder %v784_v2, 0.0 }
 0x21a   : > { %vm787_vm6 = vcmp.gt.f32.partialorder %v785_v1, 0.0  ;;  %v789_v54 = vmul.f32 -0.4, %v785_v1  ;;  %v1808_v44 = vsel %vm752_vm0, %v1806_v46, %v1807_v6  ;;  %v2485_v47 = vpop.permute.xlu1 %2484 }
 0x21b   : > { %v2402_v29 = vpop.permute.xlu0 %2401  ;;  %3427 = vmatprep.subr.mxu0 %v1808_v44  ;;  %v790_v57 = vsel %vm786_vm7, %v784_v2, %v788_v9 }
 0x21c   : > { %v791_v32 = vsel %vm787_vm6, %v785_v1, %v789_v54  ;;  %3428 = vmatpush3.msra.mxu0 %v1808_v44 }
 0x21d   : > { %3432 = vmatprep.subr.mxu1 %v791_v32  ;;  %3439 = vmatprep.subr.mxu0 %v2404_v59 }
 0x21e   : > { %3433 = vmatpush3.msra.mxu1 %v791_v32  ;;  %3430 = vmatmul.mubr.msk.f32.vlgmr.msra.gmra.mxu0 %vm1614_vm3, %v5971_v3  ;;  %v2685_v63 = vpop.permute.xlu1 %2684 }
 0x21f   : > { %v2602_v60 = vpop.permute.xlu0 %2601  ;;  %3434 = vmatprep.subr.mxu1 %v790_v57  ;;  %3440 = vmatpush3.msra.mxu0 %v2404_v59 }
 0x220   : > { %3435 = vmatpush3.msra.mxu1 %v790_v57  ;;  %3441 = vmatprep.subr.mxu0 %v2402_v29 }
 0x221   : > { %3437 = vmatmul.mubr.msk.f32.vlgmr.msra.gmra.mxu1 %vm1614_vm3, %v398_v50  ;;  %3442 = vmatpush3.msra.mxu0 %v2402_v29 }
 0x222   : > { %3446 = vmatprep.subr.mxu1 %v2487_v38  ;;  %3443 = vmatprep.mubr.msk.f32.mxu0 %vm1614_vm3, %v6495_v16  ;;  %v2683_v35 = vpop.permute.xlu1 %2682 }
 0x223   : > { %3447 = vmatpush3.msra.mxu1 %v2487_v38  ;;  %3453 = vmatprep.subr.mxu0 %v2602_v60  ;;  %v2600_v40 = vpop.permute.xlu0 %2599 }
 0x224   : > { %3444 = vmatmul.mubr.msk.f32.vlgmr.msra.gmra.mxu0 %vm1614_vm3, %v5971_v3  ;;  %3448 = vmatprep.subr.mxu1 %v2485_v47 }
 0x225   : > { %3454 = vmatpush3.msra.mxu0 %v2602_v60  ;;  %3449 = vmatpush3.msra.mxu1 %v2485_v47 }
 0x226   : > { %3450 = vmatprep.mubr.msk.f32.mxu1 %vm1614_vm3, %v6497_v27  ;;  %3455 = vmatprep.subr.mxu0 %v2600_v40 }
 0x227   : > { %3451 = vmatmul.mubr.msk.f32.vlgmr.msra.gmra.mxu1 %vm1614_vm3, %v398_v50  ;;  %3456 = vmatpush3.msra.mxu0 %v2600_v40 }
 0x228   : > { %3460 = vmatprep.subr.mxu1 %v2685_v63  ;;  %3457 = vmatprep.mubr.msk.f32.mxu0 %vm1614_vm3, %v6495_v16 }
 0x229   : > { %3461 = vmatpush3.msra.mxu1 %v2685_v63  ;;  %3458 = vmatmul.mubr.msk.f32.vlgmr.msra.gmra.mxu0 %vm1614_vm3, %v5971_v3  ;;  %v3329_v3 = vld [vmem:[%s6061_s4 + $0x18] sm:$0xff] }
 0x22a   : > { %3462 = vmatprep.subr.mxu1 %v2683_v35  ;;  %3464 = vmatprep.mubr.msk.f32.mxu1 %vm1614_vm3, %v6497_v27 }
 0x22b   : > { %3463 = vmatpush3.msra.mxu1 %v2683_v35  ;;  %3467 = vmatprep.subr.mxu0 %v3329_v3 }
 0x22c   : > { %3465 = vmatmul.mubr.msk.f32.vlgmr.msra.gmra.mxu1 %vm1614_vm3, %v398_v50  ;;  %3474 = vmatprep.subr.mxu1 %v403_v28 }
 0x22d   : > { %3475 = vmatpush3.msra.mxu1 %v403_v28  ;;  %3468 = vmatpush3.msra.mxu0 %v3329_v3 }
 0x22e   : > { %3476 = vmatprep.subr.mxu1 %v402_v23  ;;  %3469 = vmatprep.subr.mxu0 %v3328_v49 }
 0x22f   : > { %3477 = vmatpush3.msra.mxu1 %v402_v23  ;;  %3470 = vmatpush3.msra.mxu0 %v3328_v49 }
 0x230   : > { %3488 = vmatprep.subr.mxu1 %v403_v28  ;;  %3481 = vmatprep.subr.mxu0 %v3329_v3 }
 0x2ca   : > { %v3417_v39 = vpop.f32.mrf.mxu0 }
 0x2cc   : > { %v1687_v16 = vpop.f32.mrf.mxu0 }
 0x2d6   : > { %v3424_v31 = vpop.f32.mrf.mxu1 }
 0x2d7   : > { %v1774_v48 = vadd.f32 %v3424_v31, %v3417_v39 }
 0x2d8   : > { %v1768_v56 = vpop.f32.mrf.mxu1 }
 0x2d9   : > { %v1769_v26 = vadd.f32 %v1768_v56, %v1687_v16 }
 0x2db   : > { %3478 = vmatprep.mubr.msk.f32.mxu1 %vm1614_vm3, %v1769_v26 }
 0x2dc   : > { %3479 = vmatmul.mubr.msk.f32.vlgmr.msra.gmra.mxu1 %vm1614_vm3, %v1774_v48 }
 0x2dd   : > { %3489 = vmatpush3.msra.mxu1 %v403_v28 }
 0x2de   : > { %v3431_v0 = vpop.f32.mrf.mxu0  ;;  %3490 = vmatprep.subr.mxu1 %v402_v23 }
 0x2df   : > { %3491 = vmatpush3.msra.mxu1 %v402_v23 }
 0x2e0   : > { %v1879_v12 = vpop.f32.mrf.mxu0 }
 0x2e1   : > { %v3438_v61 = vpop.f32.mrf.mxu1 }
 0x2e2   : > { %v1960_v21 = vadd.f32 %v3438_v61, %v3431_v0 }
 0x2e3   : > { %v1954_v30 = vpop.f32.mrf.mxu1 }
 0x2e4   : > { %v1955_v22 = vadd.f32 %v1954_v30, %v1879_v12  ;;  %v3445_v4 = vpop.f32.mrf.mxu0 }
 0x2e6   : > { %v2473_v25 = vpop.f32.mrf.mxu0  ;;  %3492 = vmatprep.mubr.msk.f32.mxu1 %vm1614_vm3, %v1955_v22 }
 0x2e7   : > { %v3452_v52 = vpop.f32.mrf.mxu1  ;;  %3493 = vmatmul.mubr.msk.f32.vlgmr.msra.gmra.mxu1 %vm1614_vm3, %v1960_v21 }
 0x2e8   : > { %v2562_v37 = vadd.f32 %v3452_v52, %v3445_v4 }
 0x2e9   : > { %v2556_v18 = vpop.f32.mrf.mxu1  ;;  %v3459_v41 = vpop.f32.mrf.mxu0 }
 0x2ea   : > { %v2557_v8 = vadd.f32 %v2556_v18, %v2473_v25 }
 0x2eb   : > { %v2671_v36 = vpop.f32.mrf.mxu0 }
 0x2ec   : > { %v3466_v45 = vpop.f32.mrf.mxu1  ;;  %3471 = vmatprep.mubr.msk.f32.mxu0 %vm1614_vm3, %v2557_v8 }
 0x2ed   : > { %3472 = vmatmul.mubr.msk.f32.vlgmr.msra.gmra.mxu0 %vm1614_vm3, %v2562_v37  ;;  %v2760_v43 = vadd.f32 %v3466_v45, %v3459_v41 }
 0x2ee   : > { %v2754_v20 = vpop.f32.mrf.mxu1  ;;  %3482 = vmatpush3.msra.mxu0 %v3329_v3 }
 0x2ef   : > { %v2755_v53 = vadd.f32 %v2754_v20, %v2671_v36  ;;  %3483 = vmatprep.subr.mxu0 %v3328_v49 }
 0x2f0   : > { %3484 = vmatpush3.msra.mxu0 %v3328_v49 }
 0x2f1   : > { %3485 = vmatprep.mubr.msk.f32.mxu0 %vm1614_vm3, %v2755_v53 }
 0x2f2   : > { %3486 = vmatmul.mubr.msk.f32.vlgmr.msra.gmra.mxu0 %vm1614_vm3, %v2760_v43 }
 0x39c   : > { %v3480_v24 = vpop.f32.mrf.mxu1 }
 0x39e   : > { %v2916_v7 = vpop.f32.mrf.mxu1 }
 0x3a7   : > { %v3494_v42 = vpop.f32.mrf.mxu1 }
 0x3a9   : > { %v3084_v10 = vpop.f32.mrf.mxu1 }
 0x3ad   : > { %v3473_v6 = vpop.f32.mrf.mxu0 }
 0x3ae   : > { %v2922_v51 = vadd.f32 %v3480_v24, %v3473_v6 }
 0x3af   : > { %v2835_v34 = vpop.f32.mrf.mxu0 }
 0x3b0   : > { %v3351_v13 = vclamps-f32 %v2922_v51, 6.027712  ;;  %v2917_v19 = vadd.f32 %v2916_v7, %v2835_v34 }
 0x3b2   : > { %2930 = vst [vmem:[%s251_s11 + $0x8] sm:$0x3f] %v3351_v13  ;;  %v3350_v55 = vclamps-f32 %v2917_v19, 6.027712  ;;  %v3487_v62 = vpop.f32.mrf.mxu0 }
 0x3b3   : > { %v3090_v33 = vadd.f32 %v3494_v42, %v3487_v62 }
 0x3b4   : > { %2929 = vst [vmem:[%s251_s11] sm:$0xff] %v3350_v55  ;;  %v3003_v5 = vpop.f32.mrf.mxu0 }
 0x3b5   : > { %v3357_v11 = vclamps-f32 %v3090_v33, 6.027712  ;;  %v3085_v50 = vadd.f32 %v3084_v10, %v3003_v5 }
 0x3b7   : > { %3359 = vst [vmem:[%s251_s11 + $0x18] sm:$0x3f] %v3357_v11  ;;  %v3356_v58 = vclamps-f32 %v3085_v50, 6.027712 }
 0x3b9   : > { %3358 = vst [vmem:[%s251_s11 + $0x10] sm:$0xff] %v3356_v58 }
 0x3ba PF: > { %s17_s18 = sadd.s32 1, %s3593_s18  }
 0x3bb   : > { %p14_p5 = scmp.ge.s32.totalorder %s17_s18, 4  }
 0x3bd   :  { %16 = sbr.rel (!%p14_p5) target bundleno = 2 (0x2), region = 85 }
 0x3c2   :  { %3121 = vsyncpa [#allocation3], 1 }
 0x3c3   :  { %3123 = vsyncpa [#allocation3 + $0x1], 1 }
 0x3c4   :  { %3124 = vsyncpa [#allocation5], 1 }

</bundles_post_ra>
